<compile_context>
chip_gen: v5e
topology: v5e:2x2
jax: 0.10.0
libtpu: 0.0.40
codegen_flags: <defaults>
</compile_context>

<pallas_src>
import math
import functools

import jax
import jax.numpy as jnp
import numpy as np
from jax.experimental import pallas as pl
from jax.experimental.pallas import tpu as pltpu

# ----- model hyper-parameters (module defaults, embed_dim picked small) -----
INPUT_DIM = 16
EMBED_DIM = 32            # constructor arg (default 64; small demo size)
NUM_HEADS = 4
NUM_LAYERS = 2
FF_DIM = 2048             # nn.TransformerEncoderLayer default dim_feedforward
HEAD_DIM = EMBED_DIM // NUM_HEADS
LN_EPS = 1e-5             # nn.TransformerEncoderLayer default layer_norm_eps

SEQ = 8
BATCH = 2


# ------------------------------ shared helpers ------------------------------
def _layer_norm(x, w, b):
    mu = jnp.mean(x, axis=-1, keepdims=True)
    var = jnp.mean((x - mu) ** 2, axis=-1, keepdims=True)
    return (x - mu) * jax.lax.rsqrt(var + LN_EPS) * w + b


# --------------------------------- kernel -----------------------------------
def transformer_kernel(x_ref, emb_wt_ref, emb_b_ref, pos_ref,
                       wq_ref, wk_ref, wv_ref,
                       bq_ref, bk_ref, bv_ref,
                       wo_ref, ob_ref,
                       ln1w_ref, ln1b_ref, ln2w_ref, ln2b_ref,
                       ff1wt_ref, ff1b_ref, ff2w_ref, ff2b_ref,
                       o_ref, *, batch, seq):
    E, H, hd = EMBED_DIM, NUM_HEADS, HEAD_DIM
    n = batch * seq

    x = x_ref[...]                                            # (N, D)
    # embedding: plain (N, D) @ (D, E) dot (lane-dense weight) + bias + pos
    h = jnp.dot(x, emb_wt_ref[...], preferred_element_type=jnp.float32)
    h = h + emb_b_ref[...] + pos_ref[...]                     # pos: (1, E) bcast

    # TODO(synk): dropout inside nn.TransformerEncoderLayer is omitted
    # (inference / eval semantics -> identity).
    for l in range(NUM_LAYERS):
        wq_l = wq_ref[l]          # (H, E, hd)  per-head, plain-dot orientation
        wk_l = wk_ref[l]          #             (scale already folded into Wq)
        wv_l = wv_ref[l]
        bq_l = bq_ref[l]          # (H, 1, hd)
        bk_l = bk_ref[l]
        bv_l = bv_ref[l]
        wo_l = wo_ref[l]          # (H, hd, E)  out-proj rows per head

        # multi-head self-attention, batched over B per head; no activation
        # lane slices, no concatenates (head outputs accumulated via out-proj).
        attn = jnp.broadcast_to(ob_ref[l], (n, E)).astype(jnp.float32)
        for hh in range(H):
            q = jnp.dot(h, wq_l[hh], preferred_element_type=jnp.float32) + bq_l[hh]
            k = jnp.dot(h, wk_l[hh], preferred_element_type=jnp.float32) + bk_l[hh]
            v = jnp.dot(h, wv_l[hh], preferred_element_type=jnp.float32) + bv_l[hh]
            q3 = q.reshape(batch, seq, hd)      # leading-axis split: free
            k3 = k.reshape(batch, seq, hd)
            v3 = v.reshape(batch, seq, hd)
            s = jnp.einsum('bqd,bkd->bqk', q3, k3,
                           preferred_element_type=jnp.float32)
            s = s - jnp.max(s, axis=-1, keepdims=True)
            p = jnp.exp(s)
            p = p * pl.reciprocal(jnp.sum(p, axis=-1, keepdims=True),
                                  approx=False)
            ctx = jnp.einsum('bqk,bkd->bqd', p, v3,
                             preferred_element_type=jnp.float32)
            attn = attn + jnp.dot(ctx.reshape(n, hd), wo_l[hh],
                                  preferred_element_type=jnp.float32)
        h = _layer_norm(h + attn, ln1w_ref[l], ln1b_ref[l])   # post-norm

        # FFN: ff1 weight pre-transposed to lane-dense (E, F); plain dot.
        ff = jnp.dot(h, ff1wt_ref[l],
                     preferred_element_type=jnp.float32) + ff1b_ref[l]
        ff = jnp.maximum(ff, 0.0)                              # relu
        # ff2 kept in its lane-dense (E, F) PyTorch layout; contract over F.
        ff = jax.lax.dot_general(ff, ff2w_ref[l], (((1,), (1,)), ((), ())),
                                 preferred_element_type=jnp.float32) + ff2b_ref[l]
        h = _layer_norm(h + ff, ln2w_ref[l], ln2b_ref[l])

    o_ref[...] = h.astype(o_ref.dtype)                         # (N, E)


# --------------------- host-side weight re-packing --------------------------
def pack_params(P):
    """Repack PyTorch-layout params into kernel-friendly (lane-dense) layouts."""
    E, H, hd, L = EMBED_DIM, NUM_HEADS, HEAD_DIM, NUM_LAYERS
    in_w, in_b = P['in_w'], P['in_b']            # (L, 3E, E), (L, 1, 3E)
    scale = 1.0 / math.sqrt(hd)

    def per_head_w(w):                            # (L, E, E) -> (L, H, E, hd)
        return jnp.transpose(w.reshape(L, H, hd, E), (0, 1, 3, 2))

    def per_head_b(b):                            # (L, 1, E) -> (L, H, 1, hd)
        return b.reshape(L, H, 1, hd)

    return dict(
        emb_wt=P['emb_w'].T,                                  # (D, E)
        emb_b=P['emb_b'], pos=P['pos'],
        # attention scale folded into Q (matches PyTorch's q-scaling).
        wq=per_head_w(in_w[:, 0:E, :]) * scale,
        wk=per_head_w(in_w[:, E:2 * E, :]),
        wv=per_head_w(in_w[:, 2 * E:3 * E, :]),
        bq=per_head_b(in_b[:, :, 0:E]) * scale,
        bk=per_head_b(in_b[:, :, E:2 * E]),
        bv=per_head_b(in_b[:, :, 2 * E:3 * E]),
        wo=jnp.transpose(P['out_w'], (0, 2, 1)).reshape(L, H, hd, E),
        ob=P['out_b'],
        ln1w=P['ln1_w'], ln1b=P['ln1_b'], ln2w=P['ln2_w'], ln2b=P['ln2_b'],
        ff1wt=jnp.transpose(P['ff1_w'], (0, 2, 1)),           # (L, E, F)
        ff1b=P['ff1_b'], ff2w=P['ff2_w'], ff2b=P['ff2_b'],
    )


# --------------------------------- wrapper ----------------------------------
def gaussian_transformer_forward(x_sbd, params):
    S, B, Din = x_sbd.shape
    N = S * B
    x_flat = jnp.transpose(x_sbd, (1, 0, 2)).reshape(N, Din)
    kp = pack_params(params)

    args = (x_flat, kp['emb_wt'], kp['emb_b'], kp['pos'],
            kp['wq'], kp['wk'], kp['wv'], kp['bq'], kp['bk'], kp['bv'],
            kp['wo'], kp['ob'],
            kp['ln1w'], kp['ln1b'], kp['ln2w'], kp['ln2b'],
            kp['ff1wt'], kp['ff1b'], kp['ff2w'], kp['ff2b'])

    kernel = functools.partial(transformer_kernel, batch=B, seq=S)
    # No grid at this size (~1.5 MiB resident, N=16): single block, whole
    # arrays in VMEM.  Add a parallel row grid only if B*S grows.
    h = pl.pallas_call(
        kernel,
        out_shape=jax.ShapeDtypeStruct((N, EMBED_DIM), jnp.float32),
        in_specs=[pl.BlockSpec(memory_space=pltpu.MemorySpace.VMEM)] * len(args),
        out_specs=pl.BlockSpec(memory_space=pltpu.MemorySpace.VMEM),
    )(*args)

    # Final E->1 decoder projection in the wrapper so the kernel's store stays
    # lane-dense (perf review); trivial GEMV, fused by XLA with the reshape.
    out = h @ params['dec_w'].T + params['dec_b']             # (N, 1)
    return jnp.transpose(out.reshape(B, S, 1), (1, 0, 2))     # (S, B, 1)


# ------------------------- deterministic parameters -------------------------
def init_params(key):
    ks = jax.random.split(key, 12)
    E, D, F, L = EMBED_DIM, INPUT_DIM, FF_DIM, NUM_LAYERS

    def nrm(k, shape, scale=0.05):
        return (scale * jax.random.normal(k, shape)).astype(jnp.float32)

    return dict(
        emb_w=nrm(ks[0], (E, D)),
        emb_b=nrm(ks[1], (1, E)),
        pos=jnp.zeros((1, E), jnp.float32),   # nn.Parameter(torch.zeros(1, E))
        in_w=nrm(ks[2], (L, 3 * E, E)),       # MHA in_proj_weight per layer
        in_b=nrm(ks[3], (L, 1, 3 * E)),
        out_w=nrm(ks[4], (L, E, E)),          # MHA out_proj per layer
        out_b=nrm(ks[5], (L, 1, E)),
        ln1_w=jnp.ones((L, 1, E), jnp.float32),
        ln1_b=jnp.zeros((L, 1, E), jnp.float32),
        ln2_w=jnp.ones((L, 1, E), jnp.float32),
        ln2_b=jnp.zeros((L, 1, E), jnp.float32),
        ff1_w=nrm(ks[6], (L, F, E)),
        ff1_b=nrm(ks[7], (L, 1, F)),
        ff2_w=nrm(ks[8], (L, E, F)),
        ff2_b=nrm(ks[9], (L, 1, E)),
        dec_w=nrm(ks[10], (1, E)),
        dec_b=nrm(ks[11], (1, 1)),
    )


# ------------------------- pure-JAX reference check -------------------------
def reference_forward(x_sbd, P):
    x = jnp.transpose(x_sbd, (1, 0, 2))                  # (B, S, Din)
    B, S, _ = x.shape
    E, H, hd = EMBED_DIM, NUM_HEADS, HEAD_DIM
    h = jnp.einsum('bsd,ed->bse', x, P['emb_w']) + P['emb_b'][0]
    h = h + P['pos'][0]
    for l in range(NUM_LAYERS):
        inw, inb = P['in_w'][l], P['in_b'][l, 0]
        q = jnp.einsum('bse,fe->bsf', h, inw[:E]) + inb[:E]
        k = jnp.einsum('bse,fe->bsf', h, inw[E:2 * E]) + inb[E:2 * E]
        v = jnp.einsum('bse,fe->bsf', h, inw[2 * E:]) + inb[2 * E:]
        q = q.reshape(B, S, H, hd)
        k = k.reshape(B, S, H, hd)
        v = v.reshape(B, S, H, hd)
        scores = jnp.einsum('bqhd,bkhd->bhqk', q, k) / math.sqrt(hd)
        p = jax.nn.softmax(scores, axis=-1)
        ctx = jnp.einsum('bhqk,bkhd->bqhd', p, v).reshape(B, S, E)
        attn = jnp.einsum('bse,fe->bsf', ctx, P['out_w'][l]) + P['out_b'][l, 0]
        h = _layer_norm(h + attn, P['ln1_w'][l, 0], P['ln1_b'][l, 0])
        ff = jnp.einsum('bse,fe->bsf', h, P['ff1_w'][l]) + P['ff1_b'][l, 0]
        ff = jnp.maximum(ff, 0.0)
        ff = jnp.einsum('bsf,ef->bse', ff, P['ff2_w'][l]) + P['ff2_b'][l, 0]
        h = _layer_norm(h + ff, P['ln2_w'][l, 0], P['ln2_b'][l, 0])
    out = jnp.einsum('bse,oe->bso', h, P['dec_w']) + P['dec_b'][0]
    return jnp.transpose(out, (1, 0, 2))                 # (S, B, 1)


if __name__ == "__main__":
    key = jax.random.PRNGKey(0)
    pkey, xkey = jax.random.split(key)
    params = init_params(pkey)
    x = jax.random.normal(xkey, (SEQ, BATCH, INPUT_DIM), dtype=jnp.float32)

    out = gaussian_transformer_forward(x, params)
    out = jax.block_until_ready(out)
    assert out.shape == (SEQ, BATCH, 1)

    ref = reference_forward(x, params)
    np.testing.assert_allclose(np.asarray(out), np.asarray(ref),
                               rtol=1e-4, atol=1e-4)
    print("KERNEL_OK")
</pallas_src>

<mosaic_0001>
module attributes {stable_mosaic.version = 11 : i64} {
  func.func @transformer_kernel(%arg0: memref<16x16xf32, #tpu.memory_space<vmem>>, %arg1: memref<16x32xf32, #tpu.memory_space<vmem>>, %arg2: memref<1x32xf32, #tpu.memory_space<vmem>>, %arg3: memref<1x32xf32, #tpu.memory_space<vmem>>, %arg4: memref<2x4x32x8xf32, #tpu.memory_space<vmem>>, %arg5: memref<2x4x32x8xf32, #tpu.memory_space<vmem>>, %arg6: memref<2x4x32x8xf32, #tpu.memory_space<vmem>>, %arg7: memref<2x4x1x8xf32, #tpu.memory_space<vmem>>, %arg8: memref<2x4x1x8xf32, #tpu.memory_space<vmem>>, %arg9: memref<2x4x1x8xf32, #tpu.memory_space<vmem>>, %arg10: memref<2x4x8x32xf32, #tpu.memory_space<vmem>>, %arg11: memref<2x1x32xf32, #tpu.memory_space<vmem>>, %arg12: memref<2x1x32xf32, #tpu.memory_space<vmem>>, %arg13: memref<2x1x32xf32, #tpu.memory_space<vmem>>, %arg14: memref<2x1x32xf32, #tpu.memory_space<vmem>>, %arg15: memref<2x1x32xf32, #tpu.memory_space<vmem>>, %arg16: memref<2x32x2048xf32, #tpu.memory_space<vmem>>, %arg17: memref<2x1x2048xf32, #tpu.memory_space<vmem>>, %arg18: memref<2x32x2048xf32, #tpu.memory_space<vmem>>, %arg19: memref<2x1x32xf32, #tpu.memory_space<vmem>>, %arg20: memref<16x32xf32, #tpu.memory_space<vmem>>) attributes {dimension_semantics = [], scalar_prefetch = 0 : i64, scratch_operands = 0 : i64, tpu.core_type = #tpu.core_type<tc>} {
    %c0 = arith.constant 0 : index
    %c0_0 = arith.constant 0 : index
    %0 = vector.load %arg0[%c0, %c0_0] : memref<16x16xf32, #tpu.memory_space<vmem>>, vector<16x16xf32>
    %c0_1 = arith.constant 0 : index
    %c0_2 = arith.constant 0 : index
    %1 = vector.load %arg1[%c0_1, %c0_2] : memref<16x32xf32, #tpu.memory_space<vmem>>, vector<16x32xf32>
    %cst = arith.constant dense<0.000000e+00> : vector<16x32xf32>
    %2 = tpu.matmul %0, %1, %cst {dimension_numbers = #tpu.dot_dimension_numbers<[1], [0], [0], [1], [0, 0, 1, 1], [], []>} : vector<16x16xf32>, vector<16x32xf32>, vector<16x32xf32> -> vector<16x32xf32>
    %c0_3 = arith.constant 0 : index
    %c0_4 = arith.constant 0 : index
    %3 = vector.load %arg2[%c0_3, %c0_4] : memref<1x32xf32, #tpu.memory_space<vmem>>, vector<1x32xf32>
    %4 = vector.broadcast %3 : vector<1x32xf32> to vector<16x32xf32>
    %5 = arith.addf %2, %4 : vector<16x32xf32>
    %c0_5 = arith.constant 0 : index
    %c0_6 = arith.constant 0 : index
    %6 = vector.load %arg3[%c0_5, %c0_6] : memref<1x32xf32, #tpu.memory_space<vmem>>, vector<1x32xf32>
    %7 = vector.broadcast %6 : vector<1x32xf32> to vector<16x32xf32>
    %8 = arith.addf %5, %7 : vector<16x32xf32>
    %c0_7 = arith.constant 0 : index
    %c0_8 = arith.constant 0 : index
    %c0_9 = arith.constant 0 : index
    %c0_10 = arith.constant 0 : index
    %9 = vector.load %arg4[%c0_7, %c0_8, %c0_9, %c0_10] : memref<2x4x32x8xf32, #tpu.memory_space<vmem>>, vector<1x4x32x8xf32>
    %10 = vector.shape_cast %9 : vector<1x4x32x8xf32> to vector<4x32x8xf32>
    %c0_11 = arith.constant 0 : index
    %c0_12 = arith.constant 0 : index
    %c0_13 = arith.constant 0 : index
    %c0_14 = arith.constant 0 : index
    %11 = vector.load %arg5[%c0_11, %c0_12, %c0_13, %c0_14] : memref<2x4x32x8xf32, #tpu.memory_space<vmem>>, vector<1x4x32x8xf32>
    %12 = vector.shape_cast %11 : vector<1x4x32x8xf32> to vector<4x32x8xf32>
    %c0_15 = arith.constant 0 : index
    %c0_16 = arith.constant 0 : index
    %c0_17 = arith.constant 0 : index
    %c0_18 = arith.constant 0 : index
    %13 = vector.load %arg6[%c0_15, %c0_16, %c0_17, %c0_18] : memref<2x4x32x8xf32, #tpu.memory_space<vmem>>, vector<1x4x32x8xf32>
    %14 = vector.shape_cast %13 : vector<1x4x32x8xf32> to vector<4x32x8xf32>
    %c0_19 = arith.constant 0 : index
    %c0_20 = arith.constant 0 : index
    %c0_21 = arith.constant 0 : index
    %c0_22 = arith.constant 0 : index
    %15 = vector.load %arg7[%c0_19, %c0_20, %c0_21, %c0_22] : memref<2x4x1x8xf32, #tpu.memory_space<vmem>>, vector<1x4x1x8xf32>
    %16 = vector.shape_cast %15 : vector<1x4x1x8xf32> to vector<4x1x8xf32>
    %c0_23 = arith.constant 0 : index
    %c0_24 = arith.constant 0 : index
    %c0_25 = arith.constant 0 : index
    %c0_26 = arith.constant 0 : index
    %17 = vector.load %arg8[%c0_23, %c0_24, %c0_25, %c0_26] : memref<2x4x1x8xf32, #tpu.memory_space<vmem>>, vector<1x4x1x8xf32>
    %18 = vector.shape_cast %17 : vector<1x4x1x8xf32> to vector<4x1x8xf32>
    %c0_27 = arith.constant 0 : index
    %c0_28 = arith.constant 0 : index
    %c0_29 = arith.constant 0 : index
    %c0_30 = arith.constant 0 : index
    %19 = vector.load %arg9[%c0_27, %c0_28, %c0_29, %c0_30] : memref<2x4x1x8xf32, #tpu.memory_space<vmem>>, vector<1x4x1x8xf32>
    %20 = vector.shape_cast %19 : vector<1x4x1x8xf32> to vector<4x1x8xf32>
    %c0_31 = arith.constant 0 : index
    %c0_32 = arith.constant 0 : index
    %c0_33 = arith.constant 0 : index
    %c0_34 = arith.constant 0 : index
    %21 = vector.load %arg10[%c0_31, %c0_32, %c0_33, %c0_34] : memref<2x4x8x32xf32, #tpu.memory_space<vmem>>, vector<1x4x8x32xf32>
    %22 = vector.shape_cast %21 : vector<1x4x8x32xf32> to vector<4x8x32xf32>
    %c0_35 = arith.constant 0 : index
    %c0_36 = arith.constant 0 : index
    %c0_37 = arith.constant 0 : index
    %23 = vector.load %arg11[%c0_35, %c0_36, %c0_37] : memref<2x1x32xf32, #tpu.memory_space<vmem>>, vector<1x1x32xf32>
    %24 = vector.shape_cast %23 : vector<1x1x32xf32> to vector<1x32xf32>
    %25 = vector.shape_cast %24 : vector<1x32xf32> to vector<1x32xf32>
    %26 = vector.broadcast %25 : vector<1x32xf32> to vector<16x32xf32>
    %27 = vector.extract_strided_slice %10 {offsets = [0, 0, 0], sizes = [1, 32, 8], strides = [1, 1, 1]} : vector<4x32x8xf32> to vector<1x32x8xf32>
    %28 = vector.shape_cast %27 : vector<1x32x8xf32> to vector<32x8xf32>
    %cst_38 = arith.constant dense<0.000000e+00> : vector<16x8xf32>
    %29 = tpu.matmul %8, %28, %cst_38 {dimension_numbers = #tpu.dot_dimension_numbers<[1], [0], [0], [1], [0, 0, 1, 1], [], []>} : vector<16x32xf32>, vector<32x8xf32>, vector<16x8xf32> -> vector<16x8xf32>
    %30 = vector.extract_strided_slice %16 {offsets = [0, 0, 0], sizes = [1, 1, 8], strides = [1, 1, 1]} : vector<4x1x8xf32> to vector<1x1x8xf32>
    %31 = vector.shape_cast %30 : vector<1x1x8xf32> to vector<1x8xf32>
    %32 = vector.broadcast %31 : vector<1x8xf32> to vector<16x8xf32>
    %33 = arith.addf %29, %32 : vector<16x8xf32>
    %34 = vector.extract_strided_slice %12 {offsets = [0, 0, 0], sizes = [1, 32, 8], strides = [1, 1, 1]} : vector<4x32x8xf32> to vector<1x32x8xf32>
    %35 = vector.shape_cast %34 : vector<1x32x8xf32> to vector<32x8xf32>
    %cst_39 = arith.constant dense<0.000000e+00> : vector<16x8xf32>
    %36 = tpu.matmul %8, %35, %cst_39 {dimension_numbers = #tpu.dot_dimension_numbers<[1], [0], [0], [1], [0, 0, 1, 1], [], []>} : vector<16x32xf32>, vector<32x8xf32>, vector<16x8xf32> -> vector<16x8xf32>
    %37 = vector.extract_strided_slice %18 {offsets = [0, 0, 0], sizes = [1, 1, 8], strides = [1, 1, 1]} : vector<4x1x8xf32> to vector<1x1x8xf32>
    %38 = vector.shape_cast %37 : vector<1x1x8xf32> to vector<1x8xf32>
    %39 = vector.broadcast %38 : vector<1x8xf32> to vector<16x8xf32>
    %40 = arith.addf %36, %39 : vector<16x8xf32>
    %41 = vector.extract_strided_slice %14 {offsets = [0, 0, 0], sizes = [1, 32, 8], strides = [1, 1, 1]} : vector<4x32x8xf32> to vector<1x32x8xf32>
    %42 = vector.shape_cast %41 : vector<1x32x8xf32> to vector<32x8xf32>
    %cst_40 = arith.constant dense<0.000000e+00> : vector<16x8xf32>
    %43 = tpu.matmul %8, %42, %cst_40 {dimension_numbers = #tpu.dot_dimension_numbers<[1], [0], [0], [1], [0, 0, 1, 1], [], []>} : vector<16x32xf32>, vector<32x8xf32>, vector<16x8xf32> -> vector<16x8xf32>
    %44 = vector.extract_strided_slice %20 {offsets = [0, 0, 0], sizes = [1, 1, 8], strides = [1, 1, 1]} : vector<4x1x8xf32> to vector<1x1x8xf32>
    %45 = vector.shape_cast %44 : vector<1x1x8xf32> to vector<1x8xf32>
    %46 = vector.broadcast %45 : vector<1x8xf32> to vector<16x8xf32>
    %47 = arith.addf %43, %46 : vector<16x8xf32>
    %48 = vector.shape_cast %33 : vector<16x8xf32> to vector<2x8x8xf32>
    %49 = vector.shape_cast %40 : vector<16x8xf32> to vector<2x8x8xf32>
    %50 = vector.shape_cast %47 : vector<16x8xf32> to vector<2x8x8xf32>
    "tpu.trace_start"() <{level = 10 : i32, message = "bqd,bkd->bqk"}> : () -> ()
    %cst_41 = arith.constant dense<0.000000e+00> : vector<2x8x8xf32>
    %51 = tpu.matmul %48, %49, %cst_41 {dimension_numbers = #tpu.dot_dimension_numbers<[2], [2], [1], [1], [0, 0, 0, 1, 1, 1], [0], [0]>} : vector<2x8x8xf32>, vector<2x8x8xf32>, vector<2x8x8xf32> -> vector<2x8x8xf32>
    "tpu.trace_stop"() : () -> ()
    %cst_42 = arith.constant dense<0xFF800000> : vector<2x8xf32>
    %52 = vector.multi_reduction <maximumf>, %51, %cst_42 [2] : vector<2x8x8xf32> to vector<2x8xf32>
    %53 = vector.shape_cast %52 : vector<2x8xf32> to vector<2x8x1xf32>
    %54 = vector.broadcast %53 : vector<2x8x1xf32> to vector<2x8x8xf32>
    %55 = arith.subf %51, %54 : vector<2x8x8xf32>
    %56 = math.exp %55 : vector<2x8x8xf32>
    %cst_43 = arith.constant dense<0.000000e+00> : vector<2x8xf32>
    %57 = vector.multi_reduction <add>, %56, %cst_43 [2] : vector<2x8x8xf32> to vector<2x8xf32>
    %58 = vector.shape_cast %57 : vector<2x8xf32> to vector<2x8x1xf32>
    %59 = tpu.reciprocal %58 : vector<2x8x1xf32> -> vector<2x8x1xf32>
    %60 = vector.broadcast %59 : vector<2x8x1xf32> to vector<2x8x8xf32>
    %61 = arith.mulf %56, %60 : vector<2x8x8xf32>
    "tpu.trace_start"() <{level = 10 : i32, message = "bqk,bkd->bqd"}> : () -> ()
    %cst_44 = arith.constant dense<0.000000e+00> : vector<2x8x8xf32>
    %62 = tpu.matmul %61, %50, %cst_44 {dimension_numbers = #tpu.dot_dimension_numbers<[2], [1], [1], [2], [0, 0, 0, 1, 1, 2], [0], [0]>} : vector<2x8x8xf32>, vector<2x8x8xf32>, vector<2x8x8xf32> -> vector<2x8x8xf32>
    "tpu.trace_stop"() : () -> ()
    %63 = vector.shape_cast %62 : vector<2x8x8xf32> to vector<16x8xf32>
    %64 = vector.extract_strided_slice %22 {offsets = [0, 0, 0], sizes = [1, 8, 32], strides = [1, 1, 1]} : vector<4x8x32xf32> to vector<1x8x32xf32>
    %65 = vector.shape_cast %64 : vector<1x8x32xf32> to vector<8x32xf32>
    %cst_45 = arith.constant dense<0.000000e+00> : vector<16x32xf32>
    %66 = tpu.matmul %63, %65, %cst_45 {dimension_numbers = #tpu.dot_dimension_numbers<[1], [0], [0], [1], [0, 0, 1, 1], [], []>} : vector<16x8xf32>, vector<8x32xf32>, vector<16x32xf32> -> vector<16x32xf32>
    %67 = arith.addf %26, %66 : vector<16x32xf32>
    %68 = vector.extract_strided_slice %10 {offsets = [1, 0, 0], sizes = [1, 32, 8], strides = [1, 1, 1]} : vector<4x32x8xf32> to vector<1x32x8xf32>
    %69 = vector.shape_cast %68 : vector<1x32x8xf32> to vector<32x8xf32>
    %cst_46 = arith.constant dense<0.000000e+00> : vector<16x8xf32>
    %70 = tpu.matmul %8, %69, %cst_46 {dimension_numbers = #tpu.dot_dimension_numbers<[1], [0], [0], [1], [0, 0, 1, 1], [], []>} : vector<16x32xf32>, vector<32x8xf32>, vector<16x8xf32> -> vector<16x8xf32>
    %71 = vector.extract_strided_slice %16 {offsets = [1, 0, 0], sizes = [1, 1, 8], strides = [1, 1, 1]} : vector<4x1x8xf32> to vector<1x1x8xf32>
    %72 = vector.shape_cast %71 : vector<1x1x8xf32> to vector<1x8xf32>
    %73 = vector.broadcast %72 : vector<1x8xf32> to vector<16x8xf32>
    %74 = arith.addf %70, %73 : vector<16x8xf32>
    %75 = vector.extract_strided_slice %12 {offsets = [1, 0, 0], sizes = [1, 32, 8], strides = [1, 1, 1]} : vector<4x32x8xf32> to vector<1x32x8xf32>
    %76 = vector.shape_cast %75 : vector<1x32x8xf32> to vector<32x8xf32>
    %cst_47 = arith.constant dense<0.000000e+00> : vector<16x8xf32>
    %77 = tpu.matmul %8, %76, %cst_47 {dimension_numbers = #tpu.dot_dimension_numbers<[1], [0], [0], [1], [0, 0, 1, 1], [], []>} : vector<16x32xf32>, vector<32x8xf32>, vector<16x8xf32> -> vector<16x8xf32>
    %78 = vector.extract_strided_slice %18 {offsets = [1, 0, 0], sizes = [1, 1, 8], strides = [1, 1, 1]} : vector<4x1x8xf32> to vector<1x1x8xf32>
    %79 = vector.shape_cast %78 : vector<1x1x8xf32> to vector<1x8xf32>
    %80 = vector.broadcast %79 : vector<1x8xf32> to vector<16x8xf32>
    %81 = arith.addf %77, %80 : vector<16x8xf32>
    %82 = vector.extract_strided_slice %14 {offsets = [1, 0, 0], sizes = [1, 32, 8], strides = [1, 1, 1]} : vector<4x32x8xf32> to vector<1x32x8xf32>
    %83 = vector.shape_cast %82 : vector<1x32x8xf32> to vector<32x8xf32>
    %cst_48 = arith.constant dense<0.000000e+00> : vector<16x8xf32>
    %84 = tpu.matmul %8, %83, %cst_48 {dimension_numbers = #tpu.dot_dimension_numbers<[1], [0], [0], [1], [0, 0, 1, 1], [], []>} : vector<16x32xf32>, vector<32x8xf32>, vector<16x8xf32> -> vector<16x8xf32>
    %85 = vector.extract_strided_slice %20 {offsets = [1, 0, 0], sizes = [1, 1, 8], strides = [1, 1, 1]} : vector<4x1x8xf32> to vector<1x1x8xf32>
    %86 = vector.shape_cast %85 : vector<1x1x8xf32> to vector<1x8xf32>
    %87 = vector.broadcast %86 : vector<1x8xf32> to vector<16x8xf32>
    %88 = arith.addf %84, %87 : vector<16x8xf32>
    %89 = vector.shape_cast %74 : vector<16x8xf32> to vector<2x8x8xf32>
    %90 = vector.shape_cast %81 : vector<16x8xf32> to vector<2x8x8xf32>
    %91 = vector.shape_cast %88 : vector<16x8xf32> to vector<2x8x8xf32>
    "tpu.trace_start"() <{level = 10 : i32, message = "bqd,bkd->bqk"}> : () -> ()
    %cst_49 = arith.constant dense<0.000000e+00> : vector<2x8x8xf32>
    %92 = tpu.matmul %89, %90, %cst_49 {dimension_numbers = #tpu.dot_dimension_numbers<[2], [2], [1], [1], [0, 0, 0, 1, 1, 1], [0], [0]>} : vector<2x8x8xf32>, vector<2x8x8xf32>, vector<2x8x8xf32> -> vector<2x8x8xf32>
    "tpu.trace_stop"() : () -> ()
    %cst_50 = arith.constant dense<0xFF800000> : vector<2x8xf32>
    %93 = vector.multi_reduction <maximumf>, %92, %cst_50 [2] : vector<2x8x8xf32> to vector<2x8xf32>
    %94 = vector.shape_cast %93 : vector<2x8xf32> to vector<2x8x1xf32>
    %95 = vector.broadcast %94 : vector<2x8x1xf32> to vector<2x8x8xf32>
    %96 = arith.subf %92, %95 : vector<2x8x8xf32>
    %97 = math.exp %96 : vector<2x8x8xf32>
    %cst_51 = arith.constant dense<0.000000e+00> : vector<2x8xf32>
    %98 = vector.multi_reduction <add>, %97, %cst_51 [2] : vector<2x8x8xf32> to vector<2x8xf32>
    %99 = vector.shape_cast %98 : vector<2x8xf32> to vector<2x8x1xf32>
    %100 = tpu.reciprocal %99 : vector<2x8x1xf32> -> vector<2x8x1xf32>
    %101 = vector.broadcast %100 : vector<2x8x1xf32> to vector<2x8x8xf32>
    %102 = arith.mulf %97, %101 : vector<2x8x8xf32>
    "tpu.trace_start"() <{level = 10 : i32, message = "bqk,bkd->bqd"}> : () -> ()
    %cst_52 = arith.constant dense<0.000000e+00> : vector<2x8x8xf32>
    %103 = tpu.matmul %102, %91, %cst_52 {dimension_numbers = #tpu.dot_dimension_numbers<[2], [1], [1], [2], [0, 0, 0, 1, 1, 2], [0], [0]>} : vector<2x8x8xf32>, vector<2x8x8xf32>, vector<2x8x8xf32> -> vector<2x8x8xf32>
    "tpu.trace_stop"() : () -> ()
    %104 = vector.shape_cast %103 : vector<2x8x8xf32> to vector<16x8xf32>
    %105 = vector.extract_strided_slice %22 {offsets = [1, 0, 0], sizes = [1, 8, 32], strides = [1, 1, 1]} : vector<4x8x32xf32> to vector<1x8x32xf32>
    %106 = vector.shape_cast %105 : vector<1x8x32xf32> to vector<8x32xf32>
    %cst_53 = arith.constant dense<0.000000e+00> : vector<16x32xf32>
    %107 = tpu.matmul %104, %106, %cst_53 {dimension_numbers = #tpu.dot_dimension_numbers<[1], [0], [0], [1], [0, 0, 1, 1], [], []>} : vector<16x8xf32>, vector<8x32xf32>, vector<16x32xf32> -> vector<16x32xf32>
    %108 = arith.addf %67, %107 : vector<16x32xf32>
    %109 = vector.extract_strided_slice %10 {offsets = [2, 0, 0], sizes = [1, 32, 8], strides = [1, 1, 1]} : vector<4x32x8xf32> to vector<1x32x8xf32>
    %110 = vector.shape_cast %109 : vector<1x32x8xf32> to vector<32x8xf32>
    %cst_54 = arith.constant dense<0.000000e+00> : vector<16x8xf32>
    %111 = tpu.matmul %8, %110, %cst_54 {dimension_numbers = #tpu.dot_dimension_numbers<[1], [0], [0], [1], [0, 0, 1, 1], [], []>} : vector<16x32xf32>, vector<32x8xf32>, vector<16x8xf32> -> vector<16x8xf32>
    %112 = vector.extract_strided_slice %16 {offsets = [2, 0, 0], sizes = [1, 1, 8], strides = [1, 1, 1]} : vector<4x1x8xf32> to vector<1x1x8xf32>
    %113 = vector.shape_cast %112 : vector<1x1x8xf32> to vector<1x8xf32>
    %114 = vector.broadcast %113 : vector<1x8xf32> to vector<16x8xf32>
    %115 = arith.addf %111, %114 : vector<16x8xf32>
    %116 = vector.extract_strided_slice %12 {offsets = [2, 0, 0], sizes = [1, 32, 8], strides = [1, 1, 1]} : vector<4x32x8xf32> to vector<1x32x8xf32>
    %117 = vector.shape_cast %116 : vector<1x32x8xf32> to vector<32x8xf32>
    %cst_55 = arith.constant dense<0.000000e+00> : vector<16x8xf32>
    %118 = tpu.matmul %8, %117, %cst_55 {dimension_numbers = #tpu.dot_dimension_numbers<[1], [0], [0], [1], [0, 0, 1, 1], [], []>} : vector<16x32xf32>, vector<32x8xf32>, vector<16x8xf32> -> vector<16x8xf32>
    %119 = vector.extract_strided_slice %18 {offsets = [2, 0, 0], sizes = [1, 1, 8], strides = [1, 1, 1]} : vector<4x1x8xf32> to vector<1x1x8xf32>
    %120 = vector.shape_cast %119 : vector<1x1x8xf32> to vector<1x8xf32>
    %121 = vector.broadcast %120 : vector<1x8xf32> to vector<16x8xf32>
    %122 = arith.addf %118, %121 : vector<16x8xf32>
    %123 = vector.extract_strided_slice %14 {offsets = [2, 0, 0], sizes = [1, 32, 8], strides = [1, 1, 1]} : vector<4x32x8xf32> to vector<1x32x8xf32>
    %124 = vector.shape_cast %123 : vector<1x32x8xf32> to vector<32x8xf32>
    %cst_56 = arith.constant dense<0.000000e+00> : vector<16x8xf32>
    %125 = tpu.matmul %8, %124, %cst_56 {dimension_numbers = #tpu.dot_dimension_numbers<[1], [0], [0], [1], [0, 0, 1, 1], [], []>} : vector<16x32xf32>, vector<32x8xf32>, vector<16x8xf32> -> vector<16x8xf32>
    %126 = vector.extract_strided_slice %20 {offsets = [2, 0, 0], sizes = [1, 1, 8], strides = [1, 1, 1]} : vector<4x1x8xf32> to vector<1x1x8xf32>
    %127 = vector.shape_cast %126 : vector<1x1x8xf32> to vector<1x8xf32>
    %128 = vector.broadcast %127 : vector<1x8xf32> to vector<16x8xf32>
    %129 = arith.addf %125, %128 : vector<16x8xf32>
    %130 = vector.shape_cast %115 : vector<16x8xf32> to vector<2x8x8xf32>
    %131 = vector.shape_cast %122 : vector<16x8xf32> to vector<2x8x8xf32>
    %132 = vector.shape_cast %129 : vector<16x8xf32> to vector<2x8x8xf32>
    "tpu.trace_start"() <{level = 10 : i32, message = "bqd,bkd->bqk"}> : () -> ()
    %cst_57 = arith.constant dense<0.000000e+00> : vector<2x8x8xf32>
    %133 = tpu.matmul %130, %131, %cst_57 {dimension_numbers = #tpu.dot_dimension_numbers<[2], [2], [1], [1], [0, 0, 0, 1, 1, 1], [0], [0]>} : vector<2x8x8xf32>, vector<2x8x8xf32>, vector<2x8x8xf32> -> vector<2x8x8xf32>
    "tpu.trace_stop"() : () -> ()
    %cst_58 = arith.constant dense<0xFF800000> : vector<2x8xf32>
    %134 = vector.multi_reduction <maximumf>, %133, %cst_58 [2] : vector<2x8x8xf32> to vector<2x8xf32>
    %135 = vector.shape_cast %134 : vector<2x8xf32> to vector<2x8x1xf32>
    %136 = vector.broadcast %135 : vector<2x8x1xf32> to vector<2x8x8xf32>
    %137 = arith.subf %133, %136 : vector<2x8x8xf32>
    %138 = math.exp %137 : vector<2x8x8xf32>
    %cst_59 = arith.constant dense<0.000000e+00> : vector<2x8xf32>
    %139 = vector.multi_reduction <add>, %138, %cst_59 [2] : vector<2x8x8xf32> to vector<2x8xf32>
    %140 = vector.shape_cast %139 : vector<2x8xf32> to vector<2x8x1xf32>
    %141 = tpu.reciprocal %140 : vector<2x8x1xf32> -> vector<2x8x1xf32>
    %142 = vector.broadcast %141 : vector<2x8x1xf32> to vector<2x8x8xf32>
    %143 = arith.mulf %138, %142 : vector<2x8x8xf32>
    "tpu.trace_start"() <{level = 10 : i32, message = "bqk,bkd->bqd"}> : () -> ()
    %cst_60 = arith.constant dense<0.000000e+00> : vector<2x8x8xf32>
    %144 = tpu.matmul %143, %132, %cst_60 {dimension_numbers = #tpu.dot_dimension_numbers<[2], [1], [1], [2], [0, 0, 0, 1, 1, 2], [0], [0]>} : vector<2x8x8xf32>, vector<2x8x8xf32>, vector<2x8x8xf32> -> vector<2x8x8xf32>
    "tpu.trace_stop"() : () -> ()
    %145 = vector.shape_cast %144 : vector<2x8x8xf32> to vector<16x8xf32>
    %146 = vector.extract_strided_slice %22 {offsets = [2, 0, 0], sizes = [1, 8, 32], strides = [1, 1, 1]} : vector<4x8x32xf32> to vector<1x8x32xf32>
    %147 = vector.shape_cast %146 : vector<1x8x32xf32> to vector<8x32xf32>
    %cst_61 = arith.constant dense<0.000000e+00> : vector<16x32xf32>
    %148 = tpu.matmul %145, %147, %cst_61 {dimension_numbers = #tpu.dot_dimension_numbers<[1], [0], [0], [1], [0, 0, 1, 1], [], []>} : vector<16x8xf32>, vector<8x32xf32>, vector<16x32xf32> -> vector<16x32xf32>
    %149 = arith.addf %108, %148 : vector<16x32xf32>
    %150 = vector.extract_strided_slice %10 {offsets = [3, 0, 0], sizes = [1, 32, 8], strides = [1, 1, 1]} : vector<4x32x8xf32> to vector<1x32x8xf32>
    %151 = vector.shape_cast %150 : vector<1x32x8xf32> to vector<32x8xf32>
    %cst_62 = arith.constant dense<0.000000e+00> : vector<16x8xf32>
    %152 = tpu.matmul %8, %151, %cst_62 {dimension_numbers = #tpu.dot_dimension_numbers<[1], [0], [0], [1], [0, 0, 1, 1], [], []>} : vector<16x32xf32>, vector<32x8xf32>, vector<16x8xf32> -> vector<16x8xf32>
    %153 = vector.extract_strided_slice %16 {offsets = [3, 0, 0], sizes = [1, 1, 8], strides = [1, 1, 1]} : vector<4x1x8xf32> to vector<1x1x8xf32>
    %154 = vector.shape_cast %153 : vector<1x1x8xf32> to vector<1x8xf32>
    %155 = vector.broadcast %154 : vector<1x8xf32> to vector<16x8xf32>
    %156 = arith.addf %152, %155 : vector<16x8xf32>
    %157 = vector.extract_strided_slice %12 {offsets = [3, 0, 0], sizes = [1, 32, 8], strides = [1, 1, 1]} : vector<4x32x8xf32> to vector<1x32x8xf32>
    %158 = vector.shape_cast %157 : vector<1x32x8xf32> to vector<32x8xf32>
    %cst_63 = arith.constant dense<0.000000e+00> : vector<16x8xf32>
    %159 = tpu.matmul %8, %158, %cst_63 {dimension_numbers = #tpu.dot_dimension_numbers<[1], [0], [0], [1], [0, 0, 1, 1], [], []>} : vector<16x32xf32>, vector<32x8xf32>, vector<16x8xf32> -> vector<16x8xf32>
    %160 = vector.extract_strided_slice %18 {offsets = [3, 0, 0], sizes = [1, 1, 8], strides = [1, 1, 1]} : vector<4x1x8xf32> to vector<1x1x8xf32>
    %161 = vector.shape_cast %160 : vector<1x1x8xf32> to vector<1x8xf32>
    %162 = vector.broadcast %161 : vector<1x8xf32> to vector<16x8xf32>
    %163 = arith.addf %159, %162 : vector<16x8xf32>
    %164 = vector.extract_strided_slice %14 {offsets = [3, 0, 0], sizes = [1, 32, 8], strides = [1, 1, 1]} : vector<4x32x8xf32> to vector<1x32x8xf32>
    %165 = vector.shape_cast %164 : vector<1x32x8xf32> to vector<32x8xf32>
    %cst_64 = arith.constant dense<0.000000e+00> : vector<16x8xf32>
    %166 = tpu.matmul %8, %165, %cst_64 {dimension_numbers = #tpu.dot_dimension_numbers<[1], [0], [0], [1], [0, 0, 1, 1], [], []>} : vector<16x32xf32>, vector<32x8xf32>, vector<16x8xf32> -> vector<16x8xf32>
    %167 = vector.extract_strided_slice %20 {offsets = [3, 0, 0], sizes = [1, 1, 8], strides = [1, 1, 1]} : vector<4x1x8xf32> to vector<1x1x8xf32>
    %168 = vector.shape_cast %167 : vector<1x1x8xf32> to vector<1x8xf32>
    %169 = vector.broadcast %168 : vector<1x8xf32> to vector<16x8xf32>
    %170 = arith.addf %166, %169 : vector<16x8xf32>
    %171 = vector.shape_cast %156 : vector<16x8xf32> to vector<2x8x8xf32>
    %172 = vector.shape_cast %163 : vector<16x8xf32> to vector<2x8x8xf32>
    %173 = vector.shape_cast %170 : vector<16x8xf32> to vector<2x8x8xf32>
    "tpu.trace_start"() <{level = 10 : i32, message = "bqd,bkd->bqk"}> : () -> ()
    %cst_65 = arith.constant dense<0.000000e+00> : vector<2x8x8xf32>
    %174 = tpu.matmul %171, %172, %cst_65 {dimension_numbers = #tpu.dot_dimension_numbers<[2], [2], [1], [1], [0, 0, 0, 1, 1, 1], [0], [0]>} : vector<2x8x8xf32>, vector<2x8x8xf32>, vector<2x8x8xf32> -> vector<2x8x8xf32>
    "tpu.trace_stop"() : () -> ()
    %cst_66 = arith.constant dense<0xFF800000> : vector<2x8xf32>
    %175 = vector.multi_reduction <maximumf>, %174, %cst_66 [2] : vector<2x8x8xf32> to vector<2x8xf32>
    %176 = vector.shape_cast %175 : vector<2x8xf32> to vector<2x8x1xf32>
    %177 = vector.broadcast %176 : vector<2x8x1xf32> to vector<2x8x8xf32>
    %178 = arith.subf %174, %177 : vector<2x8x8xf32>
    %179 = math.exp %178 : vector<2x8x8xf32>
    %cst_67 = arith.constant dense<0.000000e+00> : vector<2x8xf32>
    %180 = vector.multi_reduction <add>, %179, %cst_67 [2] : vector<2x8x8xf32> to vector<2x8xf32>
    %181 = vector.shape_cast %180 : vector<2x8xf32> to vector<2x8x1xf32>
    %182 = tpu.reciprocal %181 : vector<2x8x1xf32> -> vector<2x8x1xf32>
    %183 = vector.broadcast %182 : vector<2x8x1xf32> to vector<2x8x8xf32>
    %184 = arith.mulf %179, %183 : vector<2x8x8xf32>
    "tpu.trace_start"() <{level = 10 : i32, message = "bqk,bkd->bqd"}> : () -> ()
    %cst_68 = arith.constant dense<0.000000e+00> : vector<2x8x8xf32>
    %185 = tpu.matmul %184, %173, %cst_68 {dimension_numbers = #tpu.dot_dimension_numbers<[2], [1], [1], [2], [0, 0, 0, 1, 1, 2], [0], [0]>} : vector<2x8x8xf32>, vector<2x8x8xf32>, vector<2x8x8xf32> -> vector<2x8x8xf32>
    "tpu.trace_stop"() : () -> ()
    %186 = vector.shape_cast %185 : vector<2x8x8xf32> to vector<16x8xf32>
    %187 = vector.extract_strided_slice %22 {offsets = [3, 0, 0], sizes = [1, 8, 32], strides = [1, 1, 1]} : vector<4x8x32xf32> to vector<1x8x32xf32>
    %188 = vector.shape_cast %187 : vector<1x8x32xf32> to vector<8x32xf32>
    %cst_69 = arith.constant dense<0.000000e+00> : vector<16x32xf32>
    %189 = tpu.matmul %186, %188, %cst_69 {dimension_numbers = #tpu.dot_dimension_numbers<[1], [0], [0], [1], [0, 0, 1, 1], [], []>} : vector<16x8xf32>, vector<8x32xf32>, vector<16x32xf32> -> vector<16x32xf32>
    %190 = arith.addf %149, %189 : vector<16x32xf32>
    %191 = arith.addf %8, %190 : vector<16x32xf32>
    %c0_70 = arith.constant 0 : index
    %c0_71 = arith.constant 0 : index
    %c0_72 = arith.constant 0 : index
    %192 = vector.load %arg12[%c0_70, %c0_71, %c0_72] : memref<2x1x32xf32, #tpu.memory_space<vmem>>, vector<1x1x32xf32>
    %193 = vector.shape_cast %192 : vector<1x1x32xf32> to vector<1x32xf32>
    %c0_73 = arith.constant 0 : index
    %c0_74 = arith.constant 0 : index
    %c0_75 = arith.constant 0 : index
    %194 = vector.load %arg13[%c0_73, %c0_74, %c0_75] : memref<2x1x32xf32, #tpu.memory_space<vmem>>, vector<1x1x32xf32>
    %195 = vector.shape_cast %194 : vector<1x1x32xf32> to vector<1x32xf32>
    %cst_76 = arith.constant dense<0.000000e+00> : vector<16xf32>
    %196 = vector.multi_reduction <add>, %191, %cst_76 [1] : vector<16x32xf32> to vector<16xf32>
    %197 = vector.shape_cast %196 : vector<16xf32> to vector<16x1xf32>
    %cst_77 = arith.constant 3.200000e+01 : f32
    %198 = vector.broadcast %cst_77 : f32 to vector<16x1xf32>
    %199 = arith.divf %197, %198 : vector<16x1xf32>
    %200 = vector.broadcast %199 : vector<16x1xf32> to vector<16x32xf32>
    %201 = arith.subf %191, %200 : vector<16x32xf32>
    %202 = arith.mulf %201, %201 : vector<16x32xf32>
    %cst_78 = arith.constant dense<0.000000e+00> : vector<16xf32>
    %203 = vector.multi_reduction <add>, %202, %cst_78 [1] : vector<16x32xf32> to vector<16xf32>
    %204 = vector.shape_cast %203 : vector<16xf32> to vector<16x1xf32>
    %cst_79 = arith.constant 3.200000e+01 : f32
    %205 = vector.broadcast %cst_79 : f32 to vector<16x1xf32>
    %206 = arith.divf %204, %205 : vector<16x1xf32>
    %207 = vector.broadcast %199 : vector<16x1xf32> to vector<16x32xf32>
    %208 = arith.subf %191, %207 : vector<16x32xf32>
    %cst_80 = arith.constant 9.99999974E-6 : f32
    %209 = vector.broadcast %cst_80 : f32 to vector<16x1xf32>
    %210 = arith.addf %206, %209 : vector<16x1xf32>
    %211 = math.rsqrt %210 : vector<16x1xf32>
    %212 = vector.broadcast %211 : vector<16x1xf32> to vector<16x32xf32>
    %213 = arith.mulf %208, %212 : vector<16x32xf32>
    %214 = vector.broadcast %193 : vector<1x32xf32> to vector<16x32xf32>
    %215 = arith.mulf %213, %214 : vector<16x32xf32>
    %216 = vector.broadcast %195 : vector<1x32xf32> to vector<16x32xf32>
    %217 = arith.addf %215, %216 : vector<16x32xf32>
    %c0_81 = arith.constant 0 : index
    %c0_82 = arith.constant 0 : index
    %c0_83 = arith.constant 0 : index
    %218 = vector.load %arg16[%c0_81, %c0_82, %c0_83] : memref<2x32x2048xf32, #tpu.memory_space<vmem>>, vector<1x32x2048xf32>
    %219 = vector.shape_cast %218 : vector<1x32x2048xf32> to vector<32x2048xf32>
    %cst_84 = arith.constant dense<0.000000e+00> : vector<16x2048xf32>
    %220 = tpu.matmul %217, %219, %cst_84 {dimension_numbers = #tpu.dot_dimension_numbers<[1], [0], [0], [1], [0, 0, 1, 1], [], []>} : vector<16x32xf32>, vector<32x2048xf32>, vector<16x2048xf32> -> vector<16x2048xf32>
    %c0_85 = arith.constant 0 : index
    %c0_86 = arith.constant 0 : index
    %c0_87 = arith.constant 0 : index
    %221 = vector.load %arg17[%c0_85, %c0_86, %c0_87] : memref<2x1x2048xf32, #tpu.memory_space<vmem>>, vector<1x1x2048xf32>
    %222 = vector.shape_cast %221 : vector<1x1x2048xf32> to vector<1x2048xf32>
    %223 = vector.broadcast %222 : vector<1x2048xf32> to vector<16x2048xf32>
    %224 = arith.addf %220, %223 : vector<16x2048xf32>
    %cst_88 = arith.constant 0.000000e+00 : f32
    %225 = vector.broadcast %cst_88 : f32 to vector<16x2048xf32>
    %226 = arith.maximumf %224, %225 : vector<16x2048xf32>
    %c0_89 = arith.constant 0 : index
    %c0_90 = arith.constant 0 : index
    %c0_91 = arith.constant 0 : index
    %227 = vector.load %arg18[%c0_89, %c0_90, %c0_91] : memref<2x32x2048xf32, #tpu.memory_space<vmem>>, vector<1x32x2048xf32>
    %228 = vector.shape_cast %227 : vector<1x32x2048xf32> to vector<32x2048xf32>
    %cst_92 = arith.constant dense<0.000000e+00> : vector<16x32xf32>
    %229 = tpu.matmul %226, %228, %cst_92 {dimension_numbers = #tpu.dot_dimension_numbers<[1], [1], [0], [0], [0, 0, 1, 0], [], []>} : vector<16x2048xf32>, vector<32x2048xf32>, vector<16x32xf32> -> vector<16x32xf32>
    %c0_93 = arith.constant 0 : index
    %c0_94 = arith.constant 0 : index
    %c0_95 = arith.constant 0 : index
    %230 = vector.load %arg19[%c0_93, %c0_94, %c0_95] : memref<2x1x32xf32, #tpu.memory_space<vmem>>, vector<1x1x32xf32>
    %231 = vector.shape_cast %230 : vector<1x1x32xf32> to vector<1x32xf32>
    %232 = vector.broadcast %231 : vector<1x32xf32> to vector<16x32xf32>
    %233 = arith.addf %229, %232 : vector<16x32xf32>
    %234 = arith.addf %217, %233 : vector<16x32xf32>
    %c0_96 = arith.constant 0 : index
    %c0_97 = arith.constant 0 : index
    %c0_98 = arith.constant 0 : index
    %235 = vector.load %arg14[%c0_96, %c0_97, %c0_98] : memref<2x1x32xf32, #tpu.memory_space<vmem>>, vector<1x1x32xf32>
    %236 = vector.shape_cast %235 : vector<1x1x32xf32> to vector<1x32xf32>
    %c0_99 = arith.constant 0 : index
    %c0_100 = arith.constant 0 : index
    %c0_101 = arith.constant 0 : index
    %237 = vector.load %arg15[%c0_99, %c0_100, %c0_101] : memref<2x1x32xf32, #tpu.memory_space<vmem>>, vector<1x1x32xf32>
    %238 = vector.shape_cast %237 : vector<1x1x32xf32> to vector<1x32xf32>
    %cst_102 = arith.constant dense<0.000000e+00> : vector<16xf32>
    %239 = vector.multi_reduction <add>, %234, %cst_102 [1] : vector<16x32xf32> to vector<16xf32>
    %240 = vector.shape_cast %239 : vector<16xf32> to vector<16x1xf32>
    %cst_103 = arith.constant 3.200000e+01 : f32
    %241 = vector.broadcast %cst_103 : f32 to vector<16x1xf32>
    %242 = arith.divf %240, %241 : vector<16x1xf32>
    %243 = vector.broadcast %242 : vector<16x1xf32> to vector<16x32xf32>
    %244 = arith.subf %234, %243 : vector<16x32xf32>
    %245 = arith.mulf %244, %244 : vector<16x32xf32>
    %cst_104 = arith.constant dense<0.000000e+00> : vector<16xf32>
    %246 = vector.multi_reduction <add>, %245, %cst_104 [1] : vector<16x32xf32> to vector<16xf32>
    %247 = vector.shape_cast %246 : vector<16xf32> to vector<16x1xf32>
    %cst_105 = arith.constant 3.200000e+01 : f32
    %248 = vector.broadcast %cst_105 : f32 to vector<16x1xf32>
    %249 = arith.divf %247, %248 : vector<16x1xf32>
    %250 = vector.broadcast %242 : vector<16x1xf32> to vector<16x32xf32>
    %251 = arith.subf %234, %250 : vector<16x32xf32>
    %cst_106 = arith.constant 9.99999974E-6 : f32
    %252 = vector.broadcast %cst_106 : f32 to vector<16x1xf32>
    %253 = arith.addf %249, %252 : vector<16x1xf32>
    %254 = math.rsqrt %253 : vector<16x1xf32>
    %255 = vector.broadcast %254 : vector<16x1xf32> to vector<16x32xf32>
    %256 = arith.mulf %251, %255 : vector<16x32xf32>
    %257 = vector.broadcast %236 : vector<1x32xf32> to vector<16x32xf32>
    %258 = arith.mulf %256, %257 : vector<16x32xf32>
    %259 = vector.broadcast %238 : vector<1x32xf32> to vector<16x32xf32>
    %260 = arith.addf %258, %259 : vector<16x32xf32>
    %c1 = arith.constant 1 : index
    %c0_107 = arith.constant 0 : index
    %c0_108 = arith.constant 0 : index
    %c0_109 = arith.constant 0 : index
    %261 = vector.load %arg4[%c1, %c0_107, %c0_108, %c0_109] : memref<2x4x32x8xf32, #tpu.memory_space<vmem>>, vector<1x4x32x8xf32>
    %262 = vector.shape_cast %261 : vector<1x4x32x8xf32> to vector<4x32x8xf32>
    %c1_110 = arith.constant 1 : index
    %c0_111 = arith.constant 0 : index
    %c0_112 = arith.constant 0 : index
    %c0_113 = arith.constant 0 : index
    %263 = vector.load %arg5[%c1_110, %c0_111, %c0_112, %c0_113] : memref<2x4x32x8xf32, #tpu.memory_space<vmem>>, vector<1x4x32x8xf32>
    %264 = vector.shape_cast %263 : vector<1x4x32x8xf32> to vector<4x32x8xf32>
    %c1_114 = arith.constant 1 : index
    %c0_115 = arith.constant 0 : index
    %c0_116 = arith.constant 0 : index
    %c0_117 = arith.constant 0 : index
    %265 = vector.load %arg6[%c1_114, %c0_115, %c0_116, %c0_117] : memref<2x4x32x8xf32, #tpu.memory_space<vmem>>, vector<1x4x32x8xf32>
    %266 = vector.shape_cast %265 : vector<1x4x32x8xf32> to vector<4x32x8xf32>
    %c1_118 = arith.constant 1 : index
    %c0_119 = arith.constant 0 : index
    %c0_120 = arith.constant 0 : index
    %c0_121 = arith.constant 0 : index
    %267 = vector.load %arg7[%c1_118, %c0_119, %c0_120, %c0_121] : memref<2x4x1x8xf32, #tpu.memory_space<vmem>>, vector<1x4x1x8xf32>
    %268 = vector.shape_cast %267 : vector<1x4x1x8xf32> to vector<4x1x8xf32>
    %c1_122 = arith.constant 1 : index
    %c0_123 = arith.constant 0 : index
    %c0_124 = arith.constant 0 : index
    %c0_125 = arith.constant 0 : index
    %269 = vector.load %arg8[%c1_122, %c0_123, %c0_124, %c0_125] : memref<2x4x1x8xf32, #tpu.memory_space<vmem>>, vector<1x4x1x8xf32>
    %270 = vector.shape_cast %269 : vector<1x4x1x8xf32> to vector<4x1x8xf32>
    %c1_126 = arith.constant 1 : index
    %c0_127 = arith.constant 0 : index
    %c0_128 = arith.constant 0 : index
    %c0_129 = arith.constant 0 : index
    %271 = vector.load %arg9[%c1_126, %c0_127, %c0_128, %c0_129] : memref<2x4x1x8xf32, #tpu.memory_space<vmem>>, vector<1x4x1x8xf32>
    %272 = vector.shape_cast %271 : vector<1x4x1x8xf32> to vector<4x1x8xf32>
    %c1_130 = arith.constant 1 : index
    %c0_131 = arith.constant 0 : index
    %c0_132 = arith.constant 0 : index
    %c0_133 = arith.constant 0 : index
    %273 = vector.load %arg10[%c1_130, %c0_131, %c0_132, %c0_133] : memref<2x4x8x32xf32, #tpu.memory_space<vmem>>, vector<1x4x8x32xf32>
    %274 = vector.shape_cast %273 : vector<1x4x8x32xf32> to vector<4x8x32xf32>
    %c1_134 = arith.constant 1 : index
    %c0_135 = arith.constant 0 : index
    %c0_136 = arith.constant 0 : index
    %275 = vector.load %arg11[%c1_134, %c0_135, %c0_136] : memref<2x1x32xf32, #tpu.memory_space<vmem>>, vector<1x1x32xf32>
    %276 = vector.shape_cast %275 : vector<1x1x32xf32> to vector<1x32xf32>
    %277 = vector.shape_cast %276 : vector<1x32xf32> to vector<1x32xf32>
    %278 = vector.broadcast %277 : vector<1x32xf32> to vector<16x32xf32>
    %279 = vector.extract_strided_slice %262 {offsets = [0, 0, 0], sizes = [1, 32, 8], strides = [1, 1, 1]} : vector<4x32x8xf32> to vector<1x32x8xf32>
    %280 = vector.shape_cast %279 : vector<1x32x8xf32> to vector<32x8xf32>
    %cst_137 = arith.constant dense<0.000000e+00> : vector<16x8xf32>
    %281 = tpu.matmul %260, %280, %cst_137 {dimension_numbers = #tpu.dot_dimension_numbers<[1], [0], [0], [1], [0, 0, 1, 1], [], []>} : vector<16x32xf32>, vector<32x8xf32>, vector<16x8xf32> -> vector<16x8xf32>
    %282 = vector.extract_strided_slice %268 {offsets = [0, 0, 0], sizes = [1, 1, 8], strides = [1, 1, 1]} : vector<4x1x8xf32> to vector<1x1x8xf32>
    %283 = vector.shape_cast %282 : vector<1x1x8xf32> to vector<1x8xf32>
    %284 = vector.broadcast %283 : vector<1x8xf32> to vector<16x8xf32>
    %285 = arith.addf %281, %284 : vector<16x8xf32>
    %286 = vector.extract_strided_slice %264 {offsets = [0, 0, 0], sizes = [1, 32, 8], strides = [1, 1, 1]} : vector<4x32x8xf32> to vector<1x32x8xf32>
    %287 = vector.shape_cast %286 : vector<1x32x8xf32> to vector<32x8xf32>
    %cst_138 = arith.constant dense<0.000000e+00> : vector<16x8xf32>
    %288 = tpu.matmul %260, %287, %cst_138 {dimension_numbers = #tpu.dot_dimension_numbers<[1], [0], [0], [1], [0, 0, 1, 1], [], []>} : vector<16x32xf32>, vector<32x8xf32>, vector<16x8xf32> -> vector<16x8xf32>
    %289 = vector.extract_strided_slice %270 {offsets = [0, 0, 0], sizes = [1, 1, 8], strides = [1, 1, 1]} : vector<4x1x8xf32> to vector<1x1x8xf32>
    %290 = vector.shape_cast %289 : vector<1x1x8xf32> to vector<1x8xf32>
    %291 = vector.broadcast %290 : vector<1x8xf32> to vector<16x8xf32>
    %292 = arith.addf %288, %291 : vector<16x8xf32>
    %293 = vector.extract_strided_slice %266 {offsets = [0, 0, 0], sizes = [1, 32, 8], strides = [1, 1, 1]} : vector<4x32x8xf32> to vector<1x32x8xf32>
    %294 = vector.shape_cast %293 : vector<1x32x8xf32> to vector<32x8xf32>
    %cst_139 = arith.constant dense<0.000000e+00> : vector<16x8xf32>
    %295 = tpu.matmul %260, %294, %cst_139 {dimension_numbers = #tpu.dot_dimension_numbers<[1], [0], [0], [1], [0, 0, 1, 1], [], []>} : vector<16x32xf32>, vector<32x8xf32>, vector<16x8xf32> -> vector<16x8xf32>
    %296 = vector.extract_strided_slice %272 {offsets = [0, 0, 0], sizes = [1, 1, 8], strides = [1, 1, 1]} : vector<4x1x8xf32> to vector<1x1x8xf32>
    %297 = vector.shape_cast %296 : vector<1x1x8xf32> to vector<1x8xf32>
    %298 = vector.broadcast %297 : vector<1x8xf32> to vector<16x8xf32>
    %299 = arith.addf %295, %298 : vector<16x8xf32>
    %300 = vector.shape_cast %285 : vector<16x8xf32> to vector<2x8x8xf32>
    %301 = vector.shape_cast %292 : vector<16x8xf32> to vector<2x8x8xf32>
    %302 = vector.shape_cast %299 : vector<16x8xf32> to vector<2x8x8xf32>
    "tpu.trace_start"() <{level = 10 : i32, message = "bqd,bkd->bqk"}> : () -> ()
    %cst_140 = arith.constant dense<0.000000e+00> : vector<2x8x8xf32>
    %303 = tpu.matmul %300, %301, %cst_140 {dimension_numbers = #tpu.dot_dimension_numbers<[2], [2], [1], [1], [0, 0, 0, 1, 1, 1], [0], [0]>} : vector<2x8x8xf32>, vector<2x8x8xf32>, vector<2x8x8xf32> -> vector<2x8x8xf32>
    "tpu.trace_stop"() : () -> ()
    %cst_141 = arith.constant dense<0xFF800000> : vector<2x8xf32>
    %304 = vector.multi_reduction <maximumf>, %303, %cst_141 [2] : vector<2x8x8xf32> to vector<2x8xf32>
    %305 = vector.shape_cast %304 : vector<2x8xf32> to vector<2x8x1xf32>
    %306 = vector.broadcast %305 : vector<2x8x1xf32> to vector<2x8x8xf32>
    %307 = arith.subf %303, %306 : vector<2x8x8xf32>
    %308 = math.exp %307 : vector<2x8x8xf32>
    %cst_142 = arith.constant dense<0.000000e+00> : vector<2x8xf32>
    %309 = vector.multi_reduction <add>, %308, %cst_142 [2] : vector<2x8x8xf32> to vector<2x8xf32>
    %310 = vector.shape_cast %309 : vector<2x8xf32> to vector<2x8x1xf32>
    %311 = tpu.reciprocal %310 : vector<2x8x1xf32> -> vector<2x8x1xf32>
    %312 = vector.broadcast %311 : vector<2x8x1xf32> to vector<2x8x8xf32>
    %313 = arith.mulf %308, %312 : vector<2x8x8xf32>
    "tpu.trace_start"() <{level = 10 : i32, message = "bqk,bkd->bqd"}> : () -> ()
    %cst_143 = arith.constant dense<0.000000e+00> : vector<2x8x8xf32>
    %314 = tpu.matmul %313, %302, %cst_143 {dimension_numbers = #tpu.dot_dimension_numbers<[2], [1], [1], [2], [0, 0, 0, 1, 1, 2], [0], [0]>} : vector<2x8x8xf32>, vector<2x8x8xf32>, vector<2x8x8xf32> -> vector<2x8x8xf32>
    "tpu.trace_stop"() : () -> ()
    %315 = vector.shape_cast %314 : vector<2x8x8xf32> to vector<16x8xf32>
    %316 = vector.extract_strided_slice %274 {offsets = [0, 0, 0], sizes = [1, 8, 32], strides = [1, 1, 1]} : vector<4x8x32xf32> to vector<1x8x32xf32>
    %317 = vector.shape_cast %316 : vector<1x8x32xf32> to vector<8x32xf32>
    %cst_144 = arith.constant dense<0.000000e+00> : vector<16x32xf32>
    %318 = tpu.matmul %315, %317, %cst_144 {dimension_numbers = #tpu.dot_dimension_numbers<[1], [0], [0], [1], [0, 0, 1, 1], [], []>} : vector<16x8xf32>, vector<8x32xf32>, vector<16x32xf32> -> vector<16x32xf32>
    %319 = arith.addf %278, %318 : vector<16x32xf32>
    %320 = vector.extract_strided_slice %262 {offsets = [1, 0, 0], sizes = [1, 32, 8], strides = [1, 1, 1]} : vector<4x32x8xf32> to vector<1x32x8xf32>
    %321 = vector.shape_cast %320 : vector<1x32x8xf32> to vector<32x8xf32>
    %cst_145 = arith.constant dense<0.000000e+00> : vector<16x8xf32>
    %322 = tpu.matmul %260, %321, %cst_145 {dimension_numbers = #tpu.dot_dimension_numbers<[1], [0], [0], [1], [0, 0, 1, 1], [], []>} : vector<16x32xf32>, vector<32x8xf32>, vector<16x8xf32> -> vector<16x8xf32>
    %323 = vector.extract_strided_slice %268 {offsets = [1, 0, 0], sizes = [1, 1, 8], strides = [1, 1, 1]} : vector<4x1x8xf32> to vector<1x1x8xf32>
    %324 = vector.shape_cast %323 : vector<1x1x8xf32> to vector<1x8xf32>
    %325 = vector.broadcast %324 : vector<1x8xf32> to vector<16x8xf32>
    %326 = arith.addf %322, %325 : vector<16x8xf32>
    %327 = vector.extract_strided_slice %264 {offsets = [1, 0, 0], sizes = [1, 32, 8], strides = [1, 1, 1]} : vector<4x32x8xf32> to vector<1x32x8xf32>
    %328 = vector.shape_cast %327 : vector<1x32x8xf32> to vector<32x8xf32>
    %cst_146 = arith.constant dense<0.000000e+00> : vector<16x8xf32>
    %329 = tpu.matmul %260, %328, %cst_146 {dimension_numbers = #tpu.dot_dimension_numbers<[1], [0], [0], [1], [0, 0, 1, 1], [], []>} : vector<16x32xf32>, vector<32x8xf32>, vector<16x8xf32> -> vector<16x8xf32>
    %330 = vector.extract_strided_slice %270 {offsets = [1, 0, 0], sizes = [1, 1, 8], strides = [1, 1, 1]} : vector<4x1x8xf32> to vector<1x1x8xf32>
    %331 = vector.shape_cast %330 : vector<1x1x8xf32> to vector<1x8xf32>
    %332 = vector.broadcast %331 : vector<1x8xf32> to vector<16x8xf32>
    %333 = arith.addf %329, %332 : vector<16x8xf32>
    %334 = vector.extract_strided_slice %266 {offsets = [1, 0, 0], sizes = [1, 32, 8], strides = [1, 1, 1]} : vector<4x32x8xf32> to vector<1x32x8xf32>
    %335 = vector.shape_cast %334 : vector<1x32x8xf32> to vector<32x8xf32>
    %cst_147 = arith.constant dense<0.000000e+00> : vector<16x8xf32>
    %336 = tpu.matmul %260, %335, %cst_147 {dimension_numbers = #tpu.dot_dimension_numbers<[1], [0], [0], [1], [0, 0, 1, 1], [], []>} : vector<16x32xf32>, vector<32x8xf32>, vector<16x8xf32> -> vector<16x8xf32>
    %337 = vector.extract_strided_slice %272 {offsets = [1, 0, 0], sizes = [1, 1, 8], strides = [1, 1, 1]} : vector<4x1x8xf32> to vector<1x1x8xf32>
    %338 = vector.shape_cast %337 : vector<1x1x8xf32> to vector<1x8xf32>
    %339 = vector.broadcast %338 : vector<1x8xf32> to vector<16x8xf32>
    %340 = arith.addf %336, %339 : vector<16x8xf32>
    %341 = vector.shape_cast %326 : vector<16x8xf32> to vector<2x8x8xf32>
    %342 = vector.shape_cast %333 : vector<16x8xf32> to vector<2x8x8xf32>
    %343 = vector.shape_cast %340 : vector<16x8xf32> to vector<2x8x8xf32>
    "tpu.trace_start"() <{level = 10 : i32, message = "bqd,bkd->bqk"}> : () -> ()
    %cst_148 = arith.constant dense<0.000000e+00> : vector<2x8x8xf32>
    %344 = tpu.matmul %341, %342, %cst_148 {dimension_numbers = #tpu.dot_dimension_numbers<[2], [2], [1], [1], [0, 0, 0, 1, 1, 1], [0], [0]>} : vector<2x8x8xf32>, vector<2x8x8xf32>, vector<2x8x8xf32> -> vector<2x8x8xf32>
    "tpu.trace_stop"() : () -> ()
    %cst_149 = arith.constant dense<0xFF800000> : vector<2x8xf32>
    %345 = vector.multi_reduction <maximumf>, %344, %cst_149 [2] : vector<2x8x8xf32> to vector<2x8xf32>
    %346 = vector.shape_cast %345 : vector<2x8xf32> to vector<2x8x1xf32>
    %347 = vector.broadcast %346 : vector<2x8x1xf32> to vector<2x8x8xf32>
    %348 = arith.subf %344, %347 : vector<2x8x8xf32>
    %349 = math.exp %348 : vector<2x8x8xf32>
    %cst_150 = arith.constant dense<0.000000e+00> : vector<2x8xf32>
    %350 = vector.multi_reduction <add>, %349, %cst_150 [2] : vector<2x8x8xf32> to vector<2x8xf32>
    %351 = vector.shape_cast %350 : vector<2x8xf32> to vector<2x8x1xf32>
    %352 = tpu.reciprocal %351 : vector<2x8x1xf32> -> vector<2x8x1xf32>
    %353 = vector.broadcast %352 : vector<2x8x1xf32> to vector<2x8x8xf32>
    %354 = arith.mulf %349, %353 : vector<2x8x8xf32>
    "tpu.trace_start"() <{level = 10 : i32, message = "bqk,bkd->bqd"}> : () -> ()
    %cst_151 = arith.constant dense<0.000000e+00> : vector<2x8x8xf32>
    %355 = tpu.matmul %354, %343, %cst_151 {dimension_numbers = #tpu.dot_dimension_numbers<[2], [1], [1], [2], [0, 0, 0, 1, 1, 2], [0], [0]>} : vector<2x8x8xf32>, vector<2x8x8xf32>, vector<2x8x8xf32> -> vector<2x8x8xf32>
    "tpu.trace_stop"() : () -> ()
    %356 = vector.shape_cast %355 : vector<2x8x8xf32> to vector<16x8xf32>
    %357 = vector.extract_strided_slice %274 {offsets = [1, 0, 0], sizes = [1, 8, 32], strides = [1, 1, 1]} : vector<4x8x32xf32> to vector<1x8x32xf32>
    %358 = vector.shape_cast %357 : vector<1x8x32xf32> to vector<8x32xf32>
    %cst_152 = arith.constant dense<0.000000e+00> : vector<16x32xf32>
    %359 = tpu.matmul %356, %358, %cst_152 {dimension_numbers = #tpu.dot_dimension_numbers<[1], [0], [0], [1], [0, 0, 1, 1], [], []>} : vector<16x8xf32>, vector<8x32xf32>, vector<16x32xf32> -> vector<16x32xf32>
    %360 = arith.addf %319, %359 : vector<16x32xf32>
    %361 = vector.extract_strided_slice %262 {offsets = [2, 0, 0], sizes = [1, 32, 8], strides = [1, 1, 1]} : vector<4x32x8xf32> to vector<1x32x8xf32>
    %362 = vector.shape_cast %361 : vector<1x32x8xf32> to vector<32x8xf32>
    %cst_153 = arith.constant dense<0.000000e+00> : vector<16x8xf32>
    %363 = tpu.matmul %260, %362, %cst_153 {dimension_numbers = #tpu.dot_dimension_numbers<[1], [0], [0], [1], [0, 0, 1, 1], [], []>} : vector<16x32xf32>, vector<32x8xf32>, vector<16x8xf32> -> vector<16x8xf32>
    %364 = vector.extract_strided_slice %268 {offsets = [2, 0, 0], sizes = [1, 1, 8], strides = [1, 1, 1]} : vector<4x1x8xf32> to vector<1x1x8xf32>
    %365 = vector.shape_cast %364 : vector<1x1x8xf32> to vector<1x8xf32>
    %366 = vector.broadcast %365 : vector<1x8xf32> to vector<16x8xf32>
    %367 = arith.addf %363, %366 : vector<16x8xf32>
    %368 = vector.extract_strided_slice %264 {offsets = [2, 0, 0], sizes = [1, 32, 8], strides = [1, 1, 1]} : vector<4x32x8xf32> to vector<1x32x8xf32>
    %369 = vector.shape_cast %368 : vector<1x32x8xf32> to vector<32x8xf32>
    %cst_154 = arith.constant dense<0.000000e+00> : vector<16x8xf32>
    %370 = tpu.matmul %260, %369, %cst_154 {dimension_numbers = #tpu.dot_dimension_numbers<[1], [0], [0], [1], [0, 0, 1, 1], [], []>} : vector<16x32xf32>, vector<32x8xf32>, vector<16x8xf32> -> vector<16x8xf32>
    %371 = vector.extract_strided_slice %270 {offsets = [2, 0, 0], sizes = [1, 1, 8], strides = [1, 1, 1]} : vector<4x1x8xf32> to vector<1x1x8xf32>
    %372 = vector.shape_cast %371 : vector<1x1x8xf32> to vector<1x8xf32>
    %373 = vector.broadcast %372 : vector<1x8xf32> to vector<16x8xf32>
    %374 = arith.addf %370, %373 : vector<16x8xf32>
    %375 = vector.extract_strided_slice %266 {offsets = [2, 0, 0], sizes = [1, 32, 8], strides = [1, 1, 1]} : vector<4x32x8xf32> to vector<1x32x8xf32>
    %376 = vector.shape_cast %375 : vector<1x32x8xf32> to vector<32x8xf32>
    %cst_155 = arith.constant dense<0.000000e+00> : vector<16x8xf32>
    %377 = tpu.matmul %260, %376, %cst_155 {dimension_numbers = #tpu.dot_dimension_numbers<[1], [0], [0], [1], [0, 0, 1, 1], [], []>} : vector<16x32xf32>, vector<32x8xf32>, vector<16x8xf32> -> vector<16x8xf32>
    %378 = vector.extract_strided_slice %272 {offsets = [2, 0, 0], sizes = [1, 1, 8], strides = [1, 1, 1]} : vector<4x1x8xf32> to vector<1x1x8xf32>
    %379 = vector.shape_cast %378 : vector<1x1x8xf32> to vector<1x8xf32>
    %380 = vector.broadcast %379 : vector<1x8xf32> to vector<16x8xf32>
    %381 = arith.addf %377, %380 : vector<16x8xf32>
    %382 = vector.shape_cast %367 : vector<16x8xf32> to vector<2x8x8xf32>
    %383 = vector.shape_cast %374 : vector<16x8xf32> to vector<2x8x8xf32>
    %384 = vector.shape_cast %381 : vector<16x8xf32> to vector<2x8x8xf32>
    "tpu.trace_start"() <{level = 10 : i32, message = "bqd,bkd->bqk"}> : () -> ()
    %cst_156 = arith.constant dense<0.000000e+00> : vector<2x8x8xf32>
    %385 = tpu.matmul %382, %383, %cst_156 {dimension_numbers = #tpu.dot_dimension_numbers<[2], [2], [1], [1], [0, 0, 0, 1, 1, 1], [0], [0]>} : vector<2x8x8xf32>, vector<2x8x8xf32>, vector<2x8x8xf32> -> vector<2x8x8xf32>
    "tpu.trace_stop"() : () -> ()
    %cst_157 = arith.constant dense<0xFF800000> : vector<2x8xf32>
    %386 = vector.multi_reduction <maximumf>, %385, %cst_157 [2] : vector<2x8x8xf32> to vector<2x8xf32>
    %387 = vector.shape_cast %386 : vector<2x8xf32> to vector<2x8x1xf32>
    %388 = vector.broadcast %387 : vector<2x8x1xf32> to vector<2x8x8xf32>
    %389 = arith.subf %385, %388 : vector<2x8x8xf32>
    %390 = math.exp %389 : vector<2x8x8xf32>
    %cst_158 = arith.constant dense<0.000000e+00> : vector<2x8xf32>
    %391 = vector.multi_reduction <add>, %390, %cst_158 [2] : vector<2x8x8xf32> to vector<2x8xf32>
    %392 = vector.shape_cast %391 : vector<2x8xf32> to vector<2x8x1xf32>
    %393 = tpu.reciprocal %392 : vector<2x8x1xf32> -> vector<2x8x1xf32>
    %394 = vector.broadcast %393 : vector<2x8x1xf32> to vector<2x8x8xf32>
    %395 = arith.mulf %390, %394 : vector<2x8x8xf32>
    "tpu.trace_start"() <{level = 10 : i32, message = "bqk,bkd->bqd"}> : () -> ()
    %cst_159 = arith.constant dense<0.000000e+00> : vector<2x8x8xf32>
    %396 = tpu.matmul %395, %384, %cst_159 {dimension_numbers = #tpu.dot_dimension_numbers<[2], [1], [1], [2], [0, 0, 0, 1, 1, 2], [0], [0]>} : vector<2x8x8xf32>, vector<2x8x8xf32>, vector<2x8x8xf32> -> vector<2x8x8xf32>
    "tpu.trace_stop"() : () -> ()
    %397 = vector.shape_cast %396 : vector<2x8x8xf32> to vector<16x8xf32>
    %398 = vector.extract_strided_slice %274 {offsets = [2, 0, 0], sizes = [1, 8, 32], strides = [1, 1, 1]} : vector<4x8x32xf32> to vector<1x8x32xf32>
    %399 = vector.shape_cast %398 : vector<1x8x32xf32> to vector<8x32xf32>
    %cst_160 = arith.constant dense<0.000000e+00> : vector<16x32xf32>
    %400 = tpu.matmul %397, %399, %cst_160 {dimension_numbers = #tpu.dot_dimension_numbers<[1], [0], [0], [1], [0, 0, 1, 1], [], []>} : vector<16x8xf32>, vector<8x32xf32>, vector<16x32xf32> -> vector<16x32xf32>
    %401 = arith.addf %360, %400 : vector<16x32xf32>
    %402 = vector.extract_strided_slice %262 {offsets = [3, 0, 0], sizes = [1, 32, 8], strides = [1, 1, 1]} : vector<4x32x8xf32> to vector<1x32x8xf32>
    %403 = vector.shape_cast %402 : vector<1x32x8xf32> to vector<32x8xf32>
    %cst_161 = arith.constant dense<0.000000e+00> : vector<16x8xf32>
    %404 = tpu.matmul %260, %403, %cst_161 {dimension_numbers = #tpu.dot_dimension_numbers<[1], [0], [0], [1], [0, 0, 1, 1], [], []>} : vector<16x32xf32>, vector<32x8xf32>, vector<16x8xf32> -> vector<16x8xf32>
    %405 = vector.extract_strided_slice %268 {offsets = [3, 0, 0], sizes = [1, 1, 8], strides = [1, 1, 1]} : vector<4x1x8xf32> to vector<1x1x8xf32>
    %406 = vector.shape_cast %405 : vector<1x1x8xf32> to vector<1x8xf32>
    %407 = vector.broadcast %406 : vector<1x8xf32> to vector<16x8xf32>
    %408 = arith.addf %404, %407 : vector<16x8xf32>
    %409 = vector.extract_strided_slice %264 {offsets = [3, 0, 0], sizes = [1, 32, 8], strides = [1, 1, 1]} : vector<4x32x8xf32> to vector<1x32x8xf32>
    %410 = vector.shape_cast %409 : vector<1x32x8xf32> to vector<32x8xf32>
    %cst_162 = arith.constant dense<0.000000e+00> : vector<16x8xf32>
    %411 = tpu.matmul %260, %410, %cst_162 {dimension_numbers = #tpu.dot_dimension_numbers<[1], [0], [0], [1], [0, 0, 1, 1], [], []>} : vector<16x32xf32>, vector<32x8xf32>, vector<16x8xf32> -> vector<16x8xf32>
    %412 = vector.extract_strided_slice %270 {offsets = [3, 0, 0], sizes = [1, 1, 8], strides = [1, 1, 1]} : vector<4x1x8xf32> to vector<1x1x8xf32>
    %413 = vector.shape_cast %412 : vector<1x1x8xf32> to vector<1x8xf32>
    %414 = vector.broadcast %413 : vector<1x8xf32> to vector<16x8xf32>
    %415 = arith.addf %411, %414 : vector<16x8xf32>
    %416 = vector.extract_strided_slice %266 {offsets = [3, 0, 0], sizes = [1, 32, 8], strides = [1, 1, 1]} : vector<4x32x8xf32> to vector<1x32x8xf32>
    %417 = vector.shape_cast %416 : vector<1x32x8xf32> to vector<32x8xf32>
    %cst_163 = arith.constant dense<0.000000e+00> : vector<16x8xf32>
    %418 = tpu.matmul %260, %417, %cst_163 {dimension_numbers = #tpu.dot_dimension_numbers<[1], [0], [0], [1], [0, 0, 1, 1], [], []>} : vector<16x32xf32>, vector<32x8xf32>, vector<16x8xf32> -> vector<16x8xf32>
    %419 = vector.extract_strided_slice %272 {offsets = [3, 0, 0], sizes = [1, 1, 8], strides = [1, 1, 1]} : vector<4x1x8xf32> to vector<1x1x8xf32>
    %420 = vector.shape_cast %419 : vector<1x1x8xf32> to vector<1x8xf32>
    %421 = vector.broadcast %420 : vector<1x8xf32> to vector<16x8xf32>
    %422 = arith.addf %418, %421 : vector<16x8xf32>
    %423 = vector.shape_cast %408 : vector<16x8xf32> to vector<2x8x8xf32>
    %424 = vector.shape_cast %415 : vector<16x8xf32> to vector<2x8x8xf32>
    %425 = vector.shape_cast %422 : vector<16x8xf32> to vector<2x8x8xf32>
    "tpu.trace_start"() <{level = 10 : i32, message = "bqd,bkd->bqk"}> : () -> ()
    %cst_164 = arith.constant dense<0.000000e+00> : vector<2x8x8xf32>
    %426 = tpu.matmul %423, %424, %cst_164 {dimension_numbers = #tpu.dot_dimension_numbers<[2], [2], [1], [1], [0, 0, 0, 1, 1, 1], [0], [0]>} : vector<2x8x8xf32>, vector<2x8x8xf32>, vector<2x8x8xf32> -> vector<2x8x8xf32>
    "tpu.trace_stop"() : () -> ()
    %cst_165 = arith.constant dense<0xFF800000> : vector<2x8xf32>
    %427 = vector.multi_reduction <maximumf>, %426, %cst_165 [2] : vector<2x8x8xf32> to vector<2x8xf32>
    %428 = vector.shape_cast %427 : vector<2x8xf32> to vector<2x8x1xf32>
    %429 = vector.broadcast %428 : vector<2x8x1xf32> to vector<2x8x8xf32>
    %430 = arith.subf %426, %429 : vector<2x8x8xf32>
    %431 = math.exp %430 : vector<2x8x8xf32>
    %cst_166 = arith.constant dense<0.000000e+00> : vector<2x8xf32>
    %432 = vector.multi_reduction <add>, %431, %cst_166 [2] : vector<2x8x8xf32> to vector<2x8xf32>
    %433 = vector.shape_cast %432 : vector<2x8xf32> to vector<2x8x1xf32>
    %434 = tpu.reciprocal %433 : vector<2x8x1xf32> -> vector<2x8x1xf32>
    %435 = vector.broadcast %434 : vector<2x8x1xf32> to vector<2x8x8xf32>
    %436 = arith.mulf %431, %435 : vector<2x8x8xf32>
    "tpu.trace_start"() <{level = 10 : i32, message = "bqk,bkd->bqd"}> : () -> ()
    %cst_167 = arith.constant dense<0.000000e+00> : vector<2x8x8xf32>
    %437 = tpu.matmul %436, %425, %cst_167 {dimension_numbers = #tpu.dot_dimension_numbers<[2], [1], [1], [2], [0, 0, 0, 1, 1, 2], [0], [0]>} : vector<2x8x8xf32>, vector<2x8x8xf32>, vector<2x8x8xf32> -> vector<2x8x8xf32>
    "tpu.trace_stop"() : () -> ()
    %438 = vector.shape_cast %437 : vector<2x8x8xf32> to vector<16x8xf32>
    %439 = vector.extract_strided_slice %274 {offsets = [3, 0, 0], sizes = [1, 8, 32], strides = [1, 1, 1]} : vector<4x8x32xf32> to vector<1x8x32xf32>
    %440 = vector.shape_cast %439 : vector<1x8x32xf32> to vector<8x32xf32>
    %cst_168 = arith.constant dense<0.000000e+00> : vector<16x32xf32>
    %441 = tpu.matmul %438, %440, %cst_168 {dimension_numbers = #tpu.dot_dimension_numbers<[1], [0], [0], [1], [0, 0, 1, 1], [], []>} : vector<16x8xf32>, vector<8x32xf32>, vector<16x32xf32> -> vector<16x32xf32>
    %442 = arith.addf %401, %441 : vector<16x32xf32>
    %443 = arith.addf %260, %442 : vector<16x32xf32>
    %c1_169 = arith.constant 1 : index
    %c0_170 = arith.constant 0 : index
    %c0_171 = arith.constant 0 : index
    %444 = vector.load %arg12[%c1_169, %c0_170, %c0_171] : memref<2x1x32xf32, #tpu.memory_space<vmem>>, vector<1x1x32xf32>
    %445 = vector.shape_cast %444 : vector<1x1x32xf32> to vector<1x32xf32>
    %c1_172 = arith.constant 1 : index
    %c0_173 = arith.constant 0 : index
    %c0_174 = arith.constant 0 : index
    %446 = vector.load %arg13[%c1_172, %c0_173, %c0_174] : memref<2x1x32xf32, #tpu.memory_space<vmem>>, vector<1x1x32xf32>
    %447 = vector.shape_cast %446 : vector<1x1x32xf32> to vector<1x32xf32>
    %cst_175 = arith.constant dense<0.000000e+00> : vector<16xf32>
    %448 = vector.multi_reduction <add>, %443, %cst_175 [1] : vector<16x32xf32> to vector<16xf32>
    %449 = vector.shape_cast %448 : vector<16xf32> to vector<16x1xf32>
    %cst_176 = arith.constant 3.200000e+01 : f32
    %450 = vector.broadcast %cst_176 : f32 to vector<16x1xf32>
    %451 = arith.divf %449, %450 : vector<16x1xf32>
    %452 = vector.broadcast %451 : vector<16x1xf32> to vector<16x32xf32>
    %453 = arith.subf %443, %452 : vector<16x32xf32>
    %454 = arith.mulf %453, %453 : vector<16x32xf32>
    %cst_177 = arith.constant dense<0.000000e+00> : vector<16xf32>
    %455 = vector.multi_reduction <add>, %454, %cst_177 [1] : vector<16x32xf32> to vector<16xf32>
    %456 = vector.shape_cast %455 : vector<16xf32> to vector<16x1xf32>
    %cst_178 = arith.constant 3.200000e+01 : f32
    %457 = vector.broadcast %cst_178 : f32 to vector<16x1xf32>
    %458 = arith.divf %456, %457 : vector<16x1xf32>
    %459 = vector.broadcast %451 : vector<16x1xf32> to vector<16x32xf32>
    %460 = arith.subf %443, %459 : vector<16x32xf32>
    %cst_179 = arith.constant 9.99999974E-6 : f32
    %461 = vector.broadcast %cst_179 : f32 to vector<16x1xf32>
    %462 = arith.addf %458, %461 : vector<16x1xf32>
    %463 = math.rsqrt %462 : vector<16x1xf32>
    %464 = vector.broadcast %463 : vector<16x1xf32> to vector<16x32xf32>
    %465 = arith.mulf %460, %464 : vector<16x32xf32>
    %466 = vector.broadcast %445 : vector<1x32xf32> to vector<16x32xf32>
    %467 = arith.mulf %465, %466 : vector<16x32xf32>
    %468 = vector.broadcast %447 : vector<1x32xf32> to vector<16x32xf32>
    %469 = arith.addf %467, %468 : vector<16x32xf32>
    %c1_180 = arith.constant 1 : index
    %c0_181 = arith.constant 0 : index
    %c0_182 = arith.constant 0 : index
    %470 = vector.load %arg16[%c1_180, %c0_181, %c0_182] : memref<2x32x2048xf32, #tpu.memory_space<vmem>>, vector<1x32x2048xf32>
    %471 = vector.shape_cast %470 : vector<1x32x2048xf32> to vector<32x2048xf32>
    %cst_183 = arith.constant dense<0.000000e+00> : vector<16x2048xf32>
    %472 = tpu.matmul %469, %471, %cst_183 {dimension_numbers = #tpu.dot_dimension_numbers<[1], [0], [0], [1], [0, 0, 1, 1], [], []>} : vector<16x32xf32>, vector<32x2048xf32>, vector<16x2048xf32> -> vector<16x2048xf32>
    %c1_184 = arith.constant 1 : index
    %c0_185 = arith.constant 0 : index
    %c0_186 = arith.constant 0 : index
    %473 = vector.load %arg17[%c1_184, %c0_185, %c0_186] : memref<2x1x2048xf32, #tpu.memory_space<vmem>>, vector<1x1x2048xf32>
    %474 = vector.shape_cast %473 : vector<1x1x2048xf32> to vector<1x2048xf32>
    %475 = vector.broadcast %474 : vector<1x2048xf32> to vector<16x2048xf32>
    %476 = arith.addf %472, %475 : vector<16x2048xf32>
    %cst_187 = arith.constant 0.000000e+00 : f32
    %477 = vector.broadcast %cst_187 : f32 to vector<16x2048xf32>
    %478 = arith.maximumf %476, %477 : vector<16x2048xf32>
    %c1_188 = arith.constant 1 : index
    %c0_189 = arith.constant 0 : index
    %c0_190 = arith.constant 0 : index
    %479 = vector.load %arg18[%c1_188, %c0_189, %c0_190] : memref<2x32x2048xf32, #tpu.memory_space<vmem>>, vector<1x32x2048xf32>
    %480 = vector.shape_cast %479 : vector<1x32x2048xf32> to vector<32x2048xf32>
    %cst_191 = arith.constant dense<0.000000e+00> : vector<16x32xf32>
    %481 = tpu.matmul %478, %480, %cst_191 {dimension_numbers = #tpu.dot_dimension_numbers<[1], [1], [0], [0], [0, 0, 1, 0], [], []>} : vector<16x2048xf32>, vector<32x2048xf32>, vector<16x32xf32> -> vector<16x32xf32>
    %c1_192 = arith.constant 1 : index
    %c0_193 = arith.constant 0 : index
    %c0_194 = arith.constant 0 : index
    %482 = vector.load %arg19[%c1_192, %c0_193, %c0_194] : memref<2x1x32xf32, #tpu.memory_space<vmem>>, vector<1x1x32xf32>
    %483 = vector.shape_cast %482 : vector<1x1x32xf32> to vector<1x32xf32>
    %484 = vector.broadcast %483 : vector<1x32xf32> to vector<16x32xf32>
    %485 = arith.addf %481, %484 : vector<16x32xf32>
    %486 = arith.addf %469, %485 : vector<16x32xf32>
    %c1_195 = arith.constant 1 : index
    %c0_196 = arith.constant 0 : index
    %c0_197 = arith.constant 0 : index
    %487 = vector.load %arg14[%c1_195, %c0_196, %c0_197] : memref<2x1x32xf32, #tpu.memory_space<vmem>>, vector<1x1x32xf32>
    %488 = vector.shape_cast %487 : vector<1x1x32xf32> to vector<1x32xf32>
    %c1_198 = arith.constant 1 : index
    %c0_199 = arith.constant 0 : index
    %c0_200 = arith.constant 0 : index
    %489 = vector.load %arg15[%c1_198, %c0_199, %c0_200] : memref<2x1x32xf32, #tpu.memory_space<vmem>>, vector<1x1x32xf32>
    %490 = vector.shape_cast %489 : vector<1x1x32xf32> to vector<1x32xf32>
    %cst_201 = arith.constant dense<0.000000e+00> : vector<16xf32>
    %491 = vector.multi_reduction <add>, %486, %cst_201 [1] : vector<16x32xf32> to vector<16xf32>
    %492 = vector.shape_cast %491 : vector<16xf32> to vector<16x1xf32>
    %cst_202 = arith.constant 3.200000e+01 : f32
    %493 = vector.broadcast %cst_202 : f32 to vector<16x1xf32>
    %494 = arith.divf %492, %493 : vector<16x1xf32>
    %495 = vector.broadcast %494 : vector<16x1xf32> to vector<16x32xf32>
    %496 = arith.subf %486, %495 : vector<16x32xf32>
    %497 = arith.mulf %496, %496 : vector<16x32xf32>
    %cst_203 = arith.constant dense<0.000000e+00> : vector<16xf32>
    %498 = vector.multi_reduction <add>, %497, %cst_203 [1] : vector<16x32xf32> to vector<16xf32>
    %499 = vector.shape_cast %498 : vector<16xf32> to vector<16x1xf32>
    %cst_204 = arith.constant 3.200000e+01 : f32
    %500 = vector.broadcast %cst_204 : f32 to vector<16x1xf32>
    %501 = arith.divf %499, %500 : vector<16x1xf32>
    %502 = vector.broadcast %494 : vector<16x1xf32> to vector<16x32xf32>
    %503 = arith.subf %486, %502 : vector<16x32xf32>
    %cst_205 = arith.constant 9.99999974E-6 : f32
    %504 = vector.broadcast %cst_205 : f32 to vector<16x1xf32>
    %505 = arith.addf %501, %504 : vector<16x1xf32>
    %506 = math.rsqrt %505 : vector<16x1xf32>
    %507 = vector.broadcast %506 : vector<16x1xf32> to vector<16x32xf32>
    %508 = arith.mulf %503, %507 : vector<16x32xf32>
    %509 = vector.broadcast %488 : vector<1x32xf32> to vector<16x32xf32>
    %510 = arith.mulf %508, %509 : vector<16x32xf32>
    %511 = vector.broadcast %490 : vector<1x32xf32> to vector<16x32xf32>
    %512 = arith.addf %510, %511 : vector<16x32xf32>
    %c0_206 = arith.constant 0 : index
    %c0_207 = arith.constant 0 : index
    %513 = vector.load %arg20[%c0_206, %c0_207] : memref<16x32xf32, #tpu.memory_space<vmem>>, vector<16x32xf32>
    tpu.vector_store %arg20[%c0_206, %c0_207], %512 {strides = array<i32>} : memref<16x32xf32, #tpu.memory_space<vmem>>, vector<16x32xf32>,
    return
  }
}

</mosaic_0001>

<bundles_post_ra>
// kernel: tpu_custom_call.1
= control target key start
LH: loop header
LB: loop body
LE: loop exit
PB: predicated region body
PF: predicated region fallthrough
CT: control target
= control target key end

     0   :  { %s6006_s0 = inlined_call_operand.vmem [shape: f32[16,16], index: 0, kind: input, shape index: {}]   ;;  %s6007_s1 = inlined_call_operand.vmem [shape: f32[16,32], index: 1, kind: input, shape index: {}]   ;;  %s6008_s2 = inlined_call_operand.vmem [shape: f32[1,32], index: 2, kind: input, shape index: {}]   ;;  %s6009_s3 = inlined_call_operand.vmem [shape: f32[1,32], index: 3, kind: input, shape index: {}]   ;;  %s6010_s4 = inlined_call_operand.vmem [shape: f32[2,4,32,8], index: 4, kind: input, shape index: {}]   ;;  %s6011_s5 = inlined_call_operand.vmem [shape: f32[2,4,32,8], index: 5, kind: input, shape index: {}]   ;;  %s6012_s6 = inlined_call_operand.vmem [shape: f32[2,4,32,8], index: 6, kind: input, shape index: {}]   ;;  %s6013_s7 = inlined_call_operand.vmem [shape: f32[2,4,1,8], index: 7, kind: input, shape index: {}]   ;;  %s6014_s8 = inlined_call_operand.vmem [shape: f32[2,4,1,8], index: 8, kind: input, shape index: {}]   ;;  %s6015_s9 = inlined_call_operand.vmem [shape: f32[2,4,1,8], index: 9, kind: input, shape index: {}]   ;;  %s6016_s10 = inlined_call_operand.vmem [shape: f32[2,4,8,32], index: 10, kind: input, shape index: {}]   ;;  %s6017_s11 = inlined_call_operand.vmem [shape: f32[2,1,32], index: 11, kind: input, shape index: {}]   ;;  %s6018_s12 = inlined_call_operand.vmem [shape: f32[2,1,32], index: 12, kind: input, shape index: {}]   ;;  %s6019_s13 = inlined_call_operand.vmem [shape: f32[2,1,32], index: 13, kind: input, shape index: {}]   ;;  %s6020_s14 = inlined_call_operand.vmem [shape: f32[2,1,32], index: 14, kind: input, shape index: {}]   ;;  %s6021_s15 = inlined_call_operand.vmem [shape: f32[2,1,32], index: 15, kind: input, shape index: {}]   ;;  %s6022_s16 = inlined_call_operand.hbm [shape: f32[2,32,2048], index: 16, kind: input, shape index: {}]   ;;  %s6023_s17 = inlined_call_operand.vmem [shape: f32[2,1,2048], index: 17, kind: input, shape index: {}]   ;;  %s6024_s18 = inlined_call_operand.hbm [shape: f32[2,32,2048], index: 18, kind: input, shape index: {}]   ;;  %s6025_s19 = inlined_call_operand.vmem [shape: f32[2,1,32], index: 19, kind: input, shape index: {}]   ;;  %s6026_s20 = inlined_call_operand.hbm [shape: f32[16,32], index: 20, kind: output, shape index: {}]  }
   0x1   :  { %6030 = sst [smem:[#allocation11_spill]] %s6006_s0 }
   0x2   :  { %6031 = sst [smem:[#allocation12_spill]] %s6007_s1 }
   0x3   :  { %6032 = sst [smem:[#allocation13_spill]] %s6008_s2 }
   0x4   :  { %6033 = sst [smem:[#allocation14_spill]] %s6009_s3 }
   0x5   :  { %6034 = sst [smem:[#allocation15_spill]] %s6010_s4 }
   0x6   :  { %25 = vsyncpa [#allocation3], 0 }
   0x7   :  { %26 = vsyncpa [#allocation6], 0 }
   0x8   :  { %27 = vsyncpa [#allocation4], 0  ;;  %s64_s23 = sshll.u32 %s6022_s16, 4  ;;  %s4950_s24 = smov [#allocation2]   ;;  %s65_s23 = int_to_ptr.hbm [resolvable:$true] %s64_s23 }
   0x9   :  { %s66_s2 = sshll.u32 %s4950_s24, 4  ;;  %s79_s26 = sshll.u32 %s6024_s18, 4  ;;  %s67_s2 = int_to_ptr.vmem [resolvable:$true] %s66_s2  ;;  %s80_s26 = int_to_ptr.hbm [resolvable:$true] %s79_s26 }
   0xa   :  { %s4951_s27 = smov 2048   ;;  %s4952_s28 = smov 128  }
   0xb   :  { %72 = dma.hbm_to_vmem [thread:$0]  %s65_s23, 16384, %s67_s2, [#allocation3], %s4951_s27, %s4951_s27, %s4952_s28  }
   0xc   :  { %s4953_s4 = smov [#allocation5]  }
   0xd   :  { %s81_s29 = sshll.u32 %s4953_s4, 4  ;;  %s82_s29 = int_to_ptr.vmem [resolvable:$true] %s81_s29 }
   0xe   :  { %87 = dma.hbm_to_vmem [thread:$0]  %s80_s26, 16384, %s82_s29, [#allocation6], %s4951_s27, %s4951_s27, %s4952_s28  }
   0xf   :  { %4944 = dma.done.wait [#allocation3], 16384  }
  0x10   :  { %4945 = vsyncadd [#allocation3], 4294950912 }
  0x11   :  { %4946 = dma.done.wait [#allocation6], 16384  }
  0x12   :  { %4947 = vsyncadd [#allocation6], 4294950912  ;;  %s6035_s0 = sld [smem:[#allocation12_spill]]  ;;  %vm106_vm0 = vcmask 130048   ;;  %v161_v4 = vld [vmem:[%s6011_s5 + $0x18] sm:$0xff]  ;;  %v160_v8 = vld [vmem:[%s6011_s5 + $0x10] sm:$0xff] }
  0x13   :  { %s6036_s23 = sld [smem:[#allocation11_spill]]  ;;  %258 = vmatpush.msra.mxu2 %v161_v4  ;;  %v177_v6 = vld [vmem:[%s6012_s6 + $0x18] sm:$0xff]  ;;  %v176_v9 = vld [vmem:[%s6012_s6 + $0x10] sm:$0xff]  ;;  %v159_v11 = vld [vmem:[%s6011_s5 + $0x8] sm:$0xff]  ;;  %vm213_vm1 = vcmask 261120   ;;  %vm295_vm2 = vcmask 64512  }
  0x14   :  { %s6037_s4 = sld [smem:[#allocation15_spill]]  ;;  %284 = vmatpush.msra.mxu3 %v177_v6  ;;  %v175_v12 = vld [vmem:[%s6012_s6 + $0x8] sm:$0xff]  ;;  %v158_v14 = vld [vmem:[%s6011_s5] sm:$0xff]  ;;  %v165_v57 = vld [vmem:[%s6011_s5 + $0x38] sm:$0xff] }
  0x15   :  { %259 = vmatpush.msra.mxu2 %v160_v8  ;;  %v174_v15 = vld [vmem:[%s6012_s6] sm:$0xff]  ;;  %s6038_s22 = sld [smem:[#allocation13_spill]]  ;;  %v164_v58 = vld [vmem:[%s6011_s5 + $0x30] sm:$0xff]  ;;  %v163_v59 = vld [vmem:[%s6011_s5 + $0x28] sm:$0xff] }
  0x16   :  { %285 = vmatpush.msra.mxu3 %v176_v9  ;;  %s6039_s2 = sld [smem:[#allocation14_spill]]  ;;  %v4755_v24 = vld [vmem:[%s6014_s8] ss:$0 sm:$0xff]  ;;  %v181_v61 = vld [vmem:[%s6012_s6 + $0x38] sm:$0xff]  ;;  %v180_v62 = vld [vmem:[%s6012_s6 + $0x30] sm:$0xff] }
  0x17   :  { %260 = vmatpush.msra.mxu2 %v159_v11  ;;  %v4756_v25 = vld [vmem:[%s6015_s9] ss:$0 sm:$0xff]  ;;  %v179_v63 = vld [vmem:[%s6012_s6 + $0x28] sm:$0xff] }
  0x18   :  { %v101_v0 = vld [vmem:[%s6035_s0 + $0x8] sm:$0xff]  ;;  %v100_v1 = vld [vmem:[%s6035_s0] sm:$0xff]  ;;  %286 = vmatpush.msra.mxu3 %v175_v12 }
  0x19   :  { %127 = vmatpush.msra.mxu0 %v101_v0  ;;  %v98_v2 = vld [vmem:[%s6036_s23] sm:$0xff]  ;;  %4743 = vmatpush.msra.mxu1 %v101_v0  ;;  %v99_v3 = vld [vmem:[%s6036_s23 + $0x8] sm:$0xff] }
  0x1a   :  { %v145_v5 = vld [vmem:[%s6037_s4 + $0x18] sm:$0xff]  ;;  %v144_v7 = vld [vmem:[%s6037_s4 + $0x10] sm:$0xff]  ;;  %v143_v10 = vld [vmem:[%s6037_s4 + $0x8] sm:$0xff]  ;;  %261 = vmatpush.msra.mxu2 %v158_v14  ;;  %287 = vmatpush.msra.mxu3 %v174_v15 }
  0x1b   :  { %128 = vmatpush.msra.mxu0 %v100_v1  ;;  %4744 = vmatpush.msra.mxu1 %v100_v1  ;;  %v142_v13 = vld [vmem:[%s6037_s4] sm:$0xff]  ;;  %v149_v37 = vld [vmem:[%s6037_s4 + $0x38] sm:$0xff]  ;;  %v148_v40 = vld [vmem:[%s6037_s4 + $0x30] sm:$0xff] }
  0x1c   :  { %4493 = vmatmul.msk.f32.vlgmr.msra.gmra.mxu0 %vm106_vm0, %v98_v2  ;;  %4494 = vmatmul.msk.f32.vlgmr.msra.gmra.mxu1 %vm106_vm0, %v99_v3  ;;  %v4752_v16 = vld [vmem:[%s6038_s22] ss:$0 sm:$0xff]  ;;  %v147_v41 = vld [vmem:[%s6037_s4 + $0x28] sm:$0xff] }
  0x1d   :  { %232 = vmatpush.msrb.mxu1 %v145_v5  ;;  %v4753_v17 = vld [vmem:[%s6039_s2] ss:$0 sm:$0xff] }
  0x1e   :  { %v4754_v27 = vld [vmem:[%s6013_s7] ss:$0 sm:$0xff] }
  0x1f   :  { %233 = vmatpush.msrb.mxu1 %v144_v7  ;;  %v146_v42 = vld [vmem:[%s6037_s4 + $0x20] sm:$0xff] }
  0x20   :  { %v162_v60 = vld [vmem:[%s6011_s5 + $0x20] sm:$0xff] }
  0x21   :  { %234 = vmatpush.msrb.mxu1 %v143_v10  ;;  %v178_v1 = vld [vmem:[%s6012_s6 + $0x20] sm:$0xff] }
  0x23   :  { %235 = vmatpush.msrb.mxu1 %v142_v13 }
  0x99   :  { %v130_v18 = vpop.f32.mrf.mxu0  ;;  %v133_v20 = vpop.f32.mrf.mxu1 }
  0x9a   :  { %v131_v19 = vadd.f32 %v4752_v16, %v130_v18  ;;  %v134_v22 = vadd.f32 %v4752_v16, %v133_v20 }
  0x9c   :  { %v5124_v21 = vadd.f32 %v4753_v17, %v131_v19  ;;  %v5132_v23 = vadd.f32 %v4753_v17, %v134_v22 }
  0x9e   :  { %4495 = vmatmul.msk.f32.vlgmr.msrb.gmra.mxu1 %vm213_vm1, %v5124_v21  ;;  %4497 = vmatmul.msk.f32.vlgmr.msra.gmra.mxu2 %vm213_vm1, %v5124_v21 }
  0x9f   :  { %4499 = vmatmul.msk.f32.vlgmr.msra.gmra.mxu3 %vm213_vm1, %v5124_v21 }
  0xa6   :  { %4496 = vmatmul.msk.f32.gmra.mxu1 %vm213_vm1, %v5132_v23  ;;  %4498 = vmatmul.msk.f32.gmra.mxu2 %vm213_vm1, %v5132_v23 }
  0xa7   :  { %4500 = vmatmul.msk.f32.gmra.mxu3 %vm213_vm1, %v5132_v23 }
 0x11b   :  { %v237_v26 = vpop.f32.mrf.mxu1 }
 0x11c   :  { %v238_v32 = vadd.f32 %v4754_v27, %v237_v26 }
 0x121   :  { %v263_v28 = vpop.f32.mrf.mxu2 }
 0x122   :  { %v264_v29 = vadd.f32 %v4755_v24, %v263_v28  ;;  %v289_v30 = vpop.f32.mrf.mxu3 }
 0x123   :  { %v290_v31 = vadd.f32 %v4756_v25, %v289_v30  ;;  %v240_v34 = vpop.f32.mrf.mxu1 }
 0x124   :  { %4501 = vmatpush.xpose.msk.msrb.mxu0 %vm295_vm2, %v264_v29  ;;  %v241_v39 = vadd.f32 %v4754_v27, %v240_v34  ;;  %v202_v27 = vld [vmem:[%s6016_s10] sm:$0xff] }
 0x125   :  { %414 = vmatpush.msrb.mxu2 %v290_v31  ;;  %v4758_v29 = vld [vmem:[%s6014_s8 + $0x1] ss:$0 sm:$0xff] }
 0x126   :  { %v4757_v34 = vld [vmem:[%s6013_s7 + $0x1] ss:$0 sm:$0xff] }
 0x127   :  { %4502 = vmatmul.msk.f32.vlgmr.msrb.gmra.mxu0 %vm295_vm2, %v238_v32  ;;  %514 = vmatpush.msra.mxu2 %v165_v57 }
 0x128   :  { %463 = vmatpush.msra.mxu0 %v202_v27 }
 0x129   :  { %v266_v33 = vpop.f32.mrf.mxu2  ;;  %515 = vmatpush.msra.mxu2 %v164_v58 }
 0x12a   :  { %v267_v35 = vadd.f32 %v4755_v24, %v266_v33  ;;  %v292_v36 = vpop.f32.mrf.mxu3 }
 0x12b   :  { %v293_v38 = vadd.f32 %v4756_v25, %v292_v36  ;;  %516 = vmatpush.msra.mxu2 %v163_v59 }
 0x12c   :  { %4503 = vmatpush.xpose.msk.msra.mxu1 %vm295_vm2, %v267_v35  ;;  %v4759_v35 = vld [vmem:[%s6015_s9 + $0x1] ss:$0 sm:$0xff] }
 0x12d   :  { %437 = vmatpush.msrb.mxu3 %v293_v38  ;;  %517 = vmatpush.msra.mxu2 %v162_v60 }
 0x12f   :  { %4504 = vmatmul.msk.f32.vlgmr.msra.gmra.mxu1 %vm295_vm2, %v241_v39  ;;  %540 = vmatpush.msra.mxu3 %v181_v61 }
 0x130   :  { %488 = vmatpush.msrb.mxu1 %v149_v37 }
 0x131   :  { %541 = vmatpush.msra.mxu3 %v180_v62 }
 0x132   :  { %489 = vmatpush.msrb.mxu1 %v148_v40 }
 0x133   :  { %542 = vmatpush.msra.mxu3 %v179_v63 }
 0x134   :  { %490 = vmatpush.msrb.mxu1 %v147_v41 }
 0x135   :  { %543 = vmatpush.msra.mxu3 %v178_v1  ;;  %v169_v1 = vld [vmem:[%s6011_s5 + $0x58] sm:$0xff] }
 0x136   :  { %491 = vmatpush.msrb.mxu1 %v146_v42  ;;  %v153_v42 = vld [vmem:[%s6037_s4 + $0x58] sm:$0xff] }
 0x137   :  { %4509 = vmatmul.msk.f32.vlgmr.msrb.gmra.mxu1 %vm213_vm1, %v5124_v21 }
 0x13f   :  { %4510 = vmatmul.msk.f32.gmra.mxu1 %vm213_vm1, %v5132_v23 }
 0x1a4   :  { %v319_v43 = vpop.f32.mrf.mxu0 }
 0x1a5   :  { %v348_v44 = vsel %vm295_vm2, %v319_v43, -inf }
 0x1a6   :  { %349 = vmax.xlane.f32.xlu0 %v348_v44  ;;  %v152_v44 = vld [vmem:[%s6037_s4 + $0x50] sm:$0xff] }
 0x1ac   :  { %v345_v45 = vpop.f32.mrf.mxu1 }
 0x1ad   :  { %v351_v46 = vsel %vm295_vm2, %v345_v45, -inf }
 0x1ae   :  { %352 = vmax.xlane.f32.xlu0 %v351_v46 }
 0x1b4   :  { %v493_v30 = vpop.f32.mrf.mxu1 }
 0x1b5   :  { %v494_v36 = vadd.f32 %v4757_v34, %v493_v30 }
 0x1bc   :  { %v496_v39 = vpop.f32.mrf.mxu1 }
 0x219   :  { %v350_v47 = vpop.xlane.xlu0 %349 }
 0x21a   :  { %v354_v48 = vsub.f32 %v319_v43, %v350_v47  ;;  %v497_v43 = vadd.f32 %v4757_v34, %v496_v39  ;;  %v150_v47 = vld [vmem:[%s6037_s4 + $0x40] sm:$0xff] }
 0x21c   :  { %v356_v49 = vmul.f32 1.442695, %v354_v48 }
 0x21e   :  { %4790 = vpow2.f32 %v356_v49 }
 0x221   :  { %v353_v50 = vpop.xlane.xlu0 %352 }
 0x222   :  { %v355_v51 = vsub.f32 %v345_v45, %v353_v50  ;;  %v151_v45 = vld [vmem:[%s6037_s4 + $0x48] sm:$0xff] }
 0x224   :  { %v4791_v52 = vpop.eup %4790  ;;  %v358_v53 = vmul.f32 1.442695, %v355_v51 }
 0x225   :  { %v360_v54 = vsel %vm295_vm2, %v4791_v52, 0.0 }
 0x226   :  { %4792 = vpow2.f32 %v358_v53  ;;  %361 = vadd.xlane.f32.xlu1 %v360_v54 }
 0x22c   :  { %v4793_v55 = vpop.eup %4792 }
 0x22d   :  { %v363_v56 = vsel %vm295_vm2, %v4793_v55, 0.0 }
 0x22e   :  { %364 = vadd.xlane.f32.xlu1 %v363_v56 }
 0x299   :  { %v362_v0 = vpop.xlane.xlu1 %361 }
 0x29a   :  { %4794 = vrcp.f32 %v362_v0  ;;  %v377_v6 = vand.u32 2147483648, %v362_v0  ;;  %v375_v8 = vand.u32 2147483647, %v362_v0  ;;  %vm371_vm4 = vweird.f32 %v362_v0 }
 0x29c   :  { %v378_v11 = vor.u32 1.1754944e-38, %v377_v6  ;;  %vm376_vm6 = vcmp.eq.f32.partialorder %v375_v8, 8.507059e+37  ;;  %v184_v6 = vld [vmem:[%s6012_s6 + $0x50] sm:$0xff] }
 0x2a0   :  { %v4795_v2 = vpop.eup %4794 }
 0x2a1   :  { %v367_v3 = vmul.f32 %v4795_v2, %v362_v0  ;;  %v365_v4 = vpop.xlane.xlu1 %364  ;;  %vm372_vm3 = vweird.f32 %v4795_v2 }
 0x2a2   :  { %4796 = vrcp.f32 %v365_v4  ;;  %vm373_vm5 = vmor %vm371_vm4, %vm372_vm3  ;;  %v391_v17 = vand.u32 2147483648, %v365_v4  ;;  %v389_v19 = vand.u32 2147483647, %v365_v4  ;;  %vm385_vm8 = vweird.f32 %v365_v4 }
 0x2a3   :  { %v368_v5 = vsub.f32 1.0, %v367_v3  ;;  %v167_v3 = vld [vmem:[%s6011_s5 + $0x48] sm:$0xff] }
 0x2a4   :  { %v392_v22 = vor.u32 1.1754944e-38, %v391_v17  ;;  %vm390_vm10 = vcmp.eq.f32.partialorder %v389_v19, 8.507059e+37 }
 0x2a5   :  { %v369_v7 = vmul.f32 %v4795_v2, %v368_v5  ;;  %v185_v5 = vld [vmem:[%s6012_s6 + $0x58] sm:$0xff] }
 0x2a7   :  { %v370_v9 = vadd.f32 %v4795_v2, %v369_v7  ;;  %v183_v7 = vld [vmem:[%s6012_s6 + $0x48] sm:$0xff] }
 0x2a8   :  { %v4797_v10 = vpop.eup %4796 }
 0x2a9   :  { %v381_v12 = vmul.f32 %v4797_v10, %v365_v4  ;;  %v374_v13 = vsel %vm373_vm5, %v4795_v2, %v370_v9  ;;  %vm386_vm7 = vweird.f32 %v4797_v10  ;;  %v168_v2 = vld [vmem:[%s6011_s5 + $0x50] sm:$0xff]  ;;  %v166_v4 = vld [vmem:[%s6011_s5 + $0x40] sm:$0xff] }
 0x2aa   :  { %v379_v14 = vsel %vm376_vm6, %v378_v11, %v374_v13  ;;  %vm387_vm9 = vmor %vm385_vm8, %vm386_vm7  ;;  %v182_v9 = vld [vmem:[%s6012_s6 + $0x40] sm:$0xff] }
 0x2ab   :  { %v382_v15 = vsub.f32 1.0, %v381_v12  ;;  %v394_v16 = vmul.f32 %v4791_v52, %v379_v14 }
 0x2ad   :  { %v383_v18 = vmul.f32 %v4797_v10, %v382_v15  ;;  %4505 = vmatmul.msk.f32.vlgmr.msrb.gmra.mxu2 %vm295_vm2, %v394_v16 }
 0x2af   :  { %v384_v20 = vadd.f32 %v4797_v10, %v383_v18 }
 0x2b1   :  { %v388_v24 = vsel %vm387_vm9, %v4797_v10, %v384_v20 }
 0x2b2   :  { %v393_v25 = vsel %vm390_vm10, %v392_v22, %v388_v24 }
 0x2b3   :  { %v395_v26 = vmul.f32 %v4793_v55, %v393_v25 }
 0x2b5   :  { %4506 = vmatmul.msk.f32.vlgmr.msrb.gmra.mxu3 %vm295_vm2, %v395_v26  ;;  %4511 = vmatmul.msk.f32.vlgmr.msra.gmra.mxu2 %vm213_vm1, %v5124_v21 }
 0x2bd   :  { %4512 = vmatmul.msk.f32.gmra.mxu2 %vm213_vm1, %v5132_v23  ;;  %4513 = vmatmul.msk.f32.vlgmr.msra.gmra.mxu3 %vm213_vm1, %v5124_v21 }
 0x2c5   :  { %4514 = vmatmul.msk.f32.gmra.mxu3 %vm213_vm1, %v5132_v23 }
 0x330   :  { %v416_v28 = vpop.f32.mrf.mxu2 }
 0x331   :  { %4507 = vmatmul.msk.f32.vlgmr.msra.gmra.mxu0 %vm295_vm2, %v416_v28 }
 0x338   :  { %v439_v31 = vpop.f32.mrf.mxu3  ;;  %v519_v32 = vpop.f32.mrf.mxu2 }
 0x339   :  { %v520_v33 = vadd.f32 %v4758_v29, %v519_v32  ;;  %4508 = vmatmul.msk.f32.gmra.mxu0 %vm295_vm2, %v439_v31 }
 0x33b   :  { %4515 = vmatpush.xpose.msk.msrb.mxu0 %vm295_vm2, %v520_v33 }
 0x340   :  { %v522_v37 = vpop.f32.mrf.mxu2  ;;  %v545_v38 = vpop.f32.mrf.mxu3 }
 0x341   :  { %v523_v40 = vadd.f32 %v4758_v29, %v522_v37  ;;  %v546_v41 = vadd.f32 %v4759_v35, %v545_v38  ;;  %4516 = vmatmul.msk.f32.vlgmr.msrb.gmra.mxu0 %vm295_vm2, %v494_v36  ;;  %v4762_v37 = vld [vmem:[%s6014_s8 + $0x2] ss:$0 sm:$0xff] }
 0x343   :  { %4517 = vmatpush.xpose.msk.msra.mxu1 %vm295_vm2, %v523_v40  ;;  %669 = vmatpush.msrb.mxu2 %v546_v41 }
 0x345   :  { %769 = vmatpush.msra.mxu2 %v169_v1 }
 0x346   :  { %4518 = vmatmul.msk.f32.vlgmr.msra.gmra.mxu1 %vm295_vm2, %v497_v43  ;;  %v4763_v43 = vld [vmem:[%s6015_s9 + $0x2] ss:$0 sm:$0xff] }
 0x347   :  { %743 = vmatpush.msrb.mxu1 %v153_v42  ;;  %770 = vmatpush.msra.mxu2 %v168_v2  ;;  %v4761_v42 = vld [vmem:[%s6013_s7 + $0x2] ss:$0 sm:$0xff] }
 0x348   :  { %v548_v46 = vpop.f32.mrf.mxu3 }
 0x349   :  { %744 = vmatpush.msrb.mxu1 %v152_v44  ;;  %v549_v48 = vadd.f32 %v4759_v35, %v548_v46  ;;  %771 = vmatpush.msra.mxu2 %v167_v3  ;;  %v203_v35 = vld [vmem:[%s6016_s10 + $0x8] sm:$0xff] }
 0x34a   :  { %718 = vmatpush.msra.mxu0 %v203_v35 }
 0x34b   :  { %745 = vmatpush.msrb.mxu1 %v151_v45  ;;  %692 = vmatpush.msrb.mxu3 %v549_v48 }
 0x34c   :  { %772 = vmatpush.msra.mxu2 %v166_v4 }
 0x34d   :  { %746 = vmatpush.msrb.mxu1 %v150_v47  ;;  %795 = vmatpush.msra.mxu3 %v185_v5 }
 0x34e   :  { %4523 = vmatmul.msk.f32.vlgmr.msrb.gmra.mxu1 %vm213_vm1, %v5124_v21 }
 0x34f   :  { %796 = vmatpush.msra.mxu3 %v184_v6 }
 0x351   :  { %797 = vmatpush.msra.mxu3 %v183_v7 }
 0x353   :  { %798 = vmatpush.msra.mxu3 %v182_v9 }
 0x356   :  { %4524 = vmatmul.msk.f32.gmra.mxu1 %vm213_vm1, %v5132_v23 }
 0x3ae   :  { %v5241_v49 = vpop.f32.mrf.mxu0 }
 0x3b6   :  { %v5243_v50 = vpop.f32.mrf.mxu0 }
 0x3be   :  { %v574_v51 = vpop.f32.mrf.mxu0 }
 0x3bf   :  { %v603_v52 = vsel %vm295_vm2, %v574_v51, -inf }
 0x3c0   :  { %604 = vmax.xlane.f32.xlu2 %v603_v52  ;;  %v157_v52 = vld [vmem:[%s6037_s4 + $0x78] sm:$0xff] }
 0x3c3   :  { %v600_v53 = vpop.f32.mrf.mxu1 }
 0x3c4   :  { %v606_v54 = vsel %vm295_vm2, %v600_v53, -inf }
 0x3c8   :  { %607 = vmax.xlane.f32.xlu2 %v606_v54  ;;  %v156_v54 = vld [vmem:[%s6037_s4 + $0x70] sm:$0xff] }
 0x3cb   :  { %v748_v38 = vpop.f32.mrf.mxu1 }
 0x3cc   :  { %v749_v44 = vadd.f32 %v4761_v42, %v748_v38 }
 0x3d3   :  { %v751_v47 = vpop.f32.mrf.mxu1 }
 0x433   :  { %v605_v55 = vpop.xlane.xlu2 %604 }
 0x434   :  { %v609_v56 = vsub.f32 %v574_v51, %v605_v55  ;;  %v155_v55 = vld [vmem:[%s6037_s4 + $0x68] sm:$0xff] }
 0x436   :  { %v611_v57 = vmul.f32 1.442695, %v609_v56 }
 0x438   :  { %4798 = vpow2.f32 %v611_v57  ;;  %v154_v57 = vld [vmem:[%s6037_s4 + $0x60] sm:$0xff] }
 0x43b   :  { %v608_v58 = vpop.xlane.xlu2 %607 }
 0x43c   :  { %v610_v59 = vsub.f32 %v600_v53, %v608_v58  ;;  %v752_v53 = vadd.f32 %v4761_v42, %v751_v47 }
 0x43e   :  { %v4799_v60 = vpop.eup %4798  ;;  %v613_v61 = vmul.f32 1.442695, %v610_v59 }
 0x43f   :  { %v615_v62 = vsel %vm295_vm2, %v4799_v60, 0.0 }
 0x440   :  { %4800 = vpow2.f32 %v613_v61  ;;  %616 = vadd.xlane.f32.xlu0 %v615_v62 }
 0x446   :  { %v4801_v63 = vpop.eup %4800 }
 0x447   :  { %v618_v0 = vsel %vm295_vm2, %v4801_v63, 0.0 }
 0x448   :  { %619 = vadd.xlane.f32.xlu1 %v618_v0 }
 0x4b3   :  { %v617_v8 = vpop.xlane.xlu0 %616 }
 0x4b4   :  { %4802 = vrcp.f32 %v617_v8  ;;  %v632_v14 = vand.u32 2147483648, %v617_v8  ;;  %v630_v16 = vand.u32 2147483647, %v617_v8  ;;  %vm626_vm12 = vweird.f32 %v617_v8 }
 0x4b6   :  { %v633_v19 = vor.u32 1.1754944e-38, %v632_v14  ;;  %vm631_vm14 = vcmp.eq.f32.partialorder %v630_v16, 8.507059e+37  ;;  %v189_v14 = vld [vmem:[%s6012_s6 + $0x78] sm:$0xff]  ;;  %v188_v16 = vld [vmem:[%s6012_s6 + $0x70] sm:$0xff] }
 0x4ba   :  { %v4803_v10 = vpop.eup %4802 }
 0x4bb   :  { %v622_v11 = vmul.f32 %v4803_v10, %v617_v8  ;;  %v620_v12 = vpop.xlane.xlu1 %619  ;;  %vm627_vm11 = vweird.f32 %v4803_v10 }
 0x4bc   :  { %4804 = vrcp.f32 %v620_v12  ;;  %vm628_vm13 = vmor %vm626_vm12, %vm627_vm11  ;;  %v646_v27 = vand.u32 2147483648, %v620_v12  ;;  %v644_v29 = vand.u32 2147483647, %v620_v12  ;;  %vm640_vm0 = vweird.f32 %v620_v12 }
 0x4bd   :  { %v623_v13 = vsub.f32 1.0, %v622_v11  ;;  %v173_v11 = vld [vmem:[%s6011_s5 + $0x78] sm:$0xff] }
 0x4be   :  { %v647_v31 = vor.u32 1.1754944e-38, %v646_v27  ;;  %vm645_vm4 = vcmp.eq.f32.partialorder %v644_v29, 8.507059e+37 }
 0x4bf   :  { %v624_v15 = vmul.f32 %v4803_v10, %v623_v13  ;;  %v171_v13 = vld [vmem:[%s6011_s5 + $0x68] sm:$0xff] }
 0x4c1   :  { %v625_v17 = vadd.f32 %v4803_v10, %v624_v15  ;;  %v170_v15 = vld [vmem:[%s6011_s5 + $0x60] sm:$0xff] }
 0x4c2   :  { %v4805_v18 = vpop.eup %4804 }
 0x4c3   :  { %v629_v20 = vsel %vm628_vm13, %v4803_v10, %v625_v17  ;;  %v636_v22 = vmul.f32 %v4805_v18, %v620_v12  ;;  %vm641_vm15 = vweird.f32 %v4805_v18  ;;  %v172_v12 = vld [vmem:[%s6011_s5 + $0x70] sm:$0xff]  ;;  %v187_v17 = vld [vmem:[%s6012_s6 + $0x68] sm:$0xff] }
 0x4c4   :  { %v634_v24 = vsel %vm631_vm14, %v633_v19, %v629_v20  ;;  %vm642_vm3 = vmor %vm640_vm0, %vm641_vm15 }
 0x4c5   :  { %v637_v25 = vsub.f32 1.0, %v636_v22  ;;  %v649_v26 = vmul.f32 %v4799_v60, %v634_v24 }
 0x4c7   :  { %v638_v28 = vmul.f32 %v4805_v18, %v637_v25  ;;  %4519 = vmatmul.msk.f32.vlgmr.msrb.gmra.mxu2 %vm295_vm2, %v649_v26 }
 0x4c9   :  { %v639_v30 = vadd.f32 %v4805_v18, %v638_v28 }
 0x4cb   :  { %v643_v32 = vsel %vm642_vm3, %v4805_v18, %v639_v30  ;;  %v186_v18 = vld [vmem:[%s6012_s6 + $0x60] sm:$0xff] }
 0x4cc   :  { %v648_v33 = vsel %vm645_vm4, %v647_v31, %v643_v32 }
 0x4cd   :  { %v650_v34 = vmul.f32 %v4801_v63, %v648_v33 }
 0x4cf   :  { %4520 = vmatmul.msk.f32.vlgmr.msrb.gmra.mxu3 %vm295_vm2, %v650_v34  ;;  %4525 = vmatmul.msk.f32.vlgmr.msra.gmra.mxu2 %vm213_vm1, %v5124_v21 }
 0x4d7   :  { %4526 = vmatmul.msk.f32.gmra.mxu2 %vm213_vm1, %v5132_v23  ;;  %4527 = vmatmul.msk.f32.vlgmr.msra.gmra.mxu3 %vm213_vm1, %v5124_v21 }
 0x4df   :  { %4528 = vmatmul.msk.f32.gmra.mxu3 %vm213_vm1, %v5132_v23 }
 0x54a   :  { %v671_v36 = vpop.f32.mrf.mxu2 }
 0x54b   :  { %4521 = vmatmul.msk.f32.vlgmr.msra.gmra.mxu0 %vm295_vm2, %v671_v36 }
 0x552   :  { %v694_v39 = vpop.f32.mrf.mxu3  ;;  %v774_v40 = vpop.f32.mrf.mxu2 }
 0x553   :  { %v775_v41 = vadd.f32 %v4762_v37, %v774_v40  ;;  %4522 = vmatmul.msk.f32.gmra.mxu0 %vm295_vm2, %v694_v39 }
 0x555   :  { %4529 = vmatpush.xpose.msk.msrb.mxu0 %vm295_vm2, %v775_v41 }
 0x55a   :  { %v777_v45 = vpop.f32.mrf.mxu2  ;;  %v800_v46 = vpop.f32.mrf.mxu3 }
 0x55b   :  { %v778_v48 = vadd.f32 %v4762_v37, %v777_v45  ;;  %v801_v51 = vadd.f32 %v4763_v43, %v800_v46  ;;  %4530 = vmatmul.msk.f32.vlgmr.msrb.gmra.mxu0 %vm295_vm2, %v749_v44  ;;  %v204_v45 = vld [vmem:[%s6016_s10 + $0x10] sm:$0xff] }
 0x55c   :  { %973 = vmatpush.msra.mxu0 %v204_v45  ;;  %v205_v45 = vld [vmem:[%s6016_s10 + $0x18] sm:$0xff] }
 0x55d   :  { %4531 = vmatpush.xpose.msk.msra.mxu1 %vm295_vm2, %v778_v48  ;;  %924 = vmatpush.msrb.mxu2 %v801_v51  ;;  %v4765_v48 = vld [vmem:[%s6014_s8 + $0x3] ss:$0 sm:$0xff] }
 0x55f   :  { %1024 = vmatpush.msra.mxu2 %v173_v11 }
 0x560   :  { %4532 = vmatmul.msk.f32.vlgmr.msra.gmra.mxu1 %vm295_vm2, %v752_v53 }
 0x561   :  { %998 = vmatpush.msrb.mxu1 %v157_v52  ;;  %1025 = vmatpush.msra.mxu2 %v172_v12 }
 0x562   :  { %v803_v56 = vpop.f32.mrf.mxu3 }
 0x563   :  { %999 = vmatpush.msrb.mxu1 %v156_v54  ;;  %v804_v58 = vadd.f32 %v4763_v43, %v803_v56  ;;  %1026 = vmatpush.msra.mxu2 %v171_v13  ;;  %v4766_v54 = vld [vmem:[%s6015_s9 + $0x3] ss:$0 sm:$0xff] }
 0x565   :  { %1000 = vmatpush.msrb.mxu1 %v155_v55  ;;  %947 = vmatpush.msrb.mxu3 %v804_v58  ;;  %v4764_v55 = vld [vmem:[%s6013_s7 + $0x3] ss:$0 sm:$0xff] }
 0x566   :  { %1027 = vmatpush.msra.mxu2 %v170_v15 }
 0x567   :  { %1001 = vmatpush.msrb.mxu1 %v154_v57  ;;  %1050 = vmatpush.msra.mxu3 %v189_v14 }
 0x568   :  { %4537 = vmatmul.msk.f32.vlgmr.msrb.gmra.mxu1 %vm213_vm1, %v5124_v21 }
 0x569   :  { %1051 = vmatpush.msra.mxu3 %v188_v16 }
 0x56b   :  { %1052 = vmatpush.msra.mxu3 %v187_v17 }
 0x56d   :  { %1053 = vmatpush.msra.mxu3 %v186_v18 }
 0x570   :  { %4538 = vmatmul.msk.f32.gmra.mxu1 %vm213_vm1, %v5132_v23 }
 0x5c8   :  { %v5317_v59 = vpop.f32.mrf.mxu0 }
 0x5d0   :  { %v5319_v60 = vpop.f32.mrf.mxu0 }
 0x5d8   :  { %v829_v61 = vpop.f32.mrf.mxu0 }
 0x5d9   :  { %v858_v62 = vsel %vm295_vm2, %v829_v61, -inf }
 0x5da   :  { %859 = vmax.xlane.f32.xlu2 %v858_v62 }
 0x5dd   :  { %v855_v63 = vpop.f32.mrf.mxu1 }
 0x5de   :  { %v861_v0 = vsel %vm295_vm2, %v855_v63, -inf }
 0x5df   :  { %862 = vmax.xlane.f32.xlu0 %v861_v0 }
 0x5e5   :  { %v1003_v51 = vpop.f32.mrf.mxu1 }
 0x5e6   :  { %v1004_v58 = vadd.f32 %v4764_v55, %v1003_v51 }
 0x5ed   :  { %v1006_v62 = vpop.f32.mrf.mxu1 }
 0x5ee   :  { %v1007_v0 = vadd.f32 %v4764_v55, %v1006_v62 }
 0x64d   :  { %v860_v1 = vpop.xlane.xlu2 %859 }
 0x64e   :  { %v864_v2 = vsub.f32 %v829_v61, %v860_v1 }
 0x650   :  { %v866_v3 = vmul.f32 1.442695, %v864_v2 }
 0x652   :  { %4806 = vpow2.f32 %v866_v3  ;;  %v863_v4 = vpop.xlane.xlu0 %862 }
 0x653   :  { %v865_v5 = vsub.f32 %v855_v63, %v863_v4 }
 0x655   :  { %v868_v6 = vmul.f32 1.442695, %v865_v5 }
 0x657   :  { %4808 = vpow2.f32 %v868_v6 }
 0x658   :  { %v4807_v7 = vpop.eup %4806 }
 0x659   :  { %v870_v8 = vsel %vm295_vm2, %v4807_v7, 0.0 }
 0x65a   :  { %871 = vadd.xlane.f32.xlu1 %v870_v8 }
 0x65d   :  { %v4809_v9 = vpop.eup %4808 }
 0x65e   :  { %v873_v10 = vsel %vm295_vm2, %v4809_v9, 0.0 }
 0x65f   :  { %874 = vadd.xlane.f32.xlu2 %v873_v10 }
 0x6cd   :  { %v872_v19 = vpop.xlane.xlu1 %871 }
 0x6ce   :  { %4810 = vrcp.f32 %v872_v19  ;;  %v887_v26 = vand.u32 2147483648, %v872_v19  ;;  %v885_v29 = vand.u32 2147483647, %v872_v19  ;;  %vm881_vm6 = vweird.f32 %v872_v19 }
 0x6d0   :  { %v888_v32 = vor.u32 1.1754944e-38, %v887_v26  ;;  %vm886_vm8 = vcmp.eq.f32.partialorder %v885_v29, 8.507059e+37 }
 0x6d2   :  { %v875_v20 = vpop.xlane.xlu2 %874 }
 0x6d3   :  { %4812 = vrcp.f32 %v875_v20  ;;  %v901_v35 = vand.u32 2147483648, %v875_v20  ;;  %v899_v38 = vand.u32 2147483647, %v875_v20  ;;  %vm895_vm10 = vweird.f32 %v875_v20 }
 0x6d4   :  { %v4811_v22 = vpop.eup %4810 }
 0x6d5   :  { %v877_v24 = vmul.f32 %v4811_v22, %v872_v19  ;;  %vm882_vm5 = vweird.f32 %v4811_v22  ;;  %v902_v41 = vor.u32 1.1754944e-38, %v901_v35  ;;  %vm900_vm12 = vcmp.eq.f32.partialorder %v899_v38, 8.507059e+37 }
 0x6d6   :  { %vm883_vm7 = vmor %vm881_vm6, %vm882_vm5 }
 0x6d7   :  { %v878_v25 = vsub.f32 1.0, %v877_v24 }
 0x6d9   :  { %v4813_v27 = vpop.eup %4812  ;;  %v879_v28 = vmul.f32 %v4811_v22, %v878_v25 }
 0x6da   :  { %v891_v30 = vmul.f32 %v4813_v27, %v875_v20  ;;  %vm896_vm9 = vweird.f32 %v4813_v27 }
 0x6db   :  { %v880_v31 = vadd.f32 %v4811_v22, %v879_v28  ;;  %vm897_vm11 = vmor %vm895_vm10, %vm896_vm9 }
 0x6dc   :  { %v892_v33 = vsub.f32 1.0, %v891_v30 }
 0x6dd   :  { %v884_v34 = vsel %vm883_vm7, %v4811_v22, %v880_v31 }
 0x6de   :  { %v889_v36 = vsel %vm886_vm8, %v888_v32, %v884_v34  ;;  %v893_v37 = vmul.f32 %v4813_v27, %v892_v33 }
 0x6df   :  { %v904_v39 = vmul.f32 %v4807_v7, %v889_v36 }
 0x6e0   :  { %v894_v40 = vadd.f32 %v4813_v27, %v893_v37 }
 0x6e1   :  { %4533 = vmatmul.msk.f32.vlgmr.msrb.gmra.mxu2 %vm295_vm2, %v904_v39 }
 0x6e2   :  { %v898_v42 = vsel %vm897_vm11, %v4813_v27, %v894_v40 }
 0x6e3   :  { %v903_v43 = vsel %vm900_vm12, %v902_v41, %v898_v42 }
 0x6e4   :  { %v905_v44 = vmul.f32 %v4809_v9, %v903_v43 }
 0x6e6   :  { %4534 = vmatmul.msk.f32.vlgmr.msrb.gmra.mxu3 %vm295_vm2, %v905_v44 }
 0x6e9   :  { %4539 = vmatmul.msk.f32.vlgmr.msra.gmra.mxu2 %vm213_vm1, %v5124_v21 }
 0x6ee   :  { %4541 = vmatmul.msk.f32.vlgmr.msra.gmra.mxu3 %vm213_vm1, %v5124_v21 }
 0x6f1   :  { %4540 = vmatmul.msk.f32.gmra.mxu2 %vm213_vm1, %v5132_v23 }
 0x6f6   :  { %4542 = vmatmul.msk.f32.gmra.mxu3 %vm213_vm1, %v5132_v23 }
 0x764   :  { %v926_v46 = vpop.f32.mrf.mxu2 }
 0x765   :  { %4535 = vmatmul.msk.f32.vlgmr.msra.gmra.mxu0 %vm295_vm2, %v926_v46 }
 0x769   :  { %v949_v47 = vpop.f32.mrf.mxu3 }
 0x76c   :  { %v1029_v52 = vpop.f32.mrf.mxu2 }
 0x76d   :  { %v1030_v53 = vadd.f32 %v4765_v48, %v1029_v52  ;;  %4536 = vmatmul.msk.f32.gmra.mxu0 %vm295_vm2, %v949_v47 }
 0x76f   :  { %4543 = vmatpush.xpose.msk.msrb.mxu0 %vm295_vm2, %v1030_v53 }
 0x771   :  { %v1055_v56 = vpop.f32.mrf.mxu3 }
 0x772   :  { %v1056_v57 = vadd.f32 %v4766_v54, %v1055_v56 }
 0x773   :  { %1228 = vmatpush.msra.mxu0 %v205_v45 }
 0x774   :  { %v1032_v61 = vpop.f32.mrf.mxu2  ;;  %1179 = vmatpush.msrb.mxu2 %v1056_v57 }
 0x775   :  { %v1033_v63 = vadd.f32 %v4765_v48, %v1032_v61  ;;  %4544 = vmatmul.msk.f32.vlgmr.msrb.gmra.mxu0 %vm295_vm2, %v1004_v58  ;;  %v4760_v48 = vld [vmem:[%s6017_s11] ss:$0 sm:$0xff] }
 0x776   :  { %v471_v51 = vadd.f32 %v4760_v48, %v5241_v49  ;;  %v472_v56 = vadd.f32 %v4760_v48, %v5243_v50  ;;  %v1326_v48 = vld [vmem:[#allocation2 + $0xb8] sm:$0xff] }
 0x777   :  { %4545 = vmatpush.xpose.msk.msra.mxu1 %vm295_vm2, %v1033_v63 }
 0x778   :  { %v726_v52 = vadd.f32 %v5317_v59, %v471_v51  ;;  %v727_v58 = vadd.f32 %v5319_v60, %v472_v56  ;;  %v1307_v51 = vld [vmem:[#allocation2 + $0x20] sm:$0xff]  ;;  %v1310_v56 = vld [vmem:[#allocation2 + $0x38] sm:$0xff] }
 0x779   :  { %v1058_v1 = vpop.f32.mrf.mxu3 }
 0x77a   :  { %v1059_v2 = vadd.f32 %v4766_v54, %v1058_v1  ;;  %4546 = vmatmul.msk.f32.vlgmr.msra.gmra.mxu1 %vm295_vm2, %v1007_v0  ;;  %v4954_v1 = vmov 32.0  }
 0x77c   :  { %1202 = vmatpush.msrb.mxu3 %v1059_v2 }
 0x7e2   :  { %v5377_v3 = vpop.f32.mrf.mxu0 }
 0x7e3   :  { %v981_v53 = vadd.f32 %v5377_v3, %v726_v52  ;;  %v1308_v52 = vld [vmem:[#allocation2 + $0x28] sm:$0xff] }
 0x7ea   :  { %v5379_v4 = vpop.f32.mrf.mxu0 }
 0x7eb   :  { %v982_v62 = vadd.f32 %v5379_v4, %v727_v58 }
 0x7f2   :  { %v1084_v5 = vpop.f32.mrf.mxu0 }
 0x7f3   :  { %v1113_v6 = vsel %vm295_vm2, %v1084_v5, -inf }
 0x7f4   :  { %1114 = vmax.xlane.f32.xlu0 %v1113_v6 }
 0x7f7   :  { %v1110_v7 = vpop.f32.mrf.mxu1 }
 0x7f8   :  { %v1116_v8 = vsel %vm295_vm2, %v1110_v7, -inf }
 0x7f9   :  { %1117 = vmax.xlane.f32.xlu1 %v1116_v8 }
 0x867   :  { %v1115_v9 = vpop.xlane.xlu0 %1114 }
 0x868   :  { %v1119_v10 = vsub.f32 %v1084_v5, %v1115_v9 }
 0x86a   :  { %v1121_v11 = vmul.f32 1.442695, %v1119_v10 }
 0x86c   :  { %4814 = vpow2.f32 %v1121_v11  ;;  %v1118_v12 = vpop.xlane.xlu1 %1117 }
 0x86d   :  { %v1120_v13 = vsub.f32 %v1110_v7, %v1118_v12 }
 0x86f   :  { %v1123_v14 = vmul.f32 1.442695, %v1120_v13 }
 0x871   :  { %4816 = vpow2.f32 %v1123_v14  ;;  %v1351_v14 = vld [vmem:[#allocation2 + $0x180] sm:$0xff] }
 0x872   :  { %v4815_v15 = vpop.eup %4814  ;;  %1421 = vmatpush.msrb.mxu1 %v1351_v14  ;;  %v1344_v14 = vld [vmem:[#allocation2 + $0x148] sm:$0xff] }
 0x873   :  { %v1125_v16 = vsel %vm295_vm2, %v4815_v15, 0.0 }
 0x874   :  { %1126 = vadd.xlane.f32.xlu2 %v1125_v16  ;;  %v1353_v16 = vld [vmem:[#allocation2 + $0x190] sm:$0xff] }
 0x875   :  { %1467 = vmatpush.msra.mxu3 %v1353_v16  ;;  %v1345_v16 = vld [vmem:[#allocation2 + $0x150] sm:$0xff] }
 0x877   :  { %v4817_v17 = vpop.eup %4816 }
 0x878   :  { %v1128_v18 = vsel %vm295_vm2, %v4817_v17, 0.0 }
 0x879   :  { %1129 = vadd.xlane.f32.xlu0 %v1128_v18  ;;  %v1335_v18 = vld [vmem:[#allocation2 + $0x100] sm:$0xff] }
 0x87a   :  { %1422 = vmatpush.msrb.mxu1 %v1335_v18  ;;  %v1327_v18 = vld [vmem:[#allocation2 + $0xc0] sm:$0xff] }
 0x8e7   :  { %v1127_v19 = vpop.xlane.xlu2 %1126 }
 0x8e8   :  { %4818 = vrcp.f32 %v1127_v19  ;;  %v1142_v26 = vand.u32 2147483648, %v1127_v19  ;;  %v1140_v29 = vand.u32 2147483647, %v1127_v19  ;;  %vm1136_vm14 = vweird.f32 %v1127_v19 }
 0x8ea   :  { %v1143_v32 = vor.u32 1.1754944e-38, %v1142_v26  ;;  %vm1141_vm0 = vcmp.eq.f32.partialorder %v1140_v29, 8.507059e+37  ;;  %v1321_v26 = vld [vmem:[#allocation2 + $0x90] sm:$0xff]  ;;  %v1304_v29 = vld [vmem:[#allocation2 + $0x8] sm:$0xff] }
 0x8ec   :  { %v1130_v20 = vpop.xlane.xlu0 %1129 }
 0x8ed   :  { %4820 = vrcp.f32 %v1130_v20  ;;  %v1156_v35 = vand.u32 2147483648, %v1130_v20  ;;  %v1154_v38 = vand.u32 2147483647, %v1130_v20  ;;  %vm1150_vm4 = vweird.f32 %v1130_v20 }
 0x8ee   :  { %v4819_v22 = vpop.eup %4818  ;;  %4822 = vrcp.f32 %v4954_v1 }
 0x8ef   :  { %v1132_v24 = vmul.f32 %v4819_v22, %v1127_v19  ;;  %vm1137_vm13 = vweird.f32 %v4819_v22  ;;  %v1157_v41 = vor.u32 1.1754944e-38, %v1156_v35  ;;  %vm1155_vm6 = vcmp.eq.f32.partialorder %v1154_v38, 8.507059e+37  ;;  %v1336_v19 = vld [vmem:[#allocation2 + $0x108] sm:$0xff]  ;;  %v1355_v35 = vld [vmem:[#allocation2 + $0x1a0] sm:$0xff]  ;;  %v1358_v38 = vld [vmem:[#allocation2 + $0x1b8] sm:$0xff] }
 0x8f0   :  { %vm1138_vm15 = vmor %vm1136_vm14, %vm1137_vm13 }
 0x8f1   :  { %v1133_v25 = vsub.f32 1.0, %v1132_v24  ;;  %v1319_v24 = vld [vmem:[#allocation2 + $0x80] sm:$0xff] }
 0x8f2   :  { %1423 = vmatpush.msrb.mxu1 %v1319_v24  ;;  %v1330_v24 = vld [vmem:[#allocation2 + $0xd8] sm:$0xff] }
 0x8f3   :  { %v4821_v27 = vpop.eup %4820  ;;  %v1134_v28 = vmul.f32 %v4819_v22, %v1133_v25  ;;  %v1320_v25 = vld [vmem:[#allocation2 + $0x88] sm:$0xff] }
 0x8f4   :  { %v1146_v30 = vmul.f32 %v4821_v27, %v1130_v20  ;;  %vm1151_vm3 = vweird.f32 %v4821_v27  ;;  %v4823_v2 = vpop.eup %4822  ;;  %v1337_v20 = vld [vmem:[#allocation2 + $0x110] sm:$0xff] }
 0x8f5   :  { %v1135_v31 = vadd.f32 %v4819_v22, %v1134_v28  ;;  %vm1152_vm5 = vmor %vm1150_vm4, %vm1151_vm3  ;;  %v1249_v50 = vmul.f32 32.0, %v4823_v2  ;;  %vm1253_vm7 = vweird.f32 %v4823_v2  ;;  %1468 = vmatpush.msra.mxu3 %v1337_v20  ;;  %v1303_v28 = vld [vmem:[#allocation2] sm:$0xff] }
 0x8f6   :  { %v1147_v33 = vsub.f32 1.0, %v1146_v30  ;;  %v1305_v30 = vld [vmem:[#allocation2 + $0x10] sm:$0xff]  ;;  %1424 = vmatpush.msrb.mxu1 %v1303_v28  ;;  %v1314_v28 = vld [vmem:[#allocation2 + $0x58] sm:$0xff] }
 0x8f7   :  { %v1139_v34 = vsel %vm1138_vm15, %v4819_v22, %v1135_v31  ;;  %v1250_v3 = vsub.f32 1.0, %v1249_v50  ;;  %v1338_v22 = vld [vmem:[#allocation2 + $0x118] sm:$0xff]  ;;  %1469 = vmatpush.msra.mxu3 %v1321_v26  ;;  %v4768_v50 = vld [vmem:[%s6019_s13] ss:$0 sm:$0xff]  ;;  %v1312_v26 = vld [vmem:[#allocation2 + $0x48] sm:$0xff] }
 0x8f8   :  { %v1144_v36 = vsel %vm1141_vm0, %v1143_v32, %v1139_v34  ;;  %v1148_v37 = vmul.f32 %v4821_v27, %v1147_v33  ;;  %v1306_v31 = vld [vmem:[#allocation2 + $0x18] sm:$0xff]  ;;  %1513 = vmatpush.msra.mxu1 %v1355_v35  ;;  %v1349_v35 = vld [vmem:[#allocation2 + $0x170] sm:$0xff] }
 0x8f9   :  { %v1159_v39 = vmul.f32 %v4815_v15, %v1144_v36  ;;  %v1352_v15 = vld [vmem:[#allocation2 + $0x188] sm:$0xff]  ;;  %1470 = vmatpush.msra.mxu3 %v1305_v30 }
 0x8fa   :  { %v1149_v40 = vadd.f32 %v4821_v27, %v1148_v37  ;;  %1444 = vmatpush.msra.mxu2 %v1352_v15  ;;  %v1356_v36 = vld [vmem:[#allocation2 + $0x1a8] sm:$0xff]  ;;  %v1357_v37 = vld [vmem:[#allocation2 + $0x1b0] sm:$0xff] }
 0x8fb   :  { %4547 = vmatmul.msk.f32.vlgmr.msrb.gmra.mxu2 %vm295_vm2, %v1159_v39  ;;  %v1339_v39 = vld [vmem:[#allocation2 + $0x120] sm:$0xff]  ;;  %v1364_v30 = vld [vmem:[#allocation2 + $0x1e8] sm:$0xff] }
 0x8fc   :  { %v1153_v42 = vsel %vm1152_vm5, %v4821_v27, %v1149_v40  ;;  %1445 = vmatpush.msra.mxu2 %v1336_v19  ;;  %v1322_v27 = vld [vmem:[#allocation2 + $0x98] sm:$0xff]  ;;  %v1340_v40 = vld [vmem:[#allocation2 + $0x128] sm:$0xff]  ;;  %1514 = vmatpush.msra.mxu1 %v1339_v39  ;;  %v1333_v39 = vld [vmem:[#allocation2 + $0xf0] sm:$0xff] }
 0x8fd   :  { %v1158_v43 = vsel %vm1155_vm6, %v1157_v41, %v1153_v42  ;;  %v1341_v42 = vld [vmem:[#allocation2 + $0x130] sm:$0xff]  ;;  %v1328_v19 = vld [vmem:[#allocation2 + $0xc8] sm:$0xff] }
 0x8fe   :  { %v1160_v44 = vmul.f32 %v4817_v17, %v1158_v43  ;;  %v1354_v17 = vld [vmem:[#allocation2 + $0x198] sm:$0xff]  ;;  %1446 = vmatpush.msra.mxu2 %v1320_v25 }
 0x8ff   :  { %1490 = vmatpush.msrb.mxu0 %v1354_v17  ;;  %v1342_v43 = vld [vmem:[#allocation2 + $0x138] sm:$0xff] }
 0x900   :  { %4548 = vmatmul.msk.f32.vlgmr.msrb.gmra.mxu3 %vm295_vm2, %v1160_v44  ;;  %1447 = vmatpush.msra.mxu2 %v1304_v29  ;;  %v1323_v44 = vld [vmem:[#allocation2 + $0xa0] sm:$0xff]  ;;  %v1346_v17 = vld [vmem:[#allocation2 + $0x158] sm:$0xff] }
 0x901   :  { %1491 = vmatpush.msrb.mxu0 %v1338_v22  ;;  %1559 = vmatpush.msrb.mxu3 %v1357_v37  ;;  %v1329_v22 = vld [vmem:[#allocation2 + $0xd0] sm:$0xff]  ;;  %v1363_v29 = vld [vmem:[#allocation2 + $0x1e0] sm:$0xff] }
 0x902   :  { %1536 = vmatpush.msrb.mxu2 %v1356_v36  ;;  %1515 = vmatpush.msra.mxu1 %v1323_v44  ;;  %v1350_v36 = vld [vmem:[#allocation2 + $0x178] sm:$0xff]  ;;  %v1331_v37 = vld [vmem:[#allocation2 + $0xe0] sm:$0xff] }
 0x903   :  { %1492 = vmatpush.msrb.mxu0 %v1322_v27  ;;  %1560 = vmatpush.msrb.mxu3 %v1341_v42  ;;  %v1313_v27 = vld [vmem:[#allocation2 + $0x50] sm:$0xff]  ;;  %v1316_v42 = vld [vmem:[#allocation2 + $0x68] sm:$0xff]  ;;  %v1318_v44 = vld [vmem:[#allocation2 + $0x78] sm:$0xff] }
 0x904   :  { %1537 = vmatpush.msrb.mxu2 %v1340_v40  ;;  %1516 = vmatpush.msra.mxu1 %v1307_v51  ;;  %v1334_v40 = vld [vmem:[#allocation2 + $0xf8] sm:$0xff]  ;;  %v1841_v51 = vld [vmem:[#allocation5 + $0x100] sm:$0xff] }
 0x905   :  { %1493 = vmatpush.msrb.mxu0 %v1306_v31  ;;  %v1365_v31 = vld [vmem:[#allocation2 + $0x1f0] sm:$0xff] }
 0x97e   :  { %v1181_v46 = vpop.f32.mrf.mxu2 }
 0x97f   :  { %4549 = vmatmul.msk.f32.vlgmr.msra.gmra.mxu0 %vm295_vm2, %v1181_v46  ;;  %v1324_v46 = vld [vmem:[#allocation2 + $0xa8] sm:$0xff] }
 0x980   :  { %1582 = vmatpush.msra.mxu0 %v1358_v38  ;;  %1538 = vmatpush.msrb.mxu2 %v1324_v46  ;;  %v1332_v38 = vld [vmem:[#allocation2 + $0xe8] sm:$0xff]  ;;  %v1860_v46 = vld [vmem:[#allocation5 + $0x198] sm:$0xff] }
 0x982   :  { %1583 = vmatpush.msra.mxu0 %v1342_v43  ;;  %1539 = vmatpush.msrb.mxu2 %v1308_v52  ;;  %v1317_v43 = vld [vmem:[#allocation2 + $0x70] sm:$0xff]  ;;  %v1844_v52 = vld [vmem:[#allocation5 + $0x118] sm:$0xff] }
 0x983   :  { %v1204_v47 = vpop.f32.mrf.mxu3 }
 0x984   :  { %1584 = vmatpush.msra.mxu0 %v1326_v48  ;;  %v1859_v48 = vld [vmem:[#allocation5 + $0x190] sm:$0xff] }
 0x986   :  { %1585 = vmatpush.msra.mxu0 %v1310_v56  ;;  %v1843_v56 = vld [vmem:[#allocation5 + $0x110] sm:$0xff] }
 0x987   :  { %4550 = vmatmul.msk.f32.gmra.mxu0 %vm295_vm2, %v1204_v47  ;;  %v1325_v47 = vld [vmem:[#allocation2 + $0xb0] sm:$0xff] }
 0x988   :  { %1561 = vmatpush.msrb.mxu3 %v1325_v47  ;;  %v1858_v47 = vld [vmem:[#allocation5 + $0x188] sm:$0xff] }
 0x9fc   :  { %v1230_v54 = vpop.f32.mrf.mxu0 }
 0x9fd   :  { %v1236_v55 = vadd.f32 %v1230_v54, %v981_v53 }
 0x9ff   :  { %v1238_v57 = vadd.f32 %v1236_v55, %v5124_v21  ;;  %v1251_v21 = vmul.f32 %v4823_v2, %v1250_v3  ;;  %v1309_v55 = vld [vmem:[#allocation2 + $0x30] sm:$0xff] }
 0xa00   :  { %1562 = vmatpush.msrb.mxu3 %v1309_v55  ;;  %v1842_v55 = vld [vmem:[#allocation5 + $0x108] sm:$0xff] }
 0xa01   :  { %v1242_v61 = vsel %vm213_vm1, %v1238_v57, 0.0  ;;  %v1252_v5 = vadd.f32 %v4823_v2, %v1251_v21 }
 0xa02   :  { %1243 = vadd.xlane.f32.xlu1 %v1242_v61 }
 0xa03   :  { %v5405_v60 = vsel %vm1253_vm7, %v4823_v2, %v1252_v5 }
 0xa04   :  { %v1233_v63 = vpop.f32.mrf.mxu0 }
 0xa05   :  { %v1237_v0 = vadd.f32 %v1233_v63, %v982_v62 }
 0xa07   :  { %v1239_v49 = vadd.f32 %v1237_v0, %v5132_v23 }
 0xa09   :  { %v1245_v59 = vsel %vm213_vm1, %v1239_v49, 0.0 }
 0xa0a   :  { %1246 = vadd.xlane.f32.xlu2 %v1245_v59  ;;  %v4767_v59 = vld [vmem:[%s6018_s12] ss:$0 sm:$0xff] }
 0xa75   :  { %v1244_v6 = vpop.xlane.xlu1 %1243 }
 0xa76   :  { %v1255_v4 = vmul.f32 %v5405_v60, %v1244_v6 }
 0xa78   :  { %v5408_v7 = vsub.f32 %v1238_v57, %v1255_v4 }
 0xa7a   :  { %v1259_v23 = vmul.f32 %v5408_v7, %v5408_v7 }
 0xa7c   :  { %v1261_v8 = vsel %vm213_vm1, %v1259_v23, 0.0 }
 0xa7d   :  { %1262 = vadd.xlane.f32.xlu0 %v1261_v8  ;;  %v1247_v9 = vpop.xlane.xlu2 %1246  ;;  %v1359_v8 = vld [vmem:[#allocation2 + $0x1c0] sm:$0xff] }
 0xa7e   :  { %v1256_v10 = vmul.f32 %v5405_v60, %v1247_v9  ;;  %v1360_v9 = vld [vmem:[#allocation2 + $0x1c8] sm:$0xff] }
 0xa80   :  { %v5414_v11 = vsub.f32 %v1239_v49, %v1256_v10  ;;  %v1361_v10 = vld [vmem:[#allocation2 + $0x1d0] sm:$0xff] }
 0xa82   :  { %v1260_v12 = vmul.f32 %v5414_v11, %v5414_v11 }
 0xa84   :  { %v1264_v13 = vsel %vm213_vm1, %v1260_v12, 0.0  ;;  %v1362_v12 = vld [vmem:[#allocation2 + $0x1d8] sm:$0xff] }
 0xa85   :  { %1265 = vadd.xlane.f32.xlu1 %v1264_v13  ;;  %v1343_v13 = vld [vmem:[#allocation2 + $0x140] sm:$0xff] }
 0xaf0   :  { %v1263_v32 = vpop.xlane.xlu0 %1262 }
 0xaf1   :  { %v1267_v33 = vmul.f32 %v1263_v32, %v5405_v60  ;;  %v1366_v32 = vld [vmem:[#allocation2 + $0x1f8] sm:$0xff] }
 0xaf3   :  { %v1269_v34 = vadd.f32 1e-05, %v1267_v33  ;;  %v1347_v33 = vld [vmem:[#allocation2 + $0x160] sm:$0xff] }
 0xaf5   :  { %4824 = vrsqrt.f32 %v1269_v34  ;;  %vm1277_vm9 = vweird.f32 %v1269_v34 }
 0xaf8   :  { %v1266_v41 = vpop.xlane.xlu1 %1265 }
 0xaf9   :  { %v1268_v45 = vmul.f32 %v1266_v41, %v5405_v60  ;;  %v1315_v41 = vld [vmem:[#allocation2 + $0x60] sm:$0xff] }
 0xafb   :  { %v4825_v53 = vpop.eup %4824  ;;  %v1270_v54 = vadd.f32 1e-05, %v1268_v45  ;;  %v1857_v45 = vld [vmem:[#allocation5 + $0x180] sm:$0xff] }
 0xafc   :  { %v1272_v57 = vmul.f32 %v4825_v53, %v1269_v34  ;;  %vm1278_vm8 = vweird.f32 %v4825_v53  ;;  %v1348_v34 = vld [vmem:[#allocation2 + $0x168] sm:$0xff] }
 0xafd   :  { %4826 = vrsqrt.f32 %v1270_v54  ;;  %vm1279_vm10 = vmor %vm1277_vm9, %vm1278_vm8  ;;  %vm1287_vm12 = vweird.f32 %v1270_v54 }
 0xafe   :  { %v1273_v58 = vmul.f32 %v4825_v53, %v1272_v57  ;;  %v1809_v57 = vld [vmem:[#allocation5] sm:$0xff] }
 0xb00   :  { %v1274_v61 = vmul.f32 0.5, %v1273_v58  ;;  %v1812_v58 = vld [vmem:[#allocation5 + $0x18] sm:$0xff] }
 0xb02   :  { %v1275_v62 = vsub.f32 1.5, %v1274_v61  ;;  %v1826_v61 = vld [vmem:[#allocation5 + $0x88] sm:$0xff] }
 0xb03   :  { %v4827_v63 = vpop.eup %4826 }
 0xb04   :  { %v1276_v0 = vmul.f32 %v4825_v53, %v1275_v62  ;;  %v1282_v49 = vmul.f32 %v4827_v63, %v1270_v54  ;;  %vm1288_vm11 = vweird.f32 %v4827_v63  ;;  %v1828_v54 = vld [vmem:[#allocation5 + $0x98] sm:$0xff]  ;;  %v1827_v62 = vld [vmem:[#allocation5 + $0x90] sm:$0xff] }
 0xb05   :  { %vm1289_vm13 = vmor %vm1287_vm12, %vm1288_vm11 }
 0xb06   :  { %v1280_v1 = vsel %vm1279_vm10, %v4825_v53, %v1276_v0  ;;  %v1283_v2 = vmul.f32 %v4827_v63, %v1282_v49  ;;  %v1825_v53 = vld [vmem:[#allocation5 + $0x80] sm:$0xff]  ;;  %v1864_v0 = vld [vmem:[#allocation5 + $0x1b8] sm:$0xff]  ;;  %v1810_v49 = vld [vmem:[#allocation5 + $0x8] sm:$0xff] }
 0xb07   :  { %v1291_v3 = vmul.f32 %v1280_v1, %v5408_v7  ;;  %v1845_v1 = vld [vmem:[#allocation5 + $0x120] sm:$0xff] }
 0xb08   :  { %v1284_v21 = vmul.f32 0.5, %v1283_v2  ;;  %v1848_v2 = vld [vmem:[#allocation5 + $0x138] sm:$0xff] }
 0xb09   :  { %v1296_v5 = vmul.f32 %v4767_v59, %v1291_v3  ;;  %v1863_v3 = vld [vmem:[#allocation5 + $0x1b0] sm:$0xff] }
 0xb0a   :  { %v1285_v6 = vsub.f32 1.5, %v1284_v21  ;;  %v1829_v21 = vld [vmem:[#allocation5 + $0xa0] sm:$0xff] }
 0xb0b   :  { %v5428_v4 = vadd.f32 %v4768_v50, %v1296_v5  ;;  %v1832_v5 = vld [vmem:[#allocation5 + $0xb8] sm:$0xff] }
 0xb0c   :  { %v1286_v23 = vmul.f32 %v4827_v63, %v1285_v6  ;;  %v1846_v6 = vld [vmem:[#allocation5 + $0x128] sm:$0xff] }
 0xb0d   :  { %4551 = vmatmul.msk.f32.vlgmr.msrb.gmra.mxu1 %vm213_vm1, %v5428_v4  ;;  %4553 = vmatmul.msk.f32.vlgmr.msra.gmra.mxu2 %vm213_vm1, %v5428_v4 }
 0xb0e   :  { %v1290_v7 = vsel %vm1289_vm13, %v4827_v63, %v1286_v23  ;;  %4555 = vmatmul.msk.f32.vlgmr.msra.gmra.mxu3 %vm213_vm1, %v5428_v4  ;;  %4557 = vmatmul.msk.f32.vlgmr.msrb.gmra.mxu0 %vm213_vm1, %v5428_v4  ;;  %v1861_v63 = vld [vmem:[#allocation5 + $0x1a0] sm:$0xff]  ;;  %v1847_v23 = vld [vmem:[#allocation5 + $0x130] sm:$0xff] }
 0xb0f   :  { %v1292_v15 = vmul.f32 %v1290_v7, %v5414_v11  ;;  %1605 = vmatpush.msrb.mxu1 %v1359_v8  ;;  %1628 = vmatpush.msra.mxu2 %v1360_v9  ;;  %v1311_v11 = vld [vmem:[#allocation2 + $0x40] sm:$0xff]  ;;  %v1816_v9 = vld [vmem:[#allocation5 + $0x38] sm:$0xff]  ;;  %v1814_v7 = vld [vmem:[#allocation5 + $0x28] sm:$0xff] }
 0xb10   :  { %1651 = vmatpush.msra.mxu3 %v1361_v10  ;;  %1674 = vmatpush.msrb.mxu0 %v1362_v12  ;;  %v1813_v8 = vld [vmem:[#allocation5 + $0x20] sm:$0xff]  ;;  %v1830_v10 = vld [vmem:[#allocation5 + $0xa8] sm:$0xff]  ;;  %v1831_v12 = vld [vmem:[#allocation5 + $0xb0] sm:$0xff] }
 0xb11   :  { %v1297_v20 = vmul.f32 %v4767_v59, %v1292_v15  ;;  %1606 = vmatpush.msrb.mxu1 %v1343_v13  ;;  %1629 = vmatpush.msra.mxu2 %v1344_v14  ;;  %v1811_v59 = vld [vmem:[#allocation5 + $0x10] sm:$0xff]  ;;  %v5500_v14 = vld [vmem:[%s6023_s17] sm:$0xff] }
 0xb12   :  { %1652 = vmatpush.msra.mxu3 %v1345_v16  ;;  %1675 = vmatpush.msrb.mxu0 %v1346_v17  ;;  %v1815_v13 = vld [vmem:[#allocation5 + $0x30] sm:$0xff]  ;;  %v1371_v15 = vperm.slane %v5500_v14, 0  ;;  %v1374_v16 = vperm.slane %v5500_v14, 3 }
 0xb13   :  { %v5439_v25 = vadd.f32 %v4768_v50, %v1297_v20  ;;  %1607 = vmatpush.msrb.mxu1 %v1327_v18  ;;  %1630 = vmatpush.msra.mxu2 %v1328_v19  ;;  %v1862_v50 = vld [vmem:[#allocation5 + $0x1a8] sm:$0xff] }
 0xb14   :  { %1653 = vmatpush.msra.mxu3 %v1329_v22  ;;  %1676 = vmatpush.msrb.mxu0 %v1330_v24  ;;  %v1372_v24 = vperm.slane %v5500_v14, 1 }
 0xb15   :  { %4552 = vmatmul.msk.f32.gmra.mxu1 %vm213_vm1, %v5439_v25  ;;  %4554 = vmatmul.msk.f32.gmra.mxu2 %vm213_vm1, %v5439_v25 }
 0xb16   :  { %4556 = vmatmul.msk.f32.gmra.mxu3 %vm213_vm1, %v5439_v25  ;;  %4558 = vmatmul.msk.f32.gmra.mxu0 %vm213_vm1, %v5439_v25 }
 0xb17   :  { %1608 = vmatpush.msrb.mxu1 %v1311_v11  ;;  %1631 = vmatpush.msra.mxu2 %v1312_v26  ;;  %v1865_v11 = vld [vmem:[#allocation5 + $0x1c0] sm:$0xff] }
 0xb18   :  { %1654 = vmatpush.msra.mxu3 %v1313_v27  ;;  %1677 = vmatpush.msrb.mxu0 %v1314_v28  ;;  %v1373_v27 = vperm.slane %v5500_v14, 2  ;;  %v1868_v28 = vld [vmem:[#allocation5 + $0x1d8] sm:$0xff] }
 0xb1d   :  { %4559 = vmatmul.msk.f32.vlgmr.msra.gmra.mxu1 %vm213_vm1, %v5428_v4  ;;  %4561 = vmatmul.msk.f32.vlgmr.msrb.gmra.mxu2 %vm213_vm1, %v5428_v4 }
 0xb1e   :  { %4563 = vmatmul.msk.f32.vlgmr.msrb.gmra.mxu3 %vm213_vm1, %v5428_v4  ;;  %4565 = vmatmul.msk.f32.vlgmr.msra.gmra.mxu0 %vm213_vm1, %v5428_v4 }
 0xb1f   :  { %1697 = vmatpush.msra.mxu1 %v1363_v29  ;;  %1720 = vmatpush.msrb.mxu2 %v1364_v30 }
 0xb20   :  { %1743 = vmatpush.msrb.mxu3 %v1365_v31  ;;  %1766 = vmatpush.msra.mxu0 %v1366_v32  ;;  %v1849_v32 = vld [vmem:[#allocation5 + $0x140] sm:$0xff] }
 0xb21   :  { %1698 = vmatpush.msra.mxu1 %v1347_v33  ;;  %1721 = vmatpush.msrb.mxu2 %v1348_v34 }
 0xb22   :  { %1744 = vmatpush.msrb.mxu3 %v1349_v35  ;;  %1767 = vmatpush.msra.mxu0 %v1350_v36  ;;  %v1852_v35 = vld [vmem:[#allocation5 + $0x158] sm:$0xff] }
 0xb23   :  { %1699 = vmatpush.msra.mxu1 %v1331_v37  ;;  %1722 = vmatpush.msrb.mxu2 %v1332_v38 }
 0xb24   :  { %1745 = vmatpush.msrb.mxu3 %v1333_v39  ;;  %1768 = vmatpush.msra.mxu0 %v1334_v40  ;;  %v1866_v39 = vld [vmem:[#allocation5 + $0x1c8] sm:$0xff] }
 0xb25   :  { %4560 = vmatmul.msk.f32.gmra.mxu1 %vm213_vm1, %v5439_v25  ;;  %4562 = vmatmul.msk.f32.gmra.mxu2 %vm213_vm1, %v5439_v25 }
 0xb26   :  { %4564 = vmatmul.msk.f32.gmra.mxu3 %vm213_vm1, %v5439_v25  ;;  %4566 = vmatmul.msk.f32.gmra.mxu0 %vm213_vm1, %v5439_v25 }
 0xb27   :  { %1700 = vmatpush.msra.mxu1 %v1315_v41  ;;  %1723 = vmatpush.msrb.mxu2 %v1316_v42  ;;  %v1867_v42 = vld [vmem:[#allocation5 + $0x1d0] sm:$0xff] }
 0xb28   :  { %1746 = vmatpush.msrb.mxu3 %v1317_v43  ;;  %1769 = vmatpush.msra.mxu0 %v1318_v44  ;;  %v1833_v44 = vld [vmem:[#allocation5 + $0xc0] sm:$0xff] }
 0xb2d   :  { %4567 = vmatmul.msk.f32.vlgmr.msrb.gmra.mxu1 %vm213_vm1, %v5428_v4  ;;  %4569 = vmatmul.msk.f32.vlgmr.msra.gmra.mxu2 %vm213_vm1, %v5428_v4 }
 0xb2e   :  { %4571 = vmatmul.msk.f32.vlgmr.msra.gmra.mxu3 %vm213_vm1, %v5428_v4  ;;  %4573 = vmatmul.msk.f32.vlgmr.msrb.gmra.mxu0 %vm213_vm1, %v5428_v4 }
 0xb2f   :  { %1889 = vmatpush.xpose.msrb.mxu1 %v1857_v45  ;;  %1958 = vmatpush.xpose.msrb.mxu0 %v1860_v46  ;;  %v1836_v46 = vld [vmem:[#allocation5 + $0xd8] sm:$0xff] }
 0xb30   :  { %1912 = vmatpush.xpose.msra.mxu2 %v1858_v47  ;;  %1935 = vmatpush.xpose.msra.mxu3 %v1859_v48  ;;  %v1375_v47 = vperm.slane %v5500_v14, 4  ;;  %v1850_v48 = vld [vmem:[#allocation5 + $0x148] sm:$0xff] }
 0xb33   :  { %1890 = vmatpush.xpose.msrb.mxu1 %v1841_v51  ;;  %1959 = vmatpush.xpose.msrb.mxu0 %v1844_v52  ;;  %v1378_v52 = vperm.slane %v5500_v14, 7 }
 0xb34   :  { %1913 = vmatpush.xpose.msra.mxu2 %v1842_v55  ;;  %1936 = vmatpush.xpose.msra.mxu3 %v1843_v56  ;;  %v1817_v56 = vld [vmem:[#allocation5 + $0x40] sm:$0xff] }
 0xb35   :  { %4568 = vmatmul.msk.f32.gmra.mxu1 %vm213_vm1, %v5439_v25  ;;  %4570 = vmatmul.msk.f32.gmra.mxu2 %vm213_vm1, %v5439_v25 }
 0xb36   :  { %4572 = vmatmul.msk.f32.gmra.mxu3 %vm213_vm1, %v5439_v25  ;;  %4574 = vmatmul.msk.f32.gmra.mxu0 %vm213_vm1, %v5439_v25 }
 0xb37   :  { %1891 = vmatpush.xpose.msrb.mxu1 %v1825_v53  ;;  %1960 = vmatpush.xpose.msrb.mxu0 %v1828_v54  ;;  %v1851_v53 = vld [vmem:[#allocation5 + $0x150] sm:$0xff] }
 0xb38   :  { %1914 = vmatpush.xpose.msra.mxu2 %v1826_v61  ;;  %1937 = vmatpush.xpose.msra.mxu3 %v1827_v62  ;;  %v1820_v61 = vld [vmem:[#allocation5 + $0x58] sm:$0xff] }
 0xb3b   :  { %1892 = vmatpush.xpose.msrb.mxu1 %v1809_v57  ;;  %1961 = vmatpush.xpose.msrb.mxu0 %v1812_v58 }
 0xb3c   :  { %1915 = vmatpush.xpose.msra.mxu2 %v1810_v49  ;;  %1938 = vmatpush.xpose.msra.mxu3 %v1811_v59  ;;  %v1834_v49 = vld [vmem:[#allocation5 + $0xc8] sm:$0xff] }
 0xb3d   :  { %4575 = vmatmul.msk.f32.vlgmr.msra.gmra.mxu1 %vm213_vm1, %v5428_v4  ;;  %4577 = vmatmul.msk.f32.vlgmr.msrb.gmra.mxu2 %vm213_vm1, %v5428_v4 }
 0xb3e   :  { %4579 = vmatmul.msk.f32.vlgmr.msrb.gmra.mxu3 %vm213_vm1, %v5428_v4  ;;  %4581 = vmatmul.msk.f32.vlgmr.msra.gmra.mxu0 %vm213_vm1, %v5428_v4 }
 0xb3f   :  { %1981 = vmatpush.xpose.msra.mxu1 %v1861_v63  ;;  %2050 = vmatpush.xpose.msra.mxu0 %v1864_v0 }
 0xb40   :  { %2004 = vmatpush.xpose.msrb.mxu2 %v1862_v50  ;;  %2027 = vmatpush.xpose.msrb.mxu3 %v1863_v3  ;;  %v1376_v3 = vperm.slane %v5500_v14, 5 }
 0xb43   :  { %1982 = vmatpush.xpose.msra.mxu1 %v1845_v1  ;;  %2051 = vmatpush.xpose.msra.mxu0 %v1848_v2  ;;  %v1835_v2 = vld [vmem:[#allocation5 + $0xd0] sm:$0xff] }
 0xb44   :  { %2005 = vmatpush.xpose.msrb.mxu2 %v1846_v6  ;;  %2028 = vmatpush.xpose.msrb.mxu3 %v1847_v23  ;;  %v1377_v6 = vperm.slane %v5500_v14, 6  ;;  %v1872_v23 = vld [vmem:[#allocation5 + $0x1f8] sm:$0xff] }
 0xb45   :  { %4576 = vmatmul.msk.f32.gmra.mxu1 %vm213_vm1, %v5439_v25  ;;  %4578 = vmatmul.msk.f32.gmra.mxu2 %vm213_vm1, %v5439_v25 }
 0xb46   :  { %4580 = vmatmul.msk.f32.gmra.mxu3 %vm213_vm1, %v5439_v25  ;;  %4582 = vmatmul.msk.f32.gmra.mxu0 %vm213_vm1, %v5439_v25 }
 0xb47   :  { %1983 = vmatpush.xpose.msra.mxu1 %v1829_v21  ;;  %2052 = vmatpush.xpose.msra.mxu0 %v1832_v5  ;;  %v1869_v21 = vld [vmem:[#allocation5 + $0x1e0] sm:$0xff] }
 0xb48   :  { %2006 = vmatpush.xpose.msrb.mxu2 %v1830_v10  ;;  %2029 = vmatpush.xpose.msrb.mxu3 %v1831_v12  ;;  %v1819_v10 = vld [vmem:[#allocation5 + $0x50] sm:$0xff] }
 0xb4b   :  { %1984 = vmatpush.xpose.msra.mxu1 %v1813_v8  ;;  %2053 = vmatpush.xpose.msra.mxu0 %v1816_v9  ;;  %v1818_v8 = vld [vmem:[#allocation5 + $0x48] sm:$0xff] }
 0xb4c   :  { %2007 = vmatpush.xpose.msrb.mxu2 %v1814_v7  ;;  %2030 = vmatpush.xpose.msrb.mxu3 %v1815_v13  ;;  %v1853_v13 = vld [vmem:[#allocation5 + $0x160] sm:$0xff] }
 0xb8a   :  { %v1426_v17 = vpop.f32.mrf.mxu1 }
 0xb8b   :  { %v1427_v18 = vadd.f32 %v1426_v17, %v1371_v15  ;;  %v1495_v19 = vpop.f32.mrf.mxu0  ;;  %v1856_v17 = vld [vmem:[#allocation5 + $0x178] sm:$0xff] }
 0xb8c   :  { %v1496_v20 = vadd.f32 %v1495_v19, %v1374_v16 }
 0xb8d   :  { %v1777_v22 = vmax.f32 %v1427_v18, 0.0 }
 0xb8e   :  { %v1780_v26 = vmax.f32 %v1496_v20, 0.0  ;;  %v1870_v20 = vld [vmem:[#allocation5 + $0x1e8] sm:$0xff] }
 0xb8f   :  { %1893 = vmatmul.f32.vlgmr.msrb.gmra.mxu1 %v1777_v22 }
 0xb90   :  { %1962 = vmatmul.f32.vlgmr.msrb.gmra.mxu0 %v1780_v26  ;;  %v1449_v29 = vpop.f32.mrf.mxu2  ;;  %2073 = vmatpush.xpose.msrb.mxu1 %v1865_v11  ;;  %v5513_v11 = vld [vmem:[%s6023_s17 + $0x8] sm:$0xff]  ;;  %v1871_v26 = vld [vmem:[#allocation5 + $0x1f0] sm:$0xff] }
 0xb91   :  { %v1450_v30 = vadd.f32 %v1449_v29, %v1372_v24  ;;  %v1472_v31 = vpop.f32.mrf.mxu3  ;;  %2142 = vmatpush.xpose.msrb.mxu0 %v1868_v28  ;;  %v1837_v28 = vld [vmem:[#allocation5 + $0xe0] sm:$0xff] }
 0xb92   :  { %v1473_v33 = vadd.f32 %v1472_v31, %v1373_v27  ;;  %v1429_v34 = vpop.f32.mrf.mxu1  ;;  %v1379_v31 = vperm.slane %v5513_v11, 0 }
 0xb93   :  { %v1778_v36 = vmax.f32 %v1450_v30, 0.0  ;;  %v1430_v37 = vadd.f32 %v1429_v34, %v1371_v15  ;;  %v1498_v38 = vpop.f32.mrf.mxu0  ;;  %v1840_v30 = vld [vmem:[#allocation5 + $0xf8] sm:$0xff]  ;;  %v1382_v34 = vperm.slane %v5513_v11, 3 }
 0xb94   :  { %v1779_v40 = vmax.f32 %v1473_v33, 0.0  ;;  %v1499_v41 = vadd.f32 %v1498_v38, %v1374_v16  ;;  %2074 = vmatpush.xpose.msrb.mxu1 %v1849_v32  ;;  %v1854_v32 = vld [vmem:[#allocation5 + $0x168] sm:$0xff]  ;;  %v1821_v38 = vld [vmem:[#allocation5 + $0x60] sm:$0xff] }
 0xb95   :  { %1916 = vmatmul.f32.vlgmr.msra.gmra.mxu2 %v1778_v36  ;;  %v1793_v43 = vmax.f32 %v1430_v37, 0.0  ;;  %2143 = vmatpush.xpose.msrb.mxu0 %v1852_v35  ;;  %v1855_v35 = vld [vmem:[#allocation5 + $0x170] sm:$0xff] }
 0xb96   :  { %1939 = vmatmul.f32.vlgmr.msra.gmra.mxu3 %v1779_v40  ;;  %v1796_v45 = vmax.f32 %v1499_v41, 0.0  ;;  %2096 = vmatpush.xpose.msra.mxu2 %v1866_v39  ;;  %v1824_v41 = vld [vmem:[#allocation5 + $0x78] sm:$0xff] }
 0xb97   :  { %1896 = vmatmul.f32.gmra.mxu1 %v1793_v43  ;;  %2119 = vmatpush.xpose.msra.mxu3 %v1867_v42 }
 0xb98   :  { %1965 = vmatmul.f32.gmra.mxu0 %v1796_v45  ;;  %v1452_v51 = vpop.f32.mrf.mxu2  ;;  %2075 = vmatpush.xpose.msrb.mxu1 %v1833_v44  ;;  %v1838_v45 = vld [vmem:[#allocation5 + $0xe8] sm:$0xff] }
 0xb99   :  { %v1453_v54 = vadd.f32 %v1452_v51, %v1372_v24  ;;  %v1475_v55 = vpop.f32.mrf.mxu3  ;;  %2144 = vmatpush.xpose.msrb.mxu0 %v1836_v46 }
 0xb9a   :  { %v1476_v57 = vadd.f32 %v1475_v55, %v1373_v27  ;;  %v1518_v58 = vpop.f32.mrf.mxu1  ;;  %2097 = vmatpush.xpose.msra.mxu2 %v1850_v48  ;;  %v1839_v48 = vld [vmem:[#allocation5 + $0xf0] sm:$0xff]  ;;  %v1822_v55 = vld [vmem:[#allocation5 + $0x68] sm:$0xff] }
 0xb9b   :  { %v1519_v62 = vadd.f32 %v1518_v58, %v1375_v47  ;;  %v1587_v63 = vpop.f32.mrf.mxu0  ;;  %v1794_v0 = vmax.f32 %v1453_v54, 0.0  ;;  %2120 = vmatpush.xpose.msra.mxu3 %v1851_v53  ;;  %v1381_v54 = vperm.slane %v5513_v11, 2 }
 0xb9c   :  { %v1588_v59 = vadd.f32 %v1587_v63, %v1378_v52  ;;  %v1795_v1 = vmax.f32 %v1476_v57, 0.0  ;;  %2076 = vmatpush.xpose.msrb.mxu1 %v1817_v56  ;;  %v1823_v57 = vld [vmem:[#allocation5 + $0x70] sm:$0xff] }
 0xb9d   :  { %v1781_v50 = vmax.f32 %v1519_v62, 0.0  ;;  %1919 = vmatmul.f32.gmra.mxu2 %v1794_v0  ;;  %2145 = vmatpush.xpose.msrb.mxu0 %v1820_v61 }
 0xb9e   :  { %v1784_v5 = vmax.f32 %v1588_v59, 0.0  ;;  %1942 = vmatmul.f32.gmra.mxu3 %v1795_v1  ;;  %2098 = vmatpush.xpose.msra.mxu2 %v1834_v49 }
 0xb9f   :  { %1985 = vmatmul.f32.vlgmr.msra.gmra.mxu1 %v1781_v50  ;;  %2121 = vmatpush.xpose.msra.mxu3 %v1835_v2 }
 0xba0   :  { %2054 = vmatmul.f32.vlgmr.msra.gmra.mxu0 %v1784_v5  ;;  %v1541_v9 = vpop.f32.mrf.mxu2  ;;  %2165 = vmatpush.xpose.msra.mxu1 %v1869_v21  ;;  %v1383_v21 = vperm.slane %v5513_v11, 4 }
 0xba1   :  { %v1542_v12 = vadd.f32 %v1541_v9, %v1376_v3  ;;  %v1564_v7 = vpop.f32.mrf.mxu3  ;;  %2234 = vmatpush.xpose.msra.mxu0 %v1872_v23 }
 0xba2   :  { %v1565_v15 = vadd.f32 %v1564_v7, %v1377_v6  ;;  %v1521_v16 = vpop.f32.mrf.mxu1  ;;  %2099 = vmatpush.xpose.msra.mxu2 %v1818_v8 }
 0xba3   :  { %v1782_v18 = vmax.f32 %v1542_v12, 0.0  ;;  %v1522_v19 = vadd.f32 %v1521_v16, %v1375_v47  ;;  %v1590_v14 = vpop.f32.mrf.mxu0  ;;  %2122 = vmatpush.xpose.msra.mxu3 %v1819_v10 }
 0xba4   :  { %v1783_v22 = vmax.f32 %v1565_v15, 0.0  ;;  %v1591_v24 = vadd.f32 %v1590_v14, %v1378_v52  ;;  %2166 = vmatpush.xpose.msra.mxu1 %v1853_v13  ;;  %v1380_v52 = vperm.slane %v5513_v11, 1  ;;  %v1385_v14 = vperm.slane %v5513_v11, 6 }
 0xba5   :  { %v1797_v27 = vmax.f32 %v1522_v19, 0.0  ;;  %2008 = vmatmul.f32.vlgmr.msrb.gmra.mxu2 %v1782_v18  ;;  %2235 = vmatpush.xpose.msra.mxu0 %v1856_v17  ;;  %v1384_v18 = vperm.slane %v5513_v11, 5 }
 0xba6   :  { %v1800_v29 = vmax.f32 %v1591_v24, 0.0  ;;  %2031 = vmatmul.f32.vlgmr.msrb.gmra.mxu3 %v1783_v22  ;;  %2188 = vmatpush.xpose.msrb.mxu2 %v1870_v20 }
 0xba7   :  { %1988 = vmatmul.f32.gmra.mxu1 %v1797_v27  ;;  %2211 = vmatpush.xpose.msrb.mxu3 %v1871_v26 }
 0xba8   :  { %2057 = vmatmul.f32.gmra.mxu0 %v1800_v29  ;;  %v1544_v33 = vpop.f32.mrf.mxu2  ;;  %2167 = vmatpush.xpose.msra.mxu1 %v1837_v28 }
 0xba9   :  { %v1545_v36 = vadd.f32 %v1544_v33, %v1376_v3  ;;  %v1567_v37 = vpop.f32.mrf.mxu3  ;;  %2236 = vmatpush.xpose.msra.mxu0 %v1840_v30 }
 0xbaa   :  { %v1568_v39 = vadd.f32 %v1567_v37, %v1377_v6  ;;  %v1610_v40 = vpop.f32.mrf.mxu1  ;;  %2189 = vmatpush.xpose.msrb.mxu2 %v1854_v32  ;;  %v1386_v6 = vperm.slane %v5513_v11, 7 }
 0xbab   :  { %v1611_v42 = vadd.f32 %v1610_v40, %v1379_v31  ;;  %v1679_v43 = vpop.f32.mrf.mxu0  ;;  %v1798_v44 = vmax.f32 %v1545_v36, 0.0  ;;  %2212 = vmatpush.xpose.msrb.mxu3 %v1855_v35 }
 0xbac   :  { %v1680_v46 = vadd.f32 %v1679_v43, %v1382_v34  ;;  %v1799_v47 = vmax.f32 %v1568_v39, 0.0  ;;  %2168 = vmatpush.xpose.msra.mxu1 %v1821_v38 }
 0xbad   :  { %v1785_v51 = vmax.f32 %v1611_v42, 0.0  ;;  %2011 = vmatmul.f32.gmra.mxu2 %v1798_v44  ;;  %2237 = vmatpush.xpose.msra.mxu0 %v1824_v41 }
 0xbae   :  { %v1788_v53 = vmax.f32 %v1680_v46, 0.0  ;;  %2034 = vmatmul.f32.gmra.mxu3 %v1799_v47  ;;  %2190 = vmatpush.xpose.msrb.mxu2 %v1838_v45  ;;  %v4769_v45 = vld [vmem:[%s6025_s19] ss:$0 sm:$0xff] }
 0xbaf   :  { %2077 = vmatmul.f32.vlgmr.msrb.gmra.mxu1 %v1785_v51  ;;  %2213 = vmatpush.xpose.msrb.mxu3 %v1839_v48 }
 0xbb0   :  { %2146 = vmatmul.f32.vlgmr.msrb.gmra.mxu0 %v1788_v53  ;;  %v1633_v56 = vpop.f32.mrf.mxu2 }
 0xbb1   :  { %v1634_v58 = vadd.f32 %v1633_v56, %v1380_v52  ;;  %v1656_v61 = vpop.f32.mrf.mxu3 }
 0xbb2   :  { %v1657_v62 = vadd.f32 %v1656_v61, %v1381_v54  ;;  %v1613_v63 = vpop.f32.mrf.mxu1  ;;  %2191 = vmatpush.xpose.msrb.mxu2 %v1822_v55 }
 0xbb3   :  { %v1786_v0 = vmax.f32 %v1634_v58, 0.0  ;;  %v1614_v49 = vadd.f32 %v1613_v63, %v1379_v31  ;;  %v1682_v59 = vpop.f32.mrf.mxu0  ;;  %2214 = vmatpush.xpose.msrb.mxu3 %v1823_v57 }
 0xbb4   :  { %v1787_v1 = vmax.f32 %v1657_v62, 0.0  ;;  %v1683_v2 = vadd.f32 %v1682_v59, %v1382_v34 }
 0xbb5   :  { %v1801_v50 = vmax.f32 %v1614_v49, 0.0  ;;  %2100 = vmatmul.f32.vlgmr.msra.gmra.mxu2 %v1786_v0 }
 0xbb6   :  { %v1804_v3 = vmax.f32 %v1683_v2, 0.0  ;;  %2123 = vmatmul.f32.vlgmr.msra.gmra.mxu3 %v1787_v1 }
 0xbb7   :  { %2080 = vmatmul.f32.gmra.mxu1 %v1801_v50 }
 0xbb8   :  { %2149 = vmatmul.f32.gmra.mxu0 %v1804_v3  ;;  %v1636_v5 = vpop.f32.mrf.mxu2 }
 0xbb9   :  { %v1637_v23 = vadd.f32 %v1636_v5, %v1380_v52  ;;  %v1659_v8 = vpop.f32.mrf.mxu3 }
 0xbba   :  { %v1660_v9 = vadd.f32 %v1659_v8, %v1381_v54  ;;  %v1702_v10 = vpop.f32.mrf.mxu1 }
 0xbbb   :  { %v1802_v12 = vmax.f32 %v1637_v23, 0.0  ;;  %v1703_v7 = vadd.f32 %v1702_v10, %v1383_v21  ;;  %v1771_v13 = vpop.f32.mrf.mxu0 }
 0xbbc   :  { %v1803_v15 = vmax.f32 %v1660_v9, 0.0  ;;  %v1772_v16 = vadd.f32 %v1771_v13, %v1386_v6 }
 0xbbd   :  { %v1789_v17 = vmax.f32 %v1703_v7, 0.0  ;;  %2103 = vmatmul.f32.gmra.mxu2 %v1802_v12 }
 0xbbe   :  { %v1792_v19 = vmax.f32 %v1772_v16, 0.0  ;;  %2126 = vmatmul.f32.gmra.mxu3 %v1803_v15 }
 0xbbf   :  { %2169 = vmatmul.f32.vlgmr.msra.gmra.mxu1 %v1789_v17 }
 0xbc0   :  { %2238 = vmatmul.f32.vlgmr.msra.gmra.mxu0 %v1792_v19  ;;  %v1725_v20 = vpop.f32.mrf.mxu2 }
 0xbc1   :  { %v1726_v22 = vadd.f32 %v1725_v20, %v1384_v18  ;;  %v1748_v24 = vpop.f32.mrf.mxu3 }
 0xbc2   :  { %v1749_v26 = vadd.f32 %v1748_v24, %v1385_v14  ;;  %v1705_v27 = vpop.f32.mrf.mxu1 }
 0xbc3   :  { %v1790_v28 = vmax.f32 %v1726_v22, 0.0  ;;  %v1706_v29 = vadd.f32 %v1705_v27, %v1383_v21  ;;  %v1774_v30 = vpop.f32.mrf.mxu0 }
 0xbc4   :  { %v1791_v31 = vmax.f32 %v1749_v26, 0.0  ;;  %v1775_v32 = vadd.f32 %v1774_v30, %v1386_v6 }
 0xbc5   :  { %v1805_v33 = vmax.f32 %v1706_v29, 0.0  ;;  %2192 = vmatmul.f32.vlgmr.msrb.gmra.mxu2 %v1790_v28 }
 0xbc6   :  { %v1808_v34 = vmax.f32 %v1775_v32, 0.0  ;;  %2215 = vmatmul.f32.vlgmr.msrb.gmra.mxu3 %v1791_v31 }
 0xbc7   :  { %2172 = vmatmul.f32.gmra.mxu1 %v1805_v33 }
 0xbc8   :  { %2241 = vmatmul.f32.gmra.mxu0 %v1808_v34  ;;  %v1728_v35 = vpop.f32.mrf.mxu2 }
 0xbc9   :  { %v1729_v11 = vadd.f32 %v1728_v35, %v1384_v18  ;;  %v1751_v36 = vpop.f32.mrf.mxu3 }
 0xbca   :  { %v1752_v37 = vadd.f32 %v1751_v36, %v1385_v14 }
 0xbcb   :  { %v1806_v38 = vmax.f32 %v1729_v11, 0.0 }
 0xbcc   :  { %v1807_v39 = vmax.f32 %v1752_v37, 0.0 }
 0xbcd   :  { %2195 = vmatmul.f32.gmra.mxu2 %v1806_v38 }
 0xbce   :  { %2218 = vmatmul.f32.gmra.mxu3 %v1807_v39 }
 0xc0c   :  { %v1894_v40 = vpop.f32.mrf.mxu1 }
 0xc0d   :  { %v1963_v41 = vpop.f32.mrf.mxu0  ;;  %v1895_v48 = vadd.f32 %v4769_v45, %v1894_v40 }
 0xc14   :  { %v1897_v42 = vpop.f32.mrf.mxu1 }
 0xc15   :  { %v1966_v43 = vpop.f32.mrf.mxu0  ;;  %v1898_v56 = vadd.f32 %v4769_v45, %v1897_v42 }
 0xc18   :  { %v1917_v44 = vpop.f32.mrf.mxu2 }
 0xc19   :  { %v1940_v46 = vpop.f32.mrf.mxu3  ;;  %v1918_v51 = vadd.f32 %v1917_v44, %v1895_v48 }
 0xc1b   :  { %v1941_v55 = vadd.f32 %v1940_v46, %v1918_v51 }
 0xc1c   :  { %v1986_v47 = vpop.f32.mrf.mxu1 }
 0xc1d   :  { %v2055_v54 = vpop.f32.mrf.mxu0  ;;  %v1964_v58 = vadd.f32 %v1963_v41, %v1941_v55 }
 0xc1f   :  { %v1987_v0 = vadd.f32 %v1986_v47, %v1964_v58  ;;  %v4586_v58 = vld [vmem:[%s6037_s4 + $0x98] sm:$0xff] }
 0xc20   :  { %v1920_v52 = vpop.f32.mrf.mxu2  ;;  %2400 = vmatpush.msrb.mxu1 %v4586_v58 }
 0xc21   :  { %v1943_v53 = vpop.f32.mrf.mxu3  ;;  %v1921_v61 = vadd.f32 %v1920_v52, %v1898_v56 }
 0xc23   :  { %v1944_v49 = vadd.f32 %v1943_v53, %v1921_v61  ;;  %v4602_v61 = vld [vmem:[%s6011_s5 + $0x98] sm:$0xff] }
 0xc24   :  { %v1989_v57 = vpop.f32.mrf.mxu1  ;;  %2426 = vmatpush.msra.mxu2 %v4602_v61 }
 0xc25   :  { %v2058_v59 = vpop.f32.mrf.mxu0  ;;  %v1967_v2 = vadd.f32 %v1966_v43, %v1944_v49  ;;  %v4617_v49 = vld [vmem:[%s6012_s6 + $0x90] sm:$0xff] }
 0xc27   :  { %v1990_v6 = vadd.f32 %v1989_v57, %v1967_v2  ;;  %v4616_v2 = vld [vmem:[%s6012_s6 + $0x88] sm:$0xff] }
 0xc28   :  { %v2009_v62 = vpop.f32.mrf.mxu2 }
 0xc29   :  { %v2032_v63 = vpop.f32.mrf.mxu3  ;;  %v2010_v1 = vadd.f32 %v2009_v62, %v1987_v0  ;;  %v4618_v62 = vld [vmem:[%s6012_s6 + $0x98] sm:$0xff]  ;;  %v4601_v0 = vld [vmem:[%s6011_s5 + $0x90] sm:$0xff] }
 0xc2a   :  { %2452 = vmatpush.msra.mxu3 %v4618_v62  ;;  %2427 = vmatpush.msra.mxu2 %v4601_v0 }
 0xc2b   :  { %v2033_v21 = vadd.f32 %v2032_v63, %v2010_v1  ;;  %v4585_v63 = vld [vmem:[%s6037_s4 + $0x90] sm:$0xff]  ;;  %v4600_v1 = vld [vmem:[%s6011_s5 + $0x88] sm:$0xff] }
 0xc2c   :  { %v2078_v50 = vpop.f32.mrf.mxu1  ;;  %2401 = vmatpush.msrb.mxu1 %v4585_v63  ;;  %2453 = vmatpush.msra.mxu3 %v4617_v49 }
 0xc2d   :  { %v2056_v23 = vadd.f32 %v2055_v54, %v2033_v21  ;;  %v2147_v9 = vpop.f32.mrf.mxu0  ;;  %2428 = vmatpush.msra.mxu2 %v4600_v1  ;;  %v4615_v21 = vld [vmem:[%s6012_s6 + $0x80] sm:$0xff] }
 0xc2e   :  { %2454 = vmatpush.msra.mxu3 %v4616_v2 }
 0xc2f   :  { %v2079_v12 = vadd.f32 %v2078_v50, %v2056_v23  ;;  %v4583_v50 = vld [vmem:[%s6037_s4 + $0x80] sm:$0xff] }
 0xc30   :  { %v2012_v3 = vpop.f32.mrf.mxu2  ;;  %2455 = vmatpush.msra.mxu3 %v4615_v21  ;;  %v4605_v21 = vld [vmem:[%s6011_s5 + $0xb0] sm:$0xff] }
 0xc31   :  { %v2035_v5 = vpop.f32.mrf.mxu3  ;;  %v2013_v8 = vadd.f32 %v2012_v3, %v1990_v6  ;;  %v4599_v3 = vld [vmem:[%s6011_s5 + $0x80] sm:$0xff] }
 0xc32   :  { %2429 = vmatpush.msra.mxu2 %v4599_v3  ;;  %v4606_v3 = vld [vmem:[%s6011_s5 + $0xb8] sm:$0xff] }
 0xc33   :  { %v2036_v7 = vadd.f32 %v2035_v5, %v2013_v8 }
 0xc34   :  { %v2081_v15 = vpop.f32.mrf.mxu1 }
 0xc35   :  { %v2059_v17 = vadd.f32 %v2058_v59, %v2036_v7  ;;  %v2150_v19 = vpop.f32.mrf.mxu0  ;;  %v4584_v59 = vld [vmem:[%s6037_s4 + $0x88] sm:$0xff] }
 0xc36   :  { %2402 = vmatpush.msrb.mxu1 %v4584_v59 }
 0xc37   :  { %v2082_v20 = vadd.f32 %v2081_v15, %v2059_v17 }
 0xc38   :  { %v2101_v10 = vpop.f32.mrf.mxu2  ;;  %2403 = vmatpush.msrb.mxu1 %v4583_v50 }
 0xc39   :  { %v2124_v13 = vpop.f32.mrf.mxu3  ;;  %v2102_v16 = vadd.f32 %v2101_v10, %v2079_v12 }
 0xc3b   :  { %v2125_v18 = vadd.f32 %v2124_v13, %v2102_v16 }
 0xc3c   :  { %v2170_v27 = vpop.f32.mrf.mxu1 }
 0xc3d   :  { %v2148_v24 = vadd.f32 %v2147_v9, %v2125_v18  ;;  %v2239_v33 = vpop.f32.mrf.mxu0 }
 0xc3f   :  { %v2171_v28 = vadd.f32 %v2170_v27, %v2148_v24  ;;  %v4771_v24 = vld [vmem:[%s6021_s15] ss:$0 sm:$0xff] }
 0xc40   :  { %v2104_v14 = vpop.f32.mrf.mxu2 }
 0xc41   :  { %v2127_v22 = vpop.f32.mrf.mxu3  ;;  %v2105_v26 = vadd.f32 %v2104_v14, %v2082_v20  ;;  %v4770_v14 = vld [vmem:[%s6020_s14] ss:$0 sm:$0xff] }
 0xc43   :  { %v2128_v29 = vadd.f32 %v2127_v22, %v2105_v26 }
 0xc44   :  { %v2173_v36 = vpop.f32.mrf.mxu1 }
 0xc45   :  { %v2151_v34 = vadd.f32 %v2150_v19, %v2128_v29  ;;  %v2242_v44 = vpop.f32.mrf.mxu0 }
 0xc47   :  { %v2174_v37 = vadd.f32 %v2173_v36, %v2151_v34  ;;  %v4774_v36 = vld [vmem:[%s6015_s9 + $0x4] ss:$0 sm:$0xff] }
 0xc48   :  { %v2193_v30 = vpop.f32.mrf.mxu2 }
 0xc49   :  { %v2194_v31 = vadd.f32 %v2193_v30, %v2171_v28  ;;  %v2216_v32 = vpop.f32.mrf.mxu3 }
 0xc4b   :  { %v2217_v35 = vadd.f32 %v2216_v32, %v2194_v31 }
 0xc4d   :  { %v2240_v11 = vadd.f32 %v2239_v33, %v2217_v35 }
 0xc4f   :  { %v2245_v38 = vadd.f32 %v2240_v11, %v5428_v4  ;;  %v4773_v11 = vld [vmem:[%s6014_s8 + $0x4] ss:$0 sm:$0xff] }
 0xc50   :  { %v2196_v39 = vpop.f32.mrf.mxu2 }
 0xc51   :  { %v2197_v40 = vadd.f32 %v2196_v39, %v2174_v37  ;;  %v2249_v41 = vsel %vm213_vm1, %v2245_v38, 0.0  ;;  %v2219_v42 = vpop.f32.mrf.mxu3 }
 0xc52   :  { %2250 = vadd.xlane.f32.xlu2 %v2249_v41 }
 0xc53   :  { %v2220_v43 = vadd.f32 %v2219_v42, %v2197_v40 }
 0xc55   :  { %v2243_v45 = vadd.f32 %v2242_v44, %v2220_v43 }
 0xc57   :  { %v2246_v46 = vadd.f32 %v2243_v45, %v5439_v25 }
 0xc59   :  { %v2252_v47 = vsel %vm213_vm1, %v2246_v46, 0.0 }
 0xc5a   :  { %2253 = vadd.xlane.f32.xlu0 %v2252_v47 }
 0xcc5   :  { %v2251_v48 = vpop.xlane.xlu2 %2250 }
 0xcc6   :  { %v2255_v51 = vmul.f32 %v2251_v48, %v5405_v60  ;;  %v4590_v48 = vld [vmem:[%s6037_s4 + $0xb8] sm:$0xff] }
 0xcc8   :  { %v2257_v52 = vsub.f32 %v2245_v38, %v2255_v51  ;;  %v4772_v38 = vld [vmem:[%s6013_s7 + $0x4] ss:$0 sm:$0xff] }
 0xcca   :  { %v2259_v53 = vmul.f32 %v2257_v52, %v2257_v52 }
 0xccc   :  { %v2261_v4 = vsel %vm213_vm1, %v2259_v53, 0.0  ;;  %v4589_v53 = vld [vmem:[%s6037_s4 + $0xb0] sm:$0xff] }
 0xccd   :  { %2262 = vadd.xlane.f32.xlu1 %v2261_v4  ;;  %v2254_v54 = vpop.xlane.xlu0 %2253  ;;  %v4588_v4 = vld [vmem:[%s6037_s4 + $0xa8] sm:$0xff] }
 0xcce   :  { %v2256_v55 = vmul.f32 %v2254_v54, %v5405_v60  ;;  %v4587_v54 = vld [vmem:[%s6037_s4 + $0xa0] sm:$0xff] }
 0xcd0   :  { %v5533_v56 = vsub.f32 %v2246_v46, %v2256_v55 }
 0xcd2   :  { %v2260_v57 = vmul.f32 %v5533_v56, %v5533_v56 }
 0xcd4   :  { %v2264_v25 = vsel %vm213_vm1, %v2260_v57, 0.0 }
 0xcd5   :  { %2265 = vadd.xlane.f32.xlu2 %v2264_v25 }
 0xd40   :  { %v2263_v5 = vpop.xlane.xlu1 %2262 }
 0xd41   :  { %v2267_v6 = vmul.f32 %v2263_v5, %v5405_v60  ;;  %v4604_v5 = vld [vmem:[%s6011_s5 + $0xa8] sm:$0xff] }
 0xd43   :  { %v2269_v23 = vadd.f32 1e-05, %v2267_v6  ;;  %v4603_v6 = vld [vmem:[%s6011_s5 + $0xa0] sm:$0xff] }
 0xd45   :  { %4828 = vrsqrt.f32 %v2269_v23  ;;  %vm2277_vm15 = vweird.f32 %v2269_v23 }
 0xd48   :  { %v2266_v8 = vpop.xlane.xlu2 %2265 }
 0xd49   :  { %v2268_v9 = vmul.f32 %v2266_v8, %v5405_v60  ;;  %v4621_v8 = vld [vmem:[%s6012_s6 + $0xb0] sm:$0xff] }
 0xd4b   :  { %v4829_v10 = vpop.eup %4828  ;;  %v2270_v12 = vadd.f32 1e-05, %v2268_v9  ;;  %v4620_v9 = vld [vmem:[%s6012_s6 + $0xa8] sm:$0xff] }
 0xd4c   :  { %v2272_v7 = vmul.f32 %v4829_v10, %v2269_v23  ;;  %vm2278_vm14 = vweird.f32 %v4829_v10  ;;  %v4622_v23 = vld [vmem:[%s6012_s6 + $0xb8] sm:$0xff] }
 0xd4d   :  { %4830 = vrsqrt.f32 %v2270_v12  ;;  %vm2279_vm0 = vmor %vm2277_vm15, %vm2278_vm14  ;;  %vm2287_vm4 = vweird.f32 %v2270_v12 }
 0xd4e   :  { %v2273_v13 = vmul.f32 %v4829_v10, %v2272_v7 }
 0xd50   :  { %v2274_v15 = vmul.f32 0.5, %v2273_v13 }
 0xd52   :  { %v2275_v16 = vsub.f32 1.5, %v2274_v15 }
 0xd53   :  { %v4831_v17 = vpop.eup %4830 }
 0xd54   :  { %v2276_v18 = vmul.f32 %v4829_v10, %v2275_v16  ;;  %v2282_v19 = vmul.f32 %v4831_v17, %v2270_v12  ;;  %vm2288_vm3 = vweird.f32 %v4831_v17  ;;  %v4619_v12 = vld [vmem:[%s6012_s6 + $0xa0] sm:$0xff] }
 0xd55   :  { %vm2289_vm5 = vmor %vm2287_vm4, %vm2288_vm3 }
 0xd56   :  { %v2280_v20 = vsel %vm2279_vm0, %v4829_v10, %v2276_v18  ;;  %v2283_v22 = vmul.f32 %v4831_v17, %v2282_v19 }
 0xd57   :  { %v2291_v26 = vmul.f32 %v2280_v20, %v2257_v52 }
 0xd58   :  { %v2284_v27 = vmul.f32 0.5, %v2283_v22 }
 0xd59   :  { %v2296_v28 = vmul.f32 %v4770_v14, %v2291_v26 }
 0xd5a   :  { %v2285_v29 = vsub.f32 1.5, %v2284_v27 }
 0xd5b   :  { %v5582_v30 = vadd.f32 %v4771_v24, %v2296_v28 }
 0xd5c   :  { %v2286_v31 = vmul.f32 %v4831_v17, %v2285_v29 }
 0xd5d   :  { %4648 = vmatmul.msk.f32.vlgmr.msrb.gmra.mxu1 %vm213_vm1, %v5582_v30  ;;  %4650 = vmatmul.msk.f32.vlgmr.msra.gmra.mxu2 %vm213_vm1, %v5582_v30 }
 0xd5e   :  { %v2290_v32 = vsel %vm2289_vm5, %v4831_v17, %v2286_v31  ;;  %4652 = vmatmul.msk.f32.vlgmr.msra.gmra.mxu3 %vm213_vm1, %v5582_v30 }
 0xd5f   :  { %v2292_v33 = vmul.f32 %v2290_v32, %v5533_v56 }
 0xd61   :  { %v2297_v34 = vmul.f32 %v4770_v14, %v2292_v33 }
 0xd63   :  { %v5591_v35 = vadd.f32 %v4771_v24, %v2297_v34 }
 0xd65   :  { %4649 = vmatmul.msk.f32.gmra.mxu1 %vm213_vm1, %v5591_v35  ;;  %4651 = vmatmul.msk.f32.gmra.mxu2 %vm213_vm1, %v5591_v35 }
 0xd66   :  { %4653 = vmatmul.msk.f32.gmra.mxu3 %vm213_vm1, %v5591_v35 }
 0xdda   :  { %v2405_v37 = vpop.f32.mrf.mxu1 }
 0xddb   :  { %v2406_v43 = vadd.f32 %v4772_v38, %v2405_v37 }
 0xde0   :  { %v2431_v39 = vpop.f32.mrf.mxu2 }
 0xde1   :  { %v2432_v40 = vadd.f32 %v4773_v11, %v2431_v39  ;;  %v2457_v41 = vpop.f32.mrf.mxu3  ;;  %v4643_v39 = vld [vmem:[%s6016_s10 + $0x20] sm:$0xff] }
 0xde2   :  { %v2458_v42 = vadd.f32 %v4774_v36, %v2457_v41  ;;  %v2408_v45 = vpop.f32.mrf.mxu1  ;;  %v4776_v41 = vld [vmem:[%s6014_s8 + $0x5] ss:$0 sm:$0xff] }
 0xde3   :  { %4654 = vmatpush.xpose.msk.msrb.mxu0 %vm295_vm2, %v2432_v40  ;;  %v2409_v52 = vadd.f32 %v4772_v38, %v2408_v45 }
 0xde4   :  { %2581 = vmatpush.msrb.mxu2 %v2458_v42 }
 0xde6   :  { %4655 = vmatmul.msk.f32.vlgmr.msrb.gmra.mxu0 %vm295_vm2, %v2406_v43  ;;  %2681 = vmatpush.msra.mxu2 %v4606_v3 }
 0xde7   :  { %2630 = vmatpush.msra.mxu0 %v4643_v39 }
 0xde8   :  { %v2434_v44 = vpop.f32.mrf.mxu2  ;;  %2682 = vmatpush.msra.mxu2 %v4605_v21 }
 0xde9   :  { %v2435_v46 = vadd.f32 %v4773_v11, %v2434_v44  ;;  %v2460_v47 = vpop.f32.mrf.mxu3 }
 0xdea   :  { %v2461_v51 = vadd.f32 %v4774_v36, %v2460_v47  ;;  %2683 = vmatpush.msra.mxu2 %v4604_v5  ;;  %v4777_v47 = vld [vmem:[%s6015_s9 + $0x5] ss:$0 sm:$0xff] }
 0xdeb   :  { %4656 = vmatpush.xpose.msk.msra.mxu1 %vm295_vm2, %v2435_v46  ;;  %v4775_v46 = vld [vmem:[%s6013_s7 + $0x5] ss:$0 sm:$0xff] }
 0xdec   :  { %2604 = vmatpush.msrb.mxu3 %v2461_v51  ;;  %2684 = vmatpush.msra.mxu2 %v4603_v6 }
 0xdee   :  { %4657 = vmatmul.msk.f32.vlgmr.msra.gmra.mxu1 %vm295_vm2, %v2409_v52  ;;  %2707 = vmatpush.msra.mxu3 %v4622_v23 }
 0xdef   :  { %2655 = vmatpush.msrb.mxu1 %v4590_v48 }
 0xdf0   :  { %2708 = vmatpush.msra.mxu3 %v4621_v8 }
 0xdf1   :  { %2656 = vmatpush.msrb.mxu1 %v4589_v53 }
 0xdf2   :  { %2709 = vmatpush.msra.mxu3 %v4620_v9 }
 0xdf3   :  { %2657 = vmatpush.msrb.mxu1 %v4588_v4 }
 0xdf4   :  { %2710 = vmatpush.msra.mxu3 %v4619_v12 }
 0xdf5   :  { %2658 = vmatpush.msrb.mxu1 %v4587_v54 }
 0xdf6   :  { %4662 = vmatmul.msk.f32.vlgmr.msrb.gmra.mxu1 %vm213_vm1, %v5582_v30 }
 0xdfe   :  { %4663 = vmatmul.msk.f32.gmra.mxu1 %vm213_vm1, %v5591_v35 }
 0xe63   :  { %v2486_v55 = vpop.f32.mrf.mxu0 }
 0xe64   :  { %v2515_v56 = vsel %vm295_vm2, %v2486_v55, -inf }
 0xe65   :  { %2516 = vmax.xlane.f32.xlu0 %v2515_v56 }
 0xe6b   :  { %v2512_v57 = vpop.f32.mrf.mxu1 }
 0xe6c   :  { %v2518_v25 = vsel %vm295_vm2, %v2512_v57, -inf }
 0xe6d   :  { %2519 = vmax.xlane.f32.xlu1 %v2518_v25  ;;  %v4592_v25 = vld [vmem:[%s6037_s4 + $0xc8] sm:$0xff] }
 0xe73   :  { %v2660_v42 = vpop.f32.mrf.mxu1 }
 0xe74   :  { %v2661_v48 = vadd.f32 %v4775_v46, %v2660_v42 }
 0xe7b   :  { %v2663_v53 = vpop.f32.mrf.mxu1 }
 0xe7c   :  { %v2664_v56 = vadd.f32 %v4775_v46, %v2663_v53  ;;  %v4780_v53 = vld [vmem:[%s6014_s8 + $0x6] ss:$0 sm:$0xff] }
 0xed8   :  { %v2517_v58 = vpop.xlane.xlu0 %2516 }
 0xed9   :  { %v2521_v61 = vsub.f32 %v2486_v55, %v2517_v58  ;;  %v4594_v55 = vld [vmem:[%s6037_s4 + $0xd8] sm:$0xff] }
 0xedb   :  { %v2523_v62 = vmul.f32 1.442695, %v2521_v61  ;;  %v4591_v61 = vld [vmem:[%s6037_s4 + $0xc0] sm:$0xff] }
 0xedd   :  { %4832 = vpow2.f32 %v2523_v62 }
 0xee0   :  { %v2520_v63 = vpop.xlane.xlu1 %2519 }
 0xee1   :  { %v2522_v0 = vsub.f32 %v2512_v57, %v2520_v63  ;;  %v4593_v57 = vld [vmem:[%s6037_s4 + $0xd0] sm:$0xff] }
 0xee3   :  { %v4833_v49 = vpop.eup %4832  ;;  %v2525_v59 = vmul.f32 1.442695, %v2522_v0 }
 0xee4   :  { %v2527_v1 = vsel %vm295_vm2, %v4833_v49, 0.0 }
 0xee5   :  { %4834 = vpow2.f32 %v2525_v59  ;;  %2528 = vadd.xlane.f32.xlu2 %v2527_v1 }
 0xeeb   :  { %v4835_v2 = vpop.eup %4834 }
 0xeec   :  { %v2530_v50 = vsel %vm295_vm2, %v4835_v2, 0.0 }
 0xeed   :  { %2531 = vadd.xlane.f32.xlu0 %v2530_v50 }
 0xf58   :  { %v2529_v10 = vpop.xlane.xlu2 %2528 }
 0xf59   :  { %4836 = vrcp.f32 %v2529_v10  ;;  %v2544_v17 = vand.u32 2147483648, %v2529_v10  ;;  %v2542_v19 = vand.u32 2147483647, %v2529_v10  ;;  %vm2538_vm7 = vweird.f32 %v2529_v10 }
 0xf5b   :  { %v2545_v22 = vor.u32 1.1754944e-38, %v2544_v17  ;;  %vm2543_vm9 = vcmp.eq.f32.partialorder %v2542_v19, 8.507059e+37  ;;  %v4607_v17 = vld [vmem:[%s6011_s5 + $0xc0] sm:$0xff]  ;;  %v4624_v19 = vld [vmem:[%s6012_s6 + $0xc8] sm:$0xff] }
 0xf5f   :  { %v4837_v7 = vpop.eup %4836 }
 0xf60   :  { %v2534_v13 = vmul.f32 %v4837_v7, %v2529_v10  ;;  %v2532_v15 = vpop.xlane.xlu0 %2531  ;;  %vm2539_vm6 = vweird.f32 %v4837_v7 }
 0xf61   :  { %4838 = vrcp.f32 %v2532_v15  ;;  %vm2540_vm8 = vmor %vm2538_vm7, %vm2539_vm6  ;;  %v2558_v31 = vand.u32 2147483648, %v2532_v15  ;;  %v2556_v33 = vand.u32 2147483647, %v2532_v15  ;;  %vm2552_vm11 = vweird.f32 %v2532_v15 }
 0xf62   :  { %v2535_v16 = vsub.f32 1.0, %v2534_v13  ;;  %v4609_v13 = vld [vmem:[%s6011_s5 + $0xd0] sm:$0xff] }
 0xf63   :  { %v2559_v11 = vor.u32 1.1754944e-38, %v2558_v31  ;;  %vm2557_vm13 = vcmp.eq.f32.partialorder %v2556_v33, 8.507059e+37 }
 0xf64   :  { %v2536_v18 = vmul.f32 %v4837_v7, %v2535_v16  ;;  %v4626_v16 = vld [vmem:[%s6012_s6 + $0xd8] sm:$0xff] }
 0xf66   :  { %v2537_v14 = vadd.f32 %v4837_v7, %v2536_v18  ;;  %v4625_v18 = vld [vmem:[%s6012_s6 + $0xd0] sm:$0xff] }
 0xf67   :  { %v4839_v20 = vpop.eup %4838 }
 0xf68   :  { %v2541_v24 = vsel %vm2540_vm8, %v4837_v7, %v2537_v14  ;;  %v2548_v26 = vmul.f32 %v4839_v20, %v2532_v15  ;;  %vm2553_vm10 = vweird.f32 %v4839_v20  ;;  %v4610_v7 = vld [vmem:[%s6011_s5 + $0xd8] sm:$0xff]  ;;  %v4608_v15 = vld [vmem:[%s6011_s5 + $0xc8] sm:$0xff]  ;;  %v4623_v14 = vld [vmem:[%s6012_s6 + $0xc0] sm:$0xff] }
 0xf69   :  { %v2546_v27 = vsel %vm2543_vm9, %v2545_v22, %v2541_v24  ;;  %vm2554_vm12 = vmor %vm2552_vm11, %vm2553_vm10 }
 0xf6a   :  { %v2561_v28 = vmul.f32 %v4833_v49, %v2546_v27  ;;  %v2549_v29 = vsub.f32 1.0, %v2548_v26 }
 0xf6c   :  { %v2550_v32 = vmul.f32 %v4839_v20, %v2549_v29  ;;  %4658 = vmatmul.msk.f32.vlgmr.msrb.gmra.mxu2 %vm295_vm2, %v2561_v28 }
 0xf6e   :  { %v2551_v34 = vadd.f32 %v4839_v20, %v2550_v32 }
 0xf70   :  { %v2555_v36 = vsel %vm2554_vm12, %v4839_v20, %v2551_v34 }
 0xf71   :  { %v2560_v37 = vsel %vm2557_vm13, %v2559_v11, %v2555_v36 }
 0xf72   :  { %v2562_v38 = vmul.f32 %v4835_v2, %v2560_v37 }
 0xf74   :  { %4659 = vmatmul.msk.f32.vlgmr.msrb.gmra.mxu3 %vm295_vm2, %v2562_v38  ;;  %4664 = vmatmul.msk.f32.vlgmr.msra.gmra.mxu2 %vm213_vm1, %v5582_v30 }
 0xf7c   :  { %4665 = vmatmul.msk.f32.gmra.mxu2 %vm213_vm1, %v5591_v35  ;;  %4666 = vmatmul.msk.f32.vlgmr.msra.gmra.mxu3 %vm213_vm1, %v5582_v30 }
 0xf84   :  { %4667 = vmatmul.msk.f32.gmra.mxu3 %vm213_vm1, %v5591_v35 }
 0xfef   :  { %v2583_v40 = vpop.f32.mrf.mxu2 }
 0xff0   :  { %4660 = vmatmul.msk.f32.vlgmr.msra.gmra.mxu0 %vm295_vm2, %v2583_v40 }
 0xff7   :  { %v2606_v43 = vpop.f32.mrf.mxu3  ;;  %v2686_v44 = vpop.f32.mrf.mxu2 }
 0xff8   :  { %v2687_v45 = vadd.f32 %v4776_v41, %v2686_v44  ;;  %4661 = vmatmul.msk.f32.gmra.mxu0 %vm295_vm2, %v2606_v43 }
 0xffa   :  { %4668 = vmatpush.xpose.msk.msrb.mxu0 %vm295_vm2, %v2687_v45 }
 0xfff   :  { %v2689_v51 = vpop.f32.mrf.mxu2  ;;  %v2712_v52 = vpop.f32.mrf.mxu3 }
0x1000   :  { %v2690_v4 = vadd.f32 %v4776_v41, %v2689_v51  ;;  %v2713_v54 = vadd.f32 %v4777_v47, %v2712_v52  ;;  %4669 = vmatmul.msk.f32.vlgmr.msrb.gmra.mxu0 %vm295_vm2, %v2661_v48  ;;  %v4644_v48 = vld [vmem:[%s6016_s10 + $0x28] sm:$0xff] }
0x1001   :  { %2885 = vmatpush.msra.mxu0 %v4644_v48 }
0x1002   :  { %4670 = vmatpush.xpose.msk.msra.mxu1 %vm295_vm2, %v2690_v4  ;;  %2836 = vmatpush.msrb.mxu2 %v2713_v54 }
0x1004   :  { %2936 = vmatpush.msra.mxu2 %v4610_v7 }
0x1005   :  { %4671 = vmatmul.msk.f32.vlgmr.msra.gmra.mxu1 %vm295_vm2, %v2664_v56  ;;  %v4781_v56 = vld [vmem:[%s6015_s9 + $0x6] ss:$0 sm:$0xff] }
0x1006   :  { %2910 = vmatpush.msrb.mxu1 %v4594_v55  ;;  %2937 = vmatpush.msra.mxu2 %v4609_v13 }
0x1007   :  { %v2715_v58 = vpop.f32.mrf.mxu3 }
0x1008   :  { %2911 = vmatpush.msrb.mxu1 %v4593_v57  ;;  %v2716_v62 = vadd.f32 %v4777_v47, %v2715_v58  ;;  %2938 = vmatpush.msra.mxu2 %v4608_v15  ;;  %v4779_v57 = vld [vmem:[%s6013_s7 + $0x6] ss:$0 sm:$0xff] }
0x100a   :  { %2912 = vmatpush.msrb.mxu1 %v4592_v25  ;;  %2859 = vmatpush.msrb.mxu3 %v2716_v62 }
0x100b   :  { %2939 = vmatpush.msra.mxu2 %v4607_v17 }
0x100c   :  { %2913 = vmatpush.msrb.mxu1 %v4591_v61  ;;  %2962 = vmatpush.msra.mxu3 %v4626_v16 }
0x100d   :  { %4676 = vmatmul.msk.f32.vlgmr.msrb.gmra.mxu1 %vm213_vm1, %v5582_v30 }
0x100e   :  { %2963 = vmatpush.msra.mxu3 %v4625_v18 }
0x1010   :  { %2964 = vmatpush.msra.mxu3 %v4624_v19 }
0x1012   :  { %2965 = vmatpush.msra.mxu3 %v4623_v14 }
0x1015   :  { %4677 = vmatmul.msk.f32.gmra.mxu1 %vm213_vm1, %v5591_v35 }
0x106d   :  { %v5700_v63 = vpop.f32.mrf.mxu0 }
0x1075   :  { %v5702_v0 = vpop.f32.mrf.mxu0 }
0x107d   :  { %v2741_v49 = vpop.f32.mrf.mxu0 }
0x107e   :  { %v2770_v59 = vsel %vm295_vm2, %v2741_v49, -inf }
0x107f   :  { %2771 = vmax.xlane.f32.xlu1 %v2770_v59 }
0x1082   :  { %v2767_v1 = vpop.f32.mrf.mxu1 }
0x1083   :  { %v2773_v2 = vsel %vm295_vm2, %v2767_v1, -inf }
0x1084   :  { %2774 = vmax.xlane.f32.xlu2 %v2773_v2 }
0x108a   :  { %v2915_v4 = vpop.f32.mrf.mxu1 }
0x108b   :  { %v2916_v61 = vadd.f32 %v4779_v57, %v2915_v4 }
0x10f2   :  { %v2772_v50 = vpop.xlane.xlu1 %2771 }
0x10f3   :  { %v2776_v3 = vsub.f32 %v2741_v49, %v2772_v50  ;;  %v2918_v49 = vpop.f32.mrf.mxu1  ;;  %v4597_v50 = vld [vmem:[%s6037_s4 + $0xf0] sm:$0xff] }
0x10f4   :  { %v2919_v2 = vadd.f32 %v4779_v57, %v2918_v49 }
0x10f5   :  { %v2778_v21 = vmul.f32 1.442695, %v2776_v3 }
0x10f7   :  { %4840 = vpow2.f32 %v2778_v21  ;;  %v2775_v5 = vpop.xlane.xlu2 %2774 }
0x10f8   :  { %v2777_v6 = vsub.f32 %v2767_v1, %v2775_v5  ;;  %v4598_v1 = vld [vmem:[%s6037_s4 + $0xf8] sm:$0xff]  ;;  %v4596_v5 = vld [vmem:[%s6037_s4 + $0xe8] sm:$0xff] }
0x10fa   :  { %v2780_v23 = vmul.f32 1.442695, %v2777_v6  ;;  %v4595_v6 = vld [vmem:[%s6037_s4 + $0xe0] sm:$0xff]  ;;  %s4479_s4 = sshll.u32 %s6026_s20, 4  ;;  %s4480_s4 = int_to_ptr.hbm [resolvable:$true] %s4479_s4 }
0x10fc   :  { %4842 = vpow2.f32 %v2780_v23 }
0x10fd   :  { %v4841_v8 = vpop.eup %4840 }
0x10fe   :  { %v2782_v9 = vsel %vm295_vm2, %v4841_v8, 0.0 }
0x10ff   :  { %2783 = vadd.xlane.f32.xlu0 %v2782_v9 }
0x1102   :  { %v4843_v10 = vpop.eup %4842 }
0x1103   :  { %v2785_v12 = vsel %vm295_vm2, %v4843_v10, 0.0 }
0x1104   :  { %2786 = vadd.xlane.f32.xlu1 %v2785_v12 }
0x1172   :  { %v2784_v20 = vpop.xlane.xlu0 %2783 }
0x1173   :  { %4844 = vrcp.f32 %v2784_v20  ;;  %v2799_v28 = vand.u32 2147483648, %v2784_v20  ;;  %v2797_v32 = vand.u32 2147483647, %v2784_v20  ;;  %vm2793_vm15 = vweird.f32 %v2784_v20 }
0x1175   :  { %v2800_v11 = vor.u32 1.1754944e-38, %v2799_v28  ;;  %vm2798_vm3 = vcmp.eq.f32.partialorder %v2797_v32, 8.507059e+37  ;;  %v4612_v28 = vld [vmem:[%s6011_s5 + $0xe8] sm:$0xff]  ;;  %v4629_v32 = vld [vmem:[%s6012_s6 + $0xf0] sm:$0xff] }
0x1177   :  { %v2787_v22 = vpop.xlane.xlu1 %2786 }
0x1178   :  { %4846 = vrcp.f32 %v2787_v22  ;;  %v2813_v38 = vand.u32 2147483648, %v2787_v22  ;;  %v2811_v41 = vand.u32 2147483647, %v2787_v22  ;;  %vm2807_vm5 = vweird.f32 %v2787_v22 }
0x1179   :  { %v4845_v24 = vpop.eup %4844 }
0x117a   :  { %v2789_v26 = vmul.f32 %v4845_v24, %v2784_v20  ;;  %vm2794_vm14 = vweird.f32 %v4845_v24  ;;  %v2814_v44 = vor.u32 1.1754944e-38, %v2813_v38  ;;  %vm2812_vm7 = vcmp.eq.f32.partialorder %v2811_v41, 8.507059e+37 }
0x117b   :  { %vm2795_vm0 = vmor %vm2793_vm15, %vm2794_vm14 }
0x117c   :  { %v2790_v27 = vsub.f32 1.0, %v2789_v26  ;;  %v4614_v26 = vld [vmem:[%s6011_s5 + $0xf8] sm:$0xff] }
0x117e   :  { %v4847_v29 = vpop.eup %4846  ;;  %v2791_v31 = vmul.f32 %v4845_v24, %v2790_v27  ;;  %v4613_v27 = vld [vmem:[%s6011_s5 + $0xf0] sm:$0xff] }
0x117f   :  { %v2803_v33 = vmul.f32 %v4847_v29, %v2787_v22  ;;  %vm2808_vm4 = vweird.f32 %v4847_v29 }
0x1180   :  { %v2792_v34 = vadd.f32 %v4845_v24, %v2791_v31  ;;  %vm2809_vm6 = vmor %vm2807_vm5, %vm2808_vm4  ;;  %v4611_v31 = vld [vmem:[%s6011_s5 + $0xe0] sm:$0xff] }
0x1181   :  { %v2804_v36 = vsub.f32 1.0, %v2803_v33  ;;  %v4628_v33 = vld [vmem:[%s6012_s6 + $0xe8] sm:$0xff] }
0x1182   :  { %v2796_v37 = vsel %vm2795_vm0, %v4845_v24, %v2792_v34  ;;  %v4627_v34 = vld [vmem:[%s6012_s6 + $0xe0] sm:$0xff] }
0x1183   :  { %v2801_v39 = vsel %vm2798_vm3, %v2800_v11, %v2796_v37  ;;  %v2805_v40 = vmul.f32 %v4847_v29, %v2804_v36 }
0x1184   :  { %v2816_v42 = vmul.f32 %v4841_v8, %v2801_v39 }
0x1185   :  { %v2806_v43 = vadd.f32 %v4847_v29, %v2805_v40 }
0x1186   :  { %4672 = vmatmul.msk.f32.vlgmr.msrb.gmra.mxu2 %vm295_vm2, %v2816_v42 }
0x1187   :  { %v2810_v45 = vsel %vm2809_vm6, %v4847_v29, %v2806_v43  ;;  %v4630_v29 = vld [vmem:[%s6012_s6 + $0xf8] sm:$0xff] }
0x1188   :  { %v2815_v46 = vsel %vm2812_vm7, %v2814_v44, %v2810_v45 }
0x1189   :  { %v2817_v47 = vmul.f32 %v4843_v10, %v2815_v46 }
0x118b   :  { %4673 = vmatmul.msk.f32.vlgmr.msrb.gmra.mxu3 %vm295_vm2, %v2817_v47 }
0x118e   :  { %4678 = vmatmul.msk.f32.vlgmr.msra.gmra.mxu2 %vm213_vm1, %v5582_v30 }
0x1193   :  { %4680 = vmatmul.msk.f32.vlgmr.msra.gmra.mxu3 %vm213_vm1, %v5582_v30 }
0x1196   :  { %4679 = vmatmul.msk.f32.gmra.mxu2 %vm213_vm1, %v5591_v35 }
0x119b   :  { %4681 = vmatmul.msk.f32.gmra.mxu3 %vm213_vm1, %v5591_v35 }
0x1209   :  { %v2838_v51 = vpop.f32.mrf.mxu2 }
0x120a   :  { %4674 = vmatmul.msk.f32.vlgmr.msra.gmra.mxu0 %vm295_vm2, %v2838_v51 }
0x120e   :  { %v2861_v52 = vpop.f32.mrf.mxu3 }
0x1211   :  { %v2941_v54 = vpop.f32.mrf.mxu2 }
0x1212   :  { %v2942_v55 = vadd.f32 %v4780_v53, %v2941_v54  ;;  %4675 = vmatmul.msk.f32.gmra.mxu0 %vm295_vm2, %v2861_v52 }
0x1214   :  { %4682 = vmatpush.xpose.msk.msrb.mxu0 %vm295_vm2, %v2942_v55 }
0x1216   :  { %v2967_v25 = vpop.f32.mrf.mxu3 }
0x1217   :  { %v2968_v58 = vadd.f32 %v4781_v56, %v2967_v25 }
0x1219   :  { %v2944_v62 = vpop.f32.mrf.mxu2  ;;  %3091 = vmatpush.msrb.mxu2 %v2968_v58 }
0x121a   :  { %v2945_v59 = vadd.f32 %v4780_v53, %v2944_v62  ;;  %4683 = vmatmul.msk.f32.vlgmr.msrb.gmra.mxu0 %vm295_vm2, %v2916_v61  ;;  %v4645_v61 = vld [vmem:[%s6016_s10 + $0x30] sm:$0xff] }
0x121b   :  { %3191 = vmatpush.msra.mxu2 %v4614_v26  ;;  %3140 = vmatpush.msra.mxu0 %v4645_v61 }
0x121c   :  { %4684 = vmatpush.xpose.msk.msra.mxu1 %vm295_vm2, %v2945_v59  ;;  %v4783_v59 = vld [vmem:[%s6014_s8 + $0x7] ss:$0 sm:$0xff] }
0x121d   :  { %3192 = vmatpush.msra.mxu2 %v4613_v27 }
0x121e   :  { %v2970_v3 = vpop.f32.mrf.mxu3 }
0x121f   :  { %v2971_v21 = vadd.f32 %v4781_v56, %v2970_v3  ;;  %4685 = vmatmul.msk.f32.vlgmr.msra.gmra.mxu1 %vm295_vm2, %v2919_v2  ;;  %3193 = vmatpush.msra.mxu2 %v4612_v28  ;;  %v4784_v3 = vld [vmem:[%s6015_s9 + $0x7] ss:$0 sm:$0xff] }
0x1220   :  { %3165 = vmatpush.msrb.mxu1 %v4598_v1 }
0x1221   :  { %3114 = vmatpush.msrb.mxu3 %v2971_v21  ;;  %3194 = vmatpush.msra.mxu2 %v4611_v31  ;;  %v4782_v21 = vld [vmem:[%s6013_s7 + $0x7] ss:$0 sm:$0xff] }
0x1222   :  { %3166 = vmatpush.msrb.mxu1 %v4597_v50 }
0x1223   :  { %3217 = vmatpush.msra.mxu3 %v4630_v29 }
0x1224   :  { %3167 = vmatpush.msrb.mxu1 %v4596_v5 }
0x1225   :  { %3218 = vmatpush.msra.mxu3 %v4629_v32 }
0x1226   :  { %3168 = vmatpush.msrb.mxu1 %v4595_v6 }
0x1227   :  { %4690 = vmatmul.msk.f32.vlgmr.msrb.gmra.mxu1 %vm213_vm1, %v5582_v30  ;;  %3219 = vmatpush.msra.mxu3 %v4628_v33 }
0x1229   :  { %3220 = vmatpush.msra.mxu3 %v4627_v34 }
0x122f   :  { %4691 = vmatmul.msk.f32.gmra.mxu1 %vm213_vm1, %v5591_v35 }
0x1287   :  { %v5776_v23 = vpop.f32.mrf.mxu0 }
0x128f   :  { %v5778_v8 = vpop.f32.mrf.mxu0 }
0x1297   :  { %v2996_v9 = vpop.f32.mrf.mxu0 }
0x1298   :  { %v3025_v10 = vsel %vm295_vm2, %v2996_v9, -inf }
0x1299   :  { %3026 = vmax.xlane.f32.xlu2 %v3025_v10 }
0x129c   :  { %v3022_v12 = vpop.f32.mrf.mxu1 }
0x129d   :  { %v3028_v7 = vsel %vm295_vm2, %v3022_v12, -inf }
0x129e   :  { %3029 = vmax.xlane.f32.xlu0 %v3028_v7 }
0x12a4   :  { %v3170_v1 = vpop.f32.mrf.mxu1 }
0x130c   :  { %v3027_v13 = vpop.xlane.xlu2 %3026 }
0x130d   :  { %v3031_v15 = vsub.f32 %v2996_v9, %v3027_v13  ;;  %v3171_v9 = vadd.f32 %v4782_v21, %v3170_v1  ;;  %v4646_v1 = vld [vmem:[%s6016_s10 + $0x38] sm:$0xff] }
0x130f   :  { %v3033_v16 = vmul.f32 1.442695, %v3031_v15 }
0x1311   :  { %4848 = vpow2.f32 %v3033_v16  ;;  %v3030_v17 = vpop.xlane.xlu0 %3029 }
0x1312   :  { %v3032_v18 = vsub.f32 %v3022_v12, %v3030_v17  ;;  %v3173_v12 = vpop.f32.mrf.mxu1  ;;  %v4778_v17 = vld [vmem:[%s6017_s11 + $0x1] ss:$0 sm:$0xff] }
0x1313   :  { %v3174_v13 = vadd.f32 %v4782_v21, %v3173_v12 }
0x1314   :  { %v3035_v19 = vmul.f32 1.442695, %v3032_v18  ;;  %v2638_v18 = vadd.f32 %v4778_v17, %v5700_v63 }
0x1316   :  { %4850 = vpow2.f32 %v3035_v19  ;;  %v2893_v19 = vadd.f32 %v5776_v23, %v2638_v18 }
0x1317   :  { %v4849_v14 = vpop.eup %4848 }
0x1318   :  { %v3037_v20 = vsel %vm295_vm2, %v4849_v14, 0.0 }
0x1319   :  { %3038 = vadd.xlane.f32.xlu1 %v3037_v20 }
0x131c   :  { %v4851_v22 = vpop.eup %4850 }
0x131d   :  { %v3040_v24 = vsel %vm295_vm2, %v4851_v22, 0.0 }
0x131e   :  { %3041 = vadd.xlane.f32.xlu2 %v3040_v24 }
0x138c   :  { %v3039_v11 = vpop.xlane.xlu1 %3038 }
0x138d   :  { %4852 = vrcp.f32 %v3039_v11  ;;  %v3054_v40 = vand.u32 2147483648, %v3039_v11  ;;  %v3052_v43 = vand.u32 2147483647, %v3039_v11  ;;  %vm3048_vm9 = vweird.f32 %v3039_v11 }
0x138f   :  { %v3055_v46 = vor.u32 1.1754944e-38, %v3054_v40  ;;  %vm3053_vm11 = vcmp.eq.f32.partialorder %v3052_v43, 8.507059e+37 }
0x1391   :  { %v3042_v36 = vpop.xlane.xlu2 %3041 }
0x1392   :  { %4854 = vrcp.f32 %v3042_v36  ;;  %v3068_v51 = vand.u32 2147483648, %v3042_v36  ;;  %v3066_v4 = vand.u32 2147483647, %v3042_v36  ;;  %vm3062_vm13 = vweird.f32 %v3042_v36 }
0x1393   :  { %v4853_v37 = vpop.eup %4852 }
0x1394   :  { %v3044_v38 = vmul.f32 %v4853_v37, %v3039_v11  ;;  %vm3049_vm8 = vweird.f32 %v4853_v37  ;;  %v3069_v56 = vor.u32 1.1754944e-38, %v3068_v51  ;;  %vm3067_vm15 = vcmp.eq.f32.partialorder %v3066_v4, 8.507059e+37 }
0x1395   :  { %vm3050_vm10 = vmor %vm3048_vm9, %vm3049_vm8 }
0x1396   :  { %v3045_v39 = vsub.f32 1.0, %v3044_v38 }
0x1398   :  { %v4855_v41 = vpop.eup %4854  ;;  %v3046_v42 = vmul.f32 %v4853_v37, %v3045_v39 }
0x1399   :  { %v3058_v44 = vmul.f32 %v4855_v41, %v3042_v36  ;;  %vm3063_vm12 = vweird.f32 %v4855_v41 }
0x139a   :  { %v3047_v45 = vadd.f32 %v4853_v37, %v3046_v42  ;;  %vm3064_vm14 = vmor %vm3062_vm13, %vm3063_vm12 }
0x139b   :  { %v3059_v47 = vsub.f32 1.0, %v3058_v44 }
0x139c   :  { %v3051_v48 = vsel %vm3050_vm10, %v4853_v37, %v3047_v45 }
0x139d   :  { %v3056_v52 = vsel %vm3053_vm11, %v3055_v46, %v3051_v48  ;;  %v3060_v53 = vmul.f32 %v4855_v41, %v3059_v47 }
0x139e   :  { %v3071_v54 = vmul.f32 %v4849_v14, %v3056_v52 }
0x139f   :  { %v3061_v55 = vadd.f32 %v4855_v41, %v3060_v53 }
0x13a0   :  { %4686 = vmatmul.msk.f32.vlgmr.msrb.gmra.mxu2 %vm295_vm2, %v3071_v54 }
0x13a1   :  { %v3065_v57 = vsel %vm3064_vm14, %v4855_v41, %v3061_v55 }
0x13a2   :  { %v3070_v25 = vsel %vm3067_vm15, %v3069_v56, %v3065_v57 }
0x13a3   :  { %v3072_v58 = vmul.f32 %v4851_v22, %v3070_v25  ;;  %v2639_v22 = vadd.f32 %v4778_v17, %v5702_v0 }
0x13a5   :  { %4687 = vmatmul.msk.f32.vlgmr.msrb.gmra.mxu3 %vm295_vm2, %v3072_v58  ;;  %v2894_v24 = vadd.f32 %v5778_v8, %v2639_v22  ;;  %v3514_v22 = vld [vmem:[#allocation2 + $0x380] sm:$0xff] }
0x13a8   :  { %4692 = vmatmul.msk.f32.vlgmr.msra.gmra.mxu2 %vm213_vm1, %v5582_v30 }
0x13ad   :  { %4694 = vmatmul.msk.f32.vlgmr.msra.gmra.mxu3 %vm213_vm1, %v5582_v30 }
0x13b0   :  { %4693 = vmatmul.msk.f32.gmra.mxu2 %vm213_vm1, %v5591_v35 }
0x13b5   :  { %4695 = vmatmul.msk.f32.gmra.mxu3 %vm213_vm1, %v5591_v35 }
0x1423   :  { %v3093_v62 = vpop.f32.mrf.mxu2 }
0x1424   :  { %4688 = vmatmul.msk.f32.vlgmr.msra.gmra.mxu0 %vm295_vm2, %v3093_v62 }
0x1428   :  { %v3116_v49 = vpop.f32.mrf.mxu3 }
0x142b   :  { %v3196_v2 = vpop.f32.mrf.mxu2 }
0x142c   :  { %v3197_v50 = vadd.f32 %v4783_v59, %v3196_v2  ;;  %4689 = vmatmul.msk.f32.gmra.mxu0 %vm295_vm2, %v3116_v49 }
0x142e   :  { %4696 = vmatpush.xpose.msk.msrb.mxu0 %vm295_vm2, %v3197_v50 }
0x1430   :  { %v3222_v5 = vpop.f32.mrf.mxu3 }
0x1431   :  { %v3223_v6 = vadd.f32 %v4784_v3, %v3222_v5 }
0x1432   :  { %3395 = vmatpush.msra.mxu0 %v4646_v1 }
0x1433   :  { %v3199_v10 = vpop.f32.mrf.mxu2  ;;  %3346 = vmatpush.msrb.mxu2 %v3223_v6 }
0x1434   :  { %v3200_v7 = vadd.f32 %v4783_v59, %v3199_v10  ;;  %4697 = vmatmul.msk.f32.vlgmr.msrb.gmra.mxu0 %vm295_vm2, %v3171_v9 }
0x1436   :  { %4698 = vmatpush.xpose.msk.msra.mxu1 %vm295_vm2, %v3200_v7 }
0x1438   :  { %v3225_v15 = vpop.f32.mrf.mxu3 }
0x1439   :  { %v3226_v16 = vadd.f32 %v4784_v3, %v3225_v15  ;;  %4699 = vmatmul.msk.f32.vlgmr.msra.gmra.mxu1 %vm295_vm2, %v3174_v13 }
0x143a   :  { %3585 = vmatpush.msrb.mxu1 %v3514_v22  ;;  %v3507_v22 = vld [vmem:[#allocation2 + $0x348] sm:$0xff] }
0x143b   :  { %3369 = vmatpush.msrb.mxu3 %v3226_v16 }
0x14a1   :  { %v3142_v14 = vpop.f32.mrf.mxu0 }
0x14a2   :  { %v5841_v20 = vadd.f32 %v3142_v14, %v2893_v19 }
0x14a9   :  { %v3145_v26 = vpop.f32.mrf.mxu0 }
0x14aa   :  { %v5845_v27 = vadd.f32 %v3145_v26, %v2894_v24  ;;  %v3515_v24 = vld [vmem:[#allocation2 + $0x388] sm:$0xff]  ;;  %v3516_v26 = vld [vmem:[#allocation2 + $0x390] sm:$0xff] }
0x14ab   :  { %3608 = vmatpush.msra.mxu2 %v3515_v24  ;;  %3631 = vmatpush.msra.mxu3 %v3516_v26  ;;  %v3508_v26 = vld [vmem:[#allocation2 + $0x350] sm:$0xff] }
0x14b1   :  { %v3251_v28 = vpop.f32.mrf.mxu0 }
0x14b2   :  { %v3280_v29 = vsel %vm295_vm2, %v3251_v28, -inf }
0x14b3   :  { %3281 = vmax.xlane.f32.xlu0 %v3280_v29  ;;  %v3499_v29 = vld [vmem:[#allocation2 + $0x308] sm:$0xff] }
0x14b4   :  { %3609 = vmatpush.msra.mxu2 %v3499_v29  ;;  %v3491_v29 = vld [vmem:[#allocation2 + $0x2c8] sm:$0xff] }
0x14b6   :  { %v3277_v31 = vpop.f32.mrf.mxu1 }
0x14b7   :  { %v3283_v32 = vsel %vm295_vm2, %v3277_v31, -inf }
0x14b8   :  { %3284 = vmax.xlane.f32.xlu1 %v3283_v32  ;;  %v3501_v32 = vld [vmem:[#allocation2 + $0x318] sm:$0xff] }
0x1526   :  { %v3282_v63 = vpop.xlane.xlu0 %3281 }
0x1527   :  { %v3286_v23 = vsub.f32 %v3251_v28, %v3282_v63  ;;  %v3498_v28 = vld [vmem:[#allocation2 + $0x300] sm:$0xff] }
0x1528   :  { %3586 = vmatpush.msrb.mxu1 %v3498_v28  ;;  %v3482_v63 = vld [vmem:[#allocation2 + $0x280] sm:$0xff] }
0x1529   :  { %v3288_v33 = vmul.f32 1.442695, %v3286_v23  ;;  %v3483_v23 = vld [vmem:[#allocation2 + $0x288] sm:$0xff]  ;;  %v3490_v28 = vld [vmem:[#allocation2 + $0x2c0] sm:$0xff] }
0x152a   :  { %3587 = vmatpush.msrb.mxu1 %v3482_v63  ;;  %3610 = vmatpush.msra.mxu2 %v3483_v23  ;;  %v3493_v63 = vld [vmem:[#allocation2 + $0x2d8] sm:$0xff] }
0x152b   :  { %4856 = vpow2.f32 %v3288_v33  ;;  %v3285_v34 = vpop.xlane.xlu1 %3284  ;;  %v3484_v33 = vld [vmem:[#allocation2 + $0x290] sm:$0xff] }
0x152c   :  { %v3287_v11 = vsub.f32 %v3277_v31, %v3285_v34  ;;  %v3500_v31 = vld [vmem:[#allocation2 + $0x310] sm:$0xff]  ;;  %v3485_v34 = vld [vmem:[#allocation2 + $0x298] sm:$0xff] }
0x152d   :  { %3632 = vmatpush.msra.mxu3 %v3500_v31 }
0x152e   :  { %v3290_v0 = vmul.f32 1.442695, %v3287_v11  ;;  %v3466_v11 = vld [vmem:[#allocation2 + $0x200] sm:$0xff] }
0x152f   :  { %3633 = vmatpush.msra.mxu3 %v3484_v33  ;;  %3588 = vmatpush.msrb.mxu1 %v3466_v11  ;;  %v3475_v33 = vld [vmem:[#allocation2 + $0x248] sm:$0xff]  ;;  %v3477_v11 = vld [vmem:[#allocation2 + $0x258] sm:$0xff] }
0x1530   :  { %4858 = vpow2.f32 %v3290_v0  ;;  %v3467_v0 = vld [vmem:[#allocation2 + $0x208] sm:$0xff] }
0x1531   :  { %v4857_v8 = vpop.eup %4856  ;;  %3611 = vmatpush.msra.mxu2 %v3467_v0  ;;  %v3526_v0 = vld [vmem:[#allocation2 + $0x3e0] sm:$0xff] }
0x1532   :  { %v3292_v36 = vsel %vm295_vm2, %v4857_v8, 0.0 }
0x1533   :  { %3293 = vadd.xlane.f32.xlu2 %v3292_v36  ;;  %v3469_v36 = vld [vmem:[#allocation2 + $0x218] sm:$0xff] }
0x1536   :  { %v4859_v37 = vpop.eup %4858 }
0x1537   :  { %v3295_v38 = vsel %vm295_vm2, %v4859_v37, 0.0 }
0x1538   :  { %3296 = vadd.xlane.f32.xlu0 %v3295_v38 }
0x15a6   :  { %v3294_v39 = vpop.xlane.xlu2 %3293 }
0x15a7   :  { %4860 = vrcp.f32 %v3294_v39  ;;  %v3309_v44 = vand.u32 2147483648, %v3294_v39  ;;  %v3307_v47 = vand.u32 2147483647, %v3294_v39  ;;  %vm3303_vm3 = vweird.f32 %v3294_v39 }
0x15a9   :  { %v3310_v52 = vor.u32 1.1754944e-38, %v3309_v44  ;;  %vm3308_vm5 = vcmp.eq.f32.partialorder %v3307_v47, 8.507059e+37  ;;  %v3502_v44 = vld [vmem:[#allocation2 + $0x320] sm:$0xff]  ;;  %v3504_v47 = vld [vmem:[#allocation2 + $0x330] sm:$0xff] }
0x15ab   :  { %v3297_v40 = vpop.xlane.xlu0 %3296 }
0x15ac   :  { %4862 = vrcp.f32 %v3297_v40  ;;  %v3323_v54 = vand.u32 2147483648, %v3297_v40  ;;  %v3321_v57 = vand.u32 2147483647, %v3297_v40  ;;  %vm3317_vm7 = vweird.f32 %v3297_v40 }
0x15ad   :  { %v4861_v41 = vpop.eup %4860 }
0x15ae   :  { %v3299_v42 = vmul.f32 %v4861_v41, %v3294_v39  ;;  %vm3304_vm0 = vweird.f32 %v4861_v41  ;;  %v3324_v61 = vor.u32 1.1754944e-38, %v3323_v54  ;;  %vm3322_vm9 = vcmp.eq.f32.partialorder %v3321_v57, 8.507059e+37  ;;  %v3489_v54 = vld [vmem:[#allocation2 + $0x2b8] sm:$0xff] }
0x15af   :  { %vm3305_vm4 = vmor %vm3303_vm3, %vm3304_vm0 }
0x15b0   :  { %v3300_v43 = vsub.f32 1.0, %v3299_v42  ;;  %v3520_v42 = vld [vmem:[#allocation2 + $0x3b0] sm:$0xff] }
0x15b2   :  { %v4863_v45 = vpop.eup %4862  ;;  %v3301_v46 = vmul.f32 %v4861_v41, %v3300_v43  ;;  %v3521_v43 = vld [vmem:[#allocation2 + $0x3b8] sm:$0xff] }
0x15b3   :  { %v3313_v48 = vmul.f32 %v4863_v45, %v3297_v40  ;;  %vm3318_vm6 = vweird.f32 %v4863_v45  ;;  %v3518_v40 = vld [vmem:[#allocation2 + $0x3a0] sm:$0xff] }
0x15b4   :  { %v3302_v51 = vadd.f32 %v4861_v41, %v3301_v46  ;;  %vm3319_vm8 = vmor %vm3317_vm7, %vm3318_vm6  ;;  %3677 = vmatpush.msra.mxu1 %v3518_v40  ;;  %v3512_v40 = vld [vmem:[#allocation2 + $0x370] sm:$0xff] }
0x15b5   :  { %v3314_v53 = vsub.f32 1.0, %v3313_v48  ;;  %v3505_v48 = vld [vmem:[#allocation2 + $0x338] sm:$0xff] }
0x15b6   :  { %v3306_v4 = vsel %vm3305_vm4, %v4861_v41, %v3302_v51  ;;  %v3519_v41 = vld [vmem:[#allocation2 + $0x3a8] sm:$0xff]  ;;  %v3486_v51 = vld [vmem:[#allocation2 + $0x2a0] sm:$0xff]  ;;  %3678 = vmatpush.msra.mxu1 %v3502_v44  ;;  %v3496_v44 = vld [vmem:[#allocation2 + $0x2f0] sm:$0xff] }
0x15b7   :  { %v3311_v55 = vsel %vm3308_vm5, %v3310_v52, %v3306_v4  ;;  %v3315_v56 = vmul.f32 %v4863_v45, %v3314_v53  ;;  %v3487_v53 = vld [vmem:[#allocation2 + $0x2a8] sm:$0xff]  ;;  %v3488_v4 = vld [vmem:[#allocation2 + $0x2b0] sm:$0xff] }
0x15b8   :  { %v3326_v25 = vmul.f32 %v4857_v8, %v3311_v55  ;;  %v3468_v8 = vld [vmem:[#allocation2 + $0x210] sm:$0xff]  ;;  %v3470_v55 = vld [vmem:[#allocation2 + $0x220] sm:$0xff]  ;;  %3679 = vmatpush.msra.mxu1 %v3486_v51  ;;  %v3481_v51 = vld [vmem:[#allocation2 + $0x278] sm:$0xff] }
0x15b9   :  { %v3316_v58 = vadd.f32 %v4863_v45, %v3315_v56  ;;  %3634 = vmatpush.msra.mxu3 %v3468_v8  ;;  %v3471_v56 = vld [vmem:[#allocation2 + $0x228] sm:$0xff] }
0x15ba   :  { %4700 = vmatmul.msk.f32.vlgmr.msrb.gmra.mxu2 %vm295_vm2, %v3326_v25  ;;  %3680 = vmatpush.msra.mxu1 %v3470_v55  ;;  %v3527_v8 = vld [vmem:[#allocation2 + $0x3e8] sm:$0xff]  ;;  %v4006_v55 = vld [vmem:[#allocation5 + $0x300] sm:$0xff] }
0x15bb   :  { %v3320_v62 = vsel %vm3319_vm8, %v4863_v45, %v3316_v58  ;;  %3700 = vmatpush.msrb.mxu2 %v3519_v41  ;;  %v3503_v45 = vld [vmem:[#allocation2 + $0x328] sm:$0xff]  ;;  %v3472_v58 = vld [vmem:[#allocation2 + $0x230] sm:$0xff]  ;;  %v3513_v41 = vld [vmem:[#allocation2 + $0x378] sm:$0xff] }
0x15bc   :  { %v3325_v49 = vsel %vm3322_vm9, %v3324_v61, %v3320_v62  ;;  %v3473_v61 = vld [vmem:[#allocation2 + $0x238] sm:$0xff] }
0x15bd   :  { %v3327_v59 = vmul.f32 %v4859_v37, %v3325_v49  ;;  %3701 = vmatpush.msrb.mxu2 %v3503_v45  ;;  %v3497_v45 = vld [vmem:[#allocation2 + $0x2f8] sm:$0xff] }
0x15bf   :  { %4701 = vmatmul.msk.f32.vlgmr.msrb.gmra.mxu3 %vm295_vm2, %v3327_v59  ;;  %3702 = vmatpush.msrb.mxu2 %v3487_v53  ;;  %v4025_v53 = vld [vmem:[#allocation5 + $0x398] sm:$0xff] }
0x15c0   :  { %3723 = vmatpush.msrb.mxu3 %v3520_v42  ;;  %v3494_v42 = vld [vmem:[#allocation2 + $0x2e0] sm:$0xff] }
0x15c1   :  { %3703 = vmatpush.msrb.mxu2 %v3471_v56  ;;  %v4009_v56 = vld [vmem:[#allocation5 + $0x318] sm:$0xff] }
0x15c2   :  { %3724 = vmatpush.msrb.mxu3 %v3504_v47  ;;  %v3479_v47 = vld [vmem:[#allocation2 + $0x268] sm:$0xff] }
0x15c4   :  { %3725 = vmatpush.msrb.mxu3 %v3488_v4  ;;  %v4023_v4 = vld [vmem:[#allocation5 + $0x388] sm:$0xff] }
0x15c6   :  { %3726 = vmatpush.msrb.mxu3 %v3472_v58  ;;  %v4007_v58 = vld [vmem:[#allocation5 + $0x308] sm:$0xff] }
0x163d   :  { %v3348_v2 = vpop.f32.mrf.mxu2 }
0x163e   :  { %4702 = vmatmul.msk.f32.vlgmr.msra.gmra.mxu0 %vm295_vm2, %v3348_v2 }
0x1642   :  { %v3371_v50 = vpop.f32.mrf.mxu3 }
0x1646   :  { %4703 = vmatmul.msk.f32.gmra.mxu0 %vm295_vm2, %v3371_v50 }
0x16bb   :  { %v3397_v3 = vpop.f32.mrf.mxu0 }
0x16bc   :  { %v3403_v21 = vadd.f32 %v3397_v3, %v5841_v20 }
0x16be   :  { %v3405_v5 = vadd.f32 %v3403_v21, %v5582_v30  ;;  %v4785_v21 = vld [vmem:[%s6018_s12 + $0x1] ss:$0 sm:$0xff] }
0x16c0   :  { %v3411_v6 = vsel %vm213_vm1, %v3405_v5, 0.0 }
0x16c1   :  { %3412 = vadd.xlane.f32.xlu1 %v3411_v6 }
0x16c3   :  { %v3400_v9 = vpop.f32.mrf.mxu0 }
0x16c4   :  { %v3404_v10 = vadd.f32 %v3400_v9, %v5845_v27  ;;  %v3517_v27 = vld [vmem:[#allocation2 + $0x398] sm:$0xff]  ;;  %v4786_v9 = vld [vmem:[%s6019_s13 + $0x1] ss:$0 sm:$0xff] }
0x16c5   :  { %3654 = vmatpush.msrb.mxu0 %v3517_v27  ;;  %v3509_v27 = vld [vmem:[#allocation2 + $0x358] sm:$0xff] }
0x16c6   :  { %v3406_v12 = vadd.f32 %v3404_v10, %v5591_v35 }
0x16c7   :  { %3655 = vmatpush.msrb.mxu0 %v3501_v32  ;;  %v3492_v32 = vld [vmem:[#allocation2 + $0x2d0] sm:$0xff] }
0x16c8   :  { %v3414_v7 = vsel %vm213_vm1, %v3406_v12, 0.0 }
0x16c9   :  { %3415 = vadd.xlane.f32.xlu2 %v3414_v7  ;;  %3656 = vmatpush.msrb.mxu0 %v3485_v34  ;;  %v3476_v34 = vld [vmem:[#allocation2 + $0x250] sm:$0xff] }
0x16cb   :  { %3657 = vmatpush.msrb.mxu0 %v3469_v36  ;;  %v3528_v36 = vld [vmem:[#allocation2 + $0x3f0] sm:$0xff] }
0x16cd   :  { %3746 = vmatpush.msra.mxu0 %v3521_v43  ;;  %v3495_v43 = vld [vmem:[#allocation2 + $0x2e8] sm:$0xff] }
0x16cf   :  { %3747 = vmatpush.msra.mxu0 %v3505_v48  ;;  %v3480_v48 = vld [vmem:[#allocation2 + $0x270] sm:$0xff] }
0x16d1   :  { %3748 = vmatpush.msra.mxu0 %v3489_v54  ;;  %v4024_v54 = vld [vmem:[#allocation5 + $0x390] sm:$0xff] }
0x16d3   :  { %3749 = vmatpush.msra.mxu0 %v3473_v61  ;;  %v4008_v61 = vld [vmem:[#allocation5 + $0x310] sm:$0xff] }
0x1734   :  { %v3413_v13 = vpop.xlane.xlu1 %3412 }
0x1735   :  { %v3417_v15 = vmul.f32 %v3413_v13, %v5405_v60 }
0x1737   :  { %v5865_v16 = vsub.f32 %v3405_v5, %v3417_v15 }
0x1739   :  { %v3421_v17 = vmul.f32 %v5865_v16, %v5865_v16 }
0x173b   :  { %v3423_v30 = vsel %vm213_vm1, %v3421_v17, 0.0 }
0x173c   :  { %3424 = vadd.xlane.f32.xlu0 %v3423_v30  ;;  %v3416_v18 = vpop.xlane.xlu2 %3415  ;;  %v3522_v30 = vld [vmem:[#allocation2 + $0x3c0] sm:$0xff] }
0x173d   :  { %v3418_v19 = vmul.f32 %v3416_v18, %v5405_v60  ;;  %v3523_v18 = vld [vmem:[#allocation2 + $0x3c8] sm:$0xff] }
0x173f   :  { %v5871_v14 = vsub.f32 %v3406_v12, %v3418_v19  ;;  %v3524_v19 = vld [vmem:[#allocation2 + $0x3d0] sm:$0xff] }
0x1741   :  { %v3422_v35 = vmul.f32 %v5871_v14, %v5871_v14 }
0x1743   :  { %v3426_v20 = vsel %vm213_vm1, %v3422_v35, 0.0  ;;  %v3525_v35 = vld [vmem:[#allocation2 + $0x3d8] sm:$0xff] }
0x1744   :  { %3427 = vadd.xlane.f32.xlu1 %v3426_v20  ;;  %v3506_v20 = vld [vmem:[#allocation2 + $0x340] sm:$0xff] }
0x17af   :  { %v3425_v37 = vpop.xlane.xlu0 %3424 }
0x17b0   :  { %v3429_v38 = vmul.f32 %v3425_v37, %v5405_v60  ;;  %v3529_v37 = vld [vmem:[#allocation2 + $0x3f8] sm:$0xff] }
0x17b2   :  { %v3431_v39 = vadd.f32 1e-05, %v3429_v38  ;;  %v3510_v38 = vld [vmem:[#allocation2 + $0x360] sm:$0xff] }
0x17b4   :  { %4864 = vrsqrt.f32 %v3431_v39  ;;  %vm3439_vm10 = vweird.f32 %v3431_v39 }
0x17b7   :  { %v3428_v46 = vpop.xlane.xlu1 %3427 }
0x17b8   :  { %v3430_v52 = vmul.f32 %v3428_v46, %v5405_v60  ;;  %v3478_v46 = vld [vmem:[#allocation2 + $0x260] sm:$0xff] }
0x17ba   :  { %v4865_v57 = vpop.eup %4864  ;;  %v3432_v25 = vadd.f32 1e-05, %v3430_v52  ;;  %v4022_v52 = vld [vmem:[#allocation5 + $0x380] sm:$0xff] }
0x17bb   :  { %v3434_v62 = vmul.f32 %v4865_v57, %v3431_v39  ;;  %vm3440_vm2 = vweird.f32 %v4865_v57  ;;  %v3511_v39 = vld [vmem:[#allocation2 + $0x368] sm:$0xff] }
0x17bc   :  { %4866 = vrsqrt.f32 %v3432_v25  ;;  %vm3441_vm11 = vmor %vm3439_vm10, %vm3440_vm2  ;;  %vm3449_vm13 = vweird.f32 %v3432_v25 }
0x17bd   :  { %v3435_v49 = vmul.f32 %v4865_v57, %v3434_v62  ;;  %v3974_v62 = vld [vmem:[#allocation5 + $0x200] sm:$0xff] }
0x17bf   :  { %v3436_v59 = vmul.f32 0.5, %v3435_v49  ;;  %v3977_v49 = vld [vmem:[#allocation5 + $0x218] sm:$0xff] }
0x17c1   :  { %v3437_v1 = vsub.f32 1.5, %v3436_v59  ;;  %v3991_v59 = vld [vmem:[#allocation5 + $0x288] sm:$0xff] }
0x17c2   :  { %v4867_v2 = vpop.eup %4866 }
0x17c3   :  { %v3438_v50 = vmul.f32 %v4865_v57, %v3437_v1  ;;  %v3444_v3 = vmul.f32 %v4867_v2, %v3432_v25  ;;  %vm3450_vm12 = vweird.f32 %v4867_v2  ;;  %v3993_v25 = vld [vmem:[#allocation5 + $0x298] sm:$0xff]  ;;  %v3992_v1 = vld [vmem:[#allocation5 + $0x290] sm:$0xff] }
0x17c4   :  { %vm3451_vm14 = vmor %vm3449_vm13, %vm3450_vm12 }
0x17c5   :  { %v3442_v5 = vsel %vm3441_vm11, %v4865_v57, %v3438_v50  ;;  %v3445_v6 = vmul.f32 %v4867_v2, %v3444_v3  ;;  %v3990_v57 = vld [vmem:[#allocation5 + $0x280] sm:$0xff]  ;;  %v4029_v50 = vld [vmem:[#allocation5 + $0x3b8] sm:$0xff]  ;;  %v3975_v3 = vld [vmem:[#allocation5 + $0x208] sm:$0xff] }
0x17c6   :  { %v3453_v10 = vmul.f32 %v3442_v5, %v5865_v16  ;;  %v4010_v5 = vld [vmem:[#allocation5 + $0x320] sm:$0xff] }
0x17c7   :  { %v3446_v12 = vmul.f32 0.5, %v3445_v6  ;;  %v4013_v6 = vld [vmem:[#allocation5 + $0x338] sm:$0xff] }
0x17c8   :  { %v3458_v7 = vmul.f32 %v4785_v21, %v3453_v10  ;;  %v4028_v10 = vld [vmem:[#allocation5 + $0x3b0] sm:$0xff] }
0x17c9   :  { %v3447_v13 = vsub.f32 1.5, %v3446_v12  ;;  %v3994_v12 = vld [vmem:[#allocation5 + $0x2a0] sm:$0xff] }
0x17ca   :  { %v5885_v15 = vadd.f32 %v4786_v9, %v3458_v7  ;;  %v3997_v7 = vld [vmem:[#allocation5 + $0x2b8] sm:$0xff] }
0x17cb   :  { %v3448_v17 = vmul.f32 %v4867_v2, %v3447_v13  ;;  %v4011_v13 = vld [vmem:[#allocation5 + $0x328] sm:$0xff] }
0x17cc   :  { %4708 = vmatmul.msk.f32.vlgmr.msrb.gmra.mxu1 %vm213_vm1, %v5885_v15  ;;  %4710 = vmatmul.msk.f32.vlgmr.msra.gmra.mxu2 %vm213_vm1, %v5885_v15 }
0x17cd   :  { %v3452_v16 = vsel %vm3451_vm14, %v4867_v2, %v3448_v17  ;;  %4712 = vmatmul.msk.f32.vlgmr.msra.gmra.mxu3 %vm213_vm1, %v5885_v15  ;;  %4714 = vmatmul.msk.f32.vlgmr.msrb.gmra.mxu0 %vm213_vm1, %v5885_v15  ;;  %v4026_v2 = vld [vmem:[#allocation5 + $0x3a0] sm:$0xff]  ;;  %v4012_v17 = vld [vmem:[#allocation5 + $0x330] sm:$0xff] }
0x17ce   :  { %v3454_v24 = vmul.f32 %v3452_v16, %v5871_v14  ;;  %3769 = vmatpush.msrb.mxu1 %v3522_v30  ;;  %3792 = vmatpush.msra.mxu2 %v3523_v18  ;;  %v3474_v14 = vld [vmem:[#allocation2 + $0x240] sm:$0xff]  ;;  %v3981_v18 = vld [vmem:[#allocation5 + $0x238] sm:$0xff]  ;;  %v3979_v16 = vld [vmem:[#allocation5 + $0x228] sm:$0xff] }
0x17cf   :  { %3815 = vmatpush.msra.mxu3 %v3524_v19  ;;  %3838 = vmatpush.msrb.mxu0 %v3525_v35  ;;  %v3978_v30 = vld [vmem:[#allocation5 + $0x220] sm:$0xff]  ;;  %v3995_v19 = vld [vmem:[#allocation5 + $0x2a8] sm:$0xff]  ;;  %v3996_v35 = vld [vmem:[#allocation5 + $0x2b0] sm:$0xff] }
0x17d0   :  { %v3459_v31 = vmul.f32 %v4785_v21, %v3454_v24  ;;  %3770 = vmatpush.msrb.mxu1 %v3506_v20  ;;  %3793 = vmatpush.msra.mxu2 %v3507_v22  ;;  %v3976_v21 = vld [vmem:[#allocation5 + $0x210] sm:$0xff] }
0x17d1   :  { %3816 = vmatpush.msra.mxu3 %v3508_v26  ;;  %3839 = vmatpush.msrb.mxu0 %v3509_v27  ;;  %v3980_v20 = vld [vmem:[#allocation5 + $0x230] sm:$0xff] }
0x17d2   :  { %v5896_v23 = vadd.f32 %v4786_v9, %v3459_v31  ;;  %3771 = vmatpush.msrb.mxu1 %v3490_v28  ;;  %3794 = vmatpush.msra.mxu2 %v3491_v29  ;;  %v4027_v9 = vld [vmem:[#allocation5 + $0x3a8] sm:$0xff]  ;;  %v5957_v22 = vld [vmem:[%s6023_s17 + $0x10] sm:$0xff] }
0x17d3   :  { %3817 = vmatpush.msra.mxu3 %v3492_v32  ;;  %3840 = vmatpush.msrb.mxu0 %v3493_v63  ;;  %v3535_v24 = vperm.slane %v5957_v22, 0  ;;  %v3538_v26 = vperm.slane %v5957_v22, 3  ;;  %v3536_v63 = vperm.slane %v5957_v22, 1 }
0x17d4   :  { %4709 = vmatmul.msk.f32.gmra.mxu1 %vm213_vm1, %v5896_v23  ;;  %4711 = vmatmul.msk.f32.gmra.mxu2 %vm213_vm1, %v5896_v23 }
0x17d5   :  { %4713 = vmatmul.msk.f32.gmra.mxu3 %vm213_vm1, %v5896_v23  ;;  %4715 = vmatmul.msk.f32.gmra.mxu0 %vm213_vm1, %v5896_v23 }
0x17d6   :  { %3772 = vmatpush.msrb.mxu1 %v3474_v14  ;;  %3795 = vmatpush.msra.mxu2 %v3475_v33  ;;  %v4030_v14 = vld [vmem:[#allocation5 + $0x3c0] sm:$0xff] }
0x17d7   :  { %3818 = vmatpush.msra.mxu3 %v3476_v34  ;;  %3841 = vmatpush.msrb.mxu0 %v3477_v11  ;;  %v3537_v34 = vperm.slane %v5957_v22, 2  ;;  %v4033_v11 = vld [vmem:[#allocation5 + $0x3d8] sm:$0xff] }
0x17dc   :  { %4716 = vmatmul.msk.f32.vlgmr.msra.gmra.mxu1 %vm213_vm1, %v5885_v15  ;;  %4718 = vmatmul.msk.f32.vlgmr.msrb.gmra.mxu2 %vm213_vm1, %v5885_v15 }
0x17dd   :  { %4720 = vmatmul.msk.f32.vlgmr.msrb.gmra.mxu3 %vm213_vm1, %v5885_v15  ;;  %4722 = vmatmul.msk.f32.vlgmr.msra.gmra.mxu0 %vm213_vm1, %v5885_v15 }
0x17de   :  { %3861 = vmatpush.msra.mxu1 %v3526_v0  ;;  %3884 = vmatpush.msrb.mxu2 %v3527_v8 }
0x17df   :  { %3907 = vmatpush.msrb.mxu3 %v3528_v36  ;;  %3930 = vmatpush.msra.mxu0 %v3529_v37  ;;  %v4014_v37 = vld [vmem:[#allocation5 + $0x340] sm:$0xff] }
0x17e0   :  { %3862 = vmatpush.msra.mxu1 %v3510_v38  ;;  %3885 = vmatpush.msrb.mxu2 %v3511_v39 }
0x17e1   :  { %3908 = vmatpush.msrb.mxu3 %v3512_v40  ;;  %3931 = vmatpush.msra.mxu0 %v3513_v41  ;;  %v4017_v40 = vld [vmem:[#allocation5 + $0x358] sm:$0xff] }
0x17e2   :  { %3863 = vmatpush.msra.mxu1 %v3494_v42  ;;  %3886 = vmatpush.msrb.mxu2 %v3495_v43 }
0x17e3   :  { %3909 = vmatpush.msrb.mxu3 %v3496_v44  ;;  %3932 = vmatpush.msra.mxu0 %v3497_v45  ;;  %v4031_v44 = vld [vmem:[#allocation5 + $0x3c8] sm:$0xff] }
0x17e4   :  { %4717 = vmatmul.msk.f32.gmra.mxu1 %vm213_vm1, %v5896_v23  ;;  %4719 = vmatmul.msk.f32.gmra.mxu2 %vm213_vm1, %v5896_v23 }
0x17e5   :  { %4721 = vmatmul.msk.f32.gmra.mxu3 %vm213_vm1, %v5896_v23  ;;  %4723 = vmatmul.msk.f32.gmra.mxu0 %vm213_vm1, %v5896_v23 }
0x17e6   :  { %3864 = vmatpush.msra.mxu1 %v3478_v46  ;;  %3887 = vmatpush.msrb.mxu2 %v3479_v47  ;;  %v4032_v47 = vld [vmem:[#allocation5 + $0x3d0] sm:$0xff] }
0x17e7   :  { %3910 = vmatpush.msrb.mxu3 %v3480_v48  ;;  %3933 = vmatpush.msra.mxu0 %v3481_v51  ;;  %v3998_v51 = vld [vmem:[#allocation5 + $0x2c0] sm:$0xff] }
0x17ec   :  { %4724 = vmatmul.msk.f32.vlgmr.msrb.gmra.mxu1 %vm213_vm1, %v5885_v15  ;;  %4726 = vmatmul.msk.f32.vlgmr.msra.gmra.mxu2 %vm213_vm1, %v5885_v15 }
0x17ed   :  { %4728 = vmatmul.msk.f32.vlgmr.msra.gmra.mxu3 %vm213_vm1, %v5885_v15  ;;  %4730 = vmatmul.msk.f32.vlgmr.msrb.gmra.mxu0 %vm213_vm1, %v5885_v15 }
0x17ee   :  { %4055 = vmatpush.xpose.msrb.mxu1 %v4022_v52  ;;  %4124 = vmatpush.xpose.msrb.mxu0 %v4025_v53  ;;  %v4001_v53 = vld [vmem:[#allocation5 + $0x2d8] sm:$0xff] }
0x17ef   :  { %4078 = vmatpush.xpose.msra.mxu2 %v4023_v4  ;;  %4101 = vmatpush.xpose.msra.mxu3 %v4024_v54  ;;  %v3539_v4 = vperm.slane %v5957_v22, 4  ;;  %v4015_v54 = vld [vmem:[#allocation5 + $0x348] sm:$0xff] }
0x17f2   :  { %4056 = vmatpush.xpose.msrb.mxu1 %v4006_v55  ;;  %4125 = vmatpush.xpose.msrb.mxu0 %v4009_v56  ;;  %v3542_v56 = vperm.slane %v5957_v22, 7 }
0x17f3   :  { %4079 = vmatpush.xpose.msra.mxu2 %v4007_v58  ;;  %4102 = vmatpush.xpose.msra.mxu3 %v4008_v61  ;;  %v3982_v61 = vld [vmem:[#allocation5 + $0x240] sm:$0xff] }
0x17f4   :  { %4725 = vmatmul.msk.f32.gmra.mxu1 %vm213_vm1, %v5896_v23  ;;  %4727 = vmatmul.msk.f32.gmra.mxu2 %vm213_vm1, %v5896_v23 }
0x17f5   :  { %4729 = vmatmul.msk.f32.gmra.mxu3 %vm213_vm1, %v5896_v23  ;;  %4731 = vmatmul.msk.f32.gmra.mxu0 %vm213_vm1, %v5896_v23 }
0x17f6   :  { %4057 = vmatpush.xpose.msrb.mxu1 %v3990_v57  ;;  %4126 = vmatpush.xpose.msrb.mxu0 %v3993_v25  ;;  %v4016_v57 = vld [vmem:[#allocation5 + $0x350] sm:$0xff] }
0x17f7   :  { %4080 = vmatpush.xpose.msra.mxu2 %v3991_v59  ;;  %4103 = vmatpush.xpose.msra.mxu3 %v3992_v1  ;;  %v3985_v59 = vld [vmem:[#allocation5 + $0x258] sm:$0xff] }
0x17fa   :  { %4058 = vmatpush.xpose.msrb.mxu1 %v3974_v62  ;;  %4127 = vmatpush.xpose.msrb.mxu0 %v3977_v49 }
0x17fb   :  { %4081 = vmatpush.xpose.msra.mxu2 %v3975_v3  ;;  %4104 = vmatpush.xpose.msra.mxu3 %v3976_v21  ;;  %v3999_v3 = vld [vmem:[#allocation5 + $0x2c8] sm:$0xff] }
0x17fc   :  { %4732 = vmatmul.msk.f32.vlgmr.msra.gmra.mxu1 %vm213_vm1, %v5885_v15  ;;  %4734 = vmatmul.msk.f32.vlgmr.msrb.gmra.mxu2 %vm213_vm1, %v5885_v15 }
0x17fd   :  { %4736 = vmatmul.msk.f32.vlgmr.msrb.gmra.mxu3 %vm213_vm1, %v5885_v15  ;;  %4738 = vmatmul.msk.f32.vlgmr.msra.gmra.mxu0 %vm213_vm1, %v5885_v15 }
0x17fe   :  { %4147 = vmatpush.xpose.msra.mxu1 %v4026_v2  ;;  %4216 = vmatpush.xpose.msra.mxu0 %v4029_v50 }
0x17ff   :  { %4170 = vmatpush.xpose.msrb.mxu2 %v4027_v9  ;;  %4193 = vmatpush.xpose.msrb.mxu3 %v4028_v10  ;;  %v3540_v10 = vperm.slane %v5957_v22, 5 }
0x1802   :  { %4148 = vmatpush.xpose.msra.mxu1 %v4010_v5  ;;  %4217 = vmatpush.xpose.msra.mxu0 %v4013_v6  ;;  %v4000_v6 = vld [vmem:[#allocation5 + $0x2d0] sm:$0xff] }
0x1803   :  { %4171 = vmatpush.xpose.msrb.mxu2 %v4011_v13  ;;  %4194 = vmatpush.xpose.msrb.mxu3 %v4012_v17  ;;  %v3541_v13 = vperm.slane %v5957_v22, 6  ;;  %v4037_v17 = vld [vmem:[#allocation5 + $0x3f8] sm:$0xff] }
0x1804   :  { %4733 = vmatmul.msk.f32.gmra.mxu1 %vm213_vm1, %v5896_v23  ;;  %4735 = vmatmul.msk.f32.gmra.mxu2 %vm213_vm1, %v5896_v23 }
0x1805   :  { %4737 = vmatmul.msk.f32.gmra.mxu3 %vm213_vm1, %v5896_v23  ;;  %4739 = vmatmul.msk.f32.gmra.mxu0 %vm213_vm1, %v5896_v23 }
0x1806   :  { %4149 = vmatpush.xpose.msra.mxu1 %v3994_v12  ;;  %4218 = vmatpush.xpose.msra.mxu0 %v3997_v7  ;;  %v4034_v12 = vld [vmem:[#allocation5 + $0x3e0] sm:$0xff] }
0x1807   :  { %4172 = vmatpush.xpose.msrb.mxu2 %v3995_v19  ;;  %4195 = vmatpush.xpose.msrb.mxu3 %v3996_v35  ;;  %v3984_v19 = vld [vmem:[#allocation5 + $0x250] sm:$0xff] }
0x180a   :  { %4150 = vmatpush.xpose.msra.mxu1 %v3978_v30  ;;  %4219 = vmatpush.xpose.msra.mxu0 %v3981_v18  ;;  %v3983_v30 = vld [vmem:[#allocation5 + $0x248] sm:$0xff] }
0x180b   :  { %4173 = vmatpush.xpose.msrb.mxu2 %v3979_v16  ;;  %4196 = vmatpush.xpose.msrb.mxu3 %v3980_v20  ;;  %v4018_v20 = vld [vmem:[#allocation5 + $0x360] sm:$0xff] }
0x1849   :  { %v3590_v27 = vpop.f32.mrf.mxu1 }
0x184a   :  { %v3591_v28 = vadd.f32 %v3590_v27, %v3535_v24  ;;  %v3659_v29 = vpop.f32.mrf.mxu0  ;;  %v4021_v27 = vld [vmem:[#allocation5 + $0x378] sm:$0xff] }
0x184b   :  { %v3660_v31 = vadd.f32 %v3659_v29, %v3538_v26 }
0x184c   :  { %v3941_v32 = vmax.f32 %v3591_v28, 0.0 }
0x184d   :  { %v3944_v33 = vmax.f32 %v3660_v31, 0.0  ;;  %v4035_v31 = vld [vmem:[#allocation5 + $0x3e8] sm:$0xff] }
0x184e   :  { %4059 = vmatmul.f32.vlgmr.msrb.gmra.mxu1 %v3941_v32 }
0x184f   :  { %4128 = vmatmul.f32.vlgmr.msrb.gmra.mxu0 %v3944_v33  ;;  %v3613_v0 = vpop.f32.mrf.mxu2  ;;  %4239 = vmatpush.xpose.msrb.mxu1 %v4030_v14  ;;  %v5970_v14 = vld [vmem:[%s6023_s17 + $0x18] sm:$0xff]  ;;  %v4036_v33 = vld [vmem:[#allocation5 + $0x3f0] sm:$0xff] }
0x1850   :  { %v3614_v8 = vadd.f32 %v3613_v0, %v3536_v63  ;;  %v3636_v36 = vpop.f32.mrf.mxu3  ;;  %4308 = vmatpush.xpose.msrb.mxu0 %v4033_v11  ;;  %v4002_v11 = vld [vmem:[#allocation5 + $0x2e0] sm:$0xff] }
0x1851   :  { %v3637_v38 = vadd.f32 %v3636_v36, %v3537_v34  ;;  %v3593_v39 = vpop.f32.mrf.mxu1  ;;  %v3543_v36 = vperm.slane %v5970_v14, 0 }
0x1852   :  { %v3942_v41 = vmax.f32 %v3614_v8, 0.0  ;;  %v3594_v42 = vadd.f32 %v3593_v39, %v3535_v24  ;;  %v3662_v43 = vpop.f32.mrf.mxu0  ;;  %v4005_v8 = vld [vmem:[#allocation5 + $0x2f8] sm:$0xff]  ;;  %v3546_v39 = vperm.slane %v5970_v14, 3 }
0x1853   :  { %v3943_v45 = vmax.f32 %v3637_v38, 0.0  ;;  %v3663_v46 = vadd.f32 %v3662_v43, %v3538_v26  ;;  %4240 = vmatpush.xpose.msrb.mxu1 %v4014_v37  ;;  %v4019_v37 = vld [vmem:[#allocation5 + $0x368] sm:$0xff]  ;;  %v3986_v43 = vld [vmem:[#allocation5 + $0x260] sm:$0xff] }
0x1854   :  { %v3957_v48 = vmax.f32 %v3594_v42, 0.0  ;;  %4082 = vmatmul.f32.vlgmr.msra.gmra.mxu2 %v3942_v41  ;;  %4309 = vmatpush.xpose.msrb.mxu0 %v4017_v40  ;;  %v4020_v40 = vld [vmem:[#allocation5 + $0x370] sm:$0xff] }
0x1855   :  { %v3960_v52 = vmax.f32 %v3663_v46, 0.0  ;;  %4105 = vmatmul.f32.vlgmr.msra.gmra.mxu3 %v3943_v45  ;;  %4262 = vmatpush.xpose.msra.mxu2 %v4031_v44  ;;  %v3989_v46 = vld [vmem:[#allocation5 + $0x278] sm:$0xff] }
0x1856   :  { %4062 = vmatmul.f32.gmra.mxu1 %v3957_v48  ;;  %4285 = vmatpush.xpose.msra.mxu3 %v4032_v47 }
0x1857   :  { %4131 = vmatmul.f32.gmra.mxu0 %v3960_v52  ;;  %v3616_v55 = vpop.f32.mrf.mxu2  ;;  %4241 = vmatpush.xpose.msrb.mxu1 %v3998_v51  ;;  %v4003_v52 = vld [vmem:[#allocation5 + $0x2e8] sm:$0xff] }
0x1858   :  { %v3617_v25 = vadd.f32 %v3616_v55, %v3536_v63  ;;  %v3639_v58 = vpop.f32.mrf.mxu3  ;;  %4310 = vmatpush.xpose.msrb.mxu0 %v4001_v53 }
0x1859   :  { %v3640_v62 = vadd.f32 %v3639_v58, %v3537_v34  ;;  %v3682_v49 = vpop.f32.mrf.mxu1  ;;  %4263 = vmatpush.xpose.msra.mxu2 %v4015_v54  ;;  %v4004_v54 = vld [vmem:[#allocation5 + $0x2f0] sm:$0xff]  ;;  %v3987_v58 = vld [vmem:[#allocation5 + $0x268] sm:$0xff] }
0x185a   :  { %v3958_v1 = vmax.f32 %v3617_v25, 0.0  ;;  %v3683_v2 = vadd.f32 %v3682_v49, %v3539_v4  ;;  %v3751_v50 = vpop.f32.mrf.mxu0  ;;  %4286 = vmatpush.xpose.msra.mxu3 %v4016_v57  ;;  %v3545_v25 = vperm.slane %v5970_v14, 2 }
0x185b   :  { %v3959_v21 = vmax.f32 %v3640_v62, 0.0  ;;  %v3752_v5 = vadd.f32 %v3751_v50, %v3542_v56  ;;  %4242 = vmatpush.xpose.msrb.mxu1 %v3982_v61  ;;  %v3988_v62 = vld [vmem:[#allocation5 + $0x270] sm:$0xff] }
0x185c   :  { %v3945_v9 = vmax.f32 %v3683_v2, 0.0  ;;  %4085 = vmatmul.f32.gmra.mxu2 %v3958_v1  ;;  %4311 = vmatpush.xpose.msrb.mxu0 %v3985_v59 }
0x185d   :  { %v3948_v7 = vmax.f32 %v3752_v5, 0.0  ;;  %4108 = vmatmul.f32.gmra.mxu3 %v3959_v21  ;;  %4264 = vmatpush.xpose.msra.mxu2 %v3999_v3 }
0x185e   :  { %4151 = vmatmul.f32.vlgmr.msra.gmra.mxu1 %v3945_v9  ;;  %4287 = vmatpush.xpose.msra.mxu3 %v4000_v6 }
0x185f   :  { %4220 = vmatmul.f32.vlgmr.msra.gmra.mxu0 %v3948_v7  ;;  %v3705_v18 = vpop.f32.mrf.mxu2  ;;  %4331 = vmatpush.xpose.msra.mxu1 %v4034_v12  ;;  %v3547_v12 = vperm.slane %v5970_v14, 4 }
0x1860   :  { %v3706_v35 = vadd.f32 %v3705_v18, %v3540_v10  ;;  %v3728_v16 = vpop.f32.mrf.mxu3  ;;  %4400 = vmatpush.xpose.msra.mxu0 %v4037_v17 }
0x1861   :  { %v3729_v24 = vadd.f32 %v3728_v16, %v3541_v13  ;;  %v3685_v26 = vpop.f32.mrf.mxu1  ;;  %4265 = vmatpush.xpose.msra.mxu2 %v3983_v30 }
0x1862   :  { %v3946_v28 = vmax.f32 %v3706_v35, 0.0  ;;  %v3686_v29 = vadd.f32 %v3685_v26, %v3539_v4  ;;  %v3754_v22 = vpop.f32.mrf.mxu0  ;;  %4288 = vmatpush.xpose.msra.mxu3 %v3984_v19 }
0x1863   :  { %v3947_v32 = vmax.f32 %v3729_v24, 0.0  ;;  %v3755_v63 = vadd.f32 %v3754_v22, %v3542_v56  ;;  %4332 = vmatpush.xpose.msra.mxu1 %v4018_v20  ;;  %v3544_v56 = vperm.slane %v5970_v14, 1  ;;  %v3549_v22 = vperm.slane %v5970_v14, 6 }
0x1864   :  { %v3961_v34 = vmax.f32 %v3686_v29, 0.0  ;;  %4174 = vmatmul.f32.vlgmr.msrb.gmra.mxu2 %v3946_v28  ;;  %4401 = vmatpush.xpose.msra.mxu0 %v4021_v27  ;;  %v3548_v28 = vperm.slane %v5970_v14, 5 }
0x1865   :  { %v3964_v0 = vmax.f32 %v3755_v63, 0.0  ;;  %4197 = vmatmul.f32.vlgmr.msrb.gmra.mxu3 %v3947_v32  ;;  %4354 = vmatpush.xpose.msrb.mxu2 %v4035_v31 }
0x1866   :  { %4154 = vmatmul.f32.gmra.mxu1 %v3961_v34  ;;  %4377 = vmatpush.xpose.msrb.mxu3 %v4036_v33 }
0x1867   :  { %4223 = vmatmul.f32.gmra.mxu0 %v3964_v0  ;;  %v3708_v38 = vpop.f32.mrf.mxu2  ;;  %4333 = vmatpush.xpose.msra.mxu1 %v4002_v11 }
0x1868   :  { %v3709_v41 = vadd.f32 %v3708_v38, %v3540_v10  ;;  %v3731_v42 = vpop.f32.mrf.mxu3  ;;  %4402 = vmatpush.xpose.msra.mxu0 %v4005_v8 }
0x1869   :  { %v3732_v44 = vadd.f32 %v3731_v42, %v3541_v13  ;;  %v3774_v45 = vpop.f32.mrf.mxu1  ;;  %4355 = vmatpush.xpose.msrb.mxu2 %v4019_v37  ;;  %v3550_v13 = vperm.slane %v5970_v14, 7 }
0x186a   :  { %v3962_v47 = vmax.f32 %v3709_v41, 0.0  ;;  %v3775_v48 = vadd.f32 %v3774_v45, %v3543_v36  ;;  %v3843_v51 = vpop.f32.mrf.mxu0  ;;  %4378 = vmatpush.xpose.msrb.mxu3 %v4020_v40 }
0x186b   :  { %v3963_v53 = vmax.f32 %v3732_v44, 0.0  ;;  %v3844_v4 = vadd.f32 %v3843_v51, %v3546_v39  ;;  %4334 = vmatpush.xpose.msra.mxu1 %v3986_v43 }
0x186c   :  { %v3949_v55 = vmax.f32 %v3775_v48, 0.0  ;;  %4177 = vmatmul.f32.gmra.mxu2 %v3962_v47  ;;  %4403 = vmatpush.xpose.msra.mxu0 %v3989_v46 }
0x186d   :  { %v3952_v57 = vmax.f32 %v3844_v4, 0.0  ;;  %4200 = vmatmul.f32.gmra.mxu3 %v3963_v53  ;;  %4356 = vmatpush.xpose.msrb.mxu2 %v4003_v52  ;;  %v4787_v52 = vld [vmem:[%s6025_s19 + $0x1] ss:$0 sm:$0xff] }
0x186e   :  { %4243 = vmatmul.f32.vlgmr.msrb.gmra.mxu1 %v3949_v55  ;;  %4379 = vmatpush.xpose.msrb.mxu3 %v4004_v54 }
0x186f   :  { %4312 = vmatmul.f32.vlgmr.msrb.gmra.mxu0 %v3952_v57  ;;  %v3797_v61 = vpop.f32.mrf.mxu2 }
0x1870   :  { %v3798_v49 = vadd.f32 %v3797_v61, %v3544_v56  ;;  %v3820_v59 = vpop.f32.mrf.mxu3 }
0x1871   :  { %v3821_v1 = vadd.f32 %v3820_v59, %v3545_v25  ;;  %v3777_v2 = vpop.f32.mrf.mxu1  ;;  %4357 = vmatpush.xpose.msrb.mxu2 %v3987_v58 }
0x1872   :  { %v3950_v50 = vmax.f32 %v3798_v49, 0.0  ;;  %v3778_v3 = vadd.f32 %v3777_v2, %v3543_v36  ;;  %v3846_v21 = vpop.f32.mrf.mxu0  ;;  %4380 = vmatpush.xpose.msrb.mxu3 %v3988_v62 }
0x1873   :  { %v3951_v5 = vmax.f32 %v3821_v1, 0.0  ;;  %v3847_v6 = vadd.f32 %v3846_v21, %v3546_v39 }
0x1874   :  { %v3965_v9 = vmax.f32 %v3778_v3, 0.0  ;;  %4266 = vmatmul.f32.vlgmr.msra.gmra.mxu2 %v3950_v50 }
0x1875   :  { %v3968_v10 = vmax.f32 %v3847_v6, 0.0  ;;  %4289 = vmatmul.f32.vlgmr.msra.gmra.mxu3 %v3951_v5 }
0x1876   :  { %4246 = vmatmul.f32.gmra.mxu1 %v3965_v9 }
0x1877   :  { %4315 = vmatmul.f32.gmra.mxu0 %v3968_v10  ;;  %v3800_v7 = vpop.f32.mrf.mxu2 }
0x1878   :  { %v3801_v17 = vadd.f32 %v3800_v7, %v3544_v56  ;;  %v3823_v30 = vpop.f32.mrf.mxu3 }
0x1879   :  { %v3824_v18 = vadd.f32 %v3823_v30, %v3545_v25  ;;  %v3866_v19 = vpop.f32.mrf.mxu1 }
0x187a   :  { %v3966_v35 = vmax.f32 %v3801_v17, 0.0  ;;  %v3867_v16 = vadd.f32 %v3866_v19, %v3547_v12  ;;  %v3935_v20 = vpop.f32.mrf.mxu0 }
0x187b   :  { %v3967_v24 = vmax.f32 %v3824_v18, 0.0  ;;  %v3936_v26 = vadd.f32 %v3935_v20, %v3550_v13 }
0x187c   :  { %v3953_v27 = vmax.f32 %v3867_v16, 0.0  ;;  %4269 = vmatmul.f32.gmra.mxu2 %v3966_v35 }
0x187d   :  { %v3956_v29 = vmax.f32 %v3936_v26, 0.0  ;;  %4292 = vmatmul.f32.gmra.mxu3 %v3967_v24 }
0x187e   :  { %4335 = vmatmul.f32.vlgmr.msra.gmra.mxu1 %v3953_v27 }
0x187f   :  { %4404 = vmatmul.f32.vlgmr.msra.gmra.mxu0 %v3956_v29  ;;  %v3889_v31 = vpop.f32.mrf.mxu2 }
0x1880   :  { %v3890_v32 = vadd.f32 %v3889_v31, %v3548_v28  ;;  %v3912_v63 = vpop.f32.mrf.mxu3 }
0x1881   :  { %v3913_v33 = vadd.f32 %v3912_v63, %v3549_v22  ;;  %v3869_v34 = vpop.f32.mrf.mxu1 }
0x1882   :  { %v3954_v11 = vmax.f32 %v3890_v32, 0.0  ;;  %v3870_v0 = vadd.f32 %v3869_v34, %v3547_v12  ;;  %v3938_v8 = vpop.f32.mrf.mxu0 }
0x1883   :  { %v3955_v36 = vmax.f32 %v3913_v33, 0.0  ;;  %v3939_v37 = vadd.f32 %v3938_v8, %v3550_v13 }
0x1884   :  { %v3969_v38 = vmax.f32 %v3870_v0, 0.0  ;;  %4358 = vmatmul.f32.vlgmr.msrb.gmra.mxu2 %v3954_v11 }
0x1885   :  { %v3972_v39 = vmax.f32 %v3939_v37, 0.0  ;;  %4381 = vmatmul.f32.vlgmr.msrb.gmra.mxu3 %v3955_v36 }
0x1886   :  { %4338 = vmatmul.f32.gmra.mxu1 %v3969_v38 }
0x1887   :  { %4407 = vmatmul.f32.gmra.mxu0 %v3972_v39  ;;  %v3892_v40 = vpop.f32.mrf.mxu2 }
0x1888   :  { %v3893_v14 = vadd.f32 %v3892_v40, %v3548_v28  ;;  %v3915_v41 = vpop.f32.mrf.mxu3 }
0x1889   :  { %v3916_v42 = vadd.f32 %v3915_v41, %v3549_v22 }
0x188a   :  { %v3970_v43 = vmax.f32 %v3893_v14, 0.0 }
0x188b   :  { %v3971_v44 = vmax.f32 %v3916_v42, 0.0 }
0x188c   :  { %4361 = vmatmul.f32.gmra.mxu2 %v3970_v43 }
0x188d   :  { %4384 = vmatmul.f32.gmra.mxu3 %v3971_v44 }
0x18cb   :  { %v4060_v45 = vpop.f32.mrf.mxu1 }
0x18cc   :  { %v4129_v46 = vpop.f32.mrf.mxu0  ;;  %v4061_v54 = vadd.f32 %v4787_v52, %v4060_v45 }
0x18d3   :  { %v4063_v47 = vpop.f32.mrf.mxu1 }
0x18d4   :  { %v4132_v48 = vpop.f32.mrf.mxu0  ;;  %v4064_v61 = vadd.f32 %v4787_v52, %v4063_v47 }
0x18d7   :  { %v4083_v51 = vpop.f32.mrf.mxu2 }
0x18d8   :  { %v4106_v53 = vpop.f32.mrf.mxu3  ;;  %v4084_v55 = vadd.f32 %v4083_v51, %v4061_v54 }
0x18da   :  { %v4107_v58 = vadd.f32 %v4106_v53, %v4084_v55 }
0x18db   :  { %v4152_v4 = vpop.f32.mrf.mxu1 }
0x18dc   :  { %v4221_v25 = vpop.f32.mrf.mxu0  ;;  %v4130_v49 = vadd.f32 %v4129_v46, %v4107_v58 }
0x18de   :  { %v4153_v50 = vadd.f32 %v4152_v4, %v4130_v49 }
0x18df   :  { %v4086_v56 = vpop.f32.mrf.mxu2 }
0x18e0   :  { %v4109_v57 = vpop.f32.mrf.mxu3  ;;  %v4087_v59 = vadd.f32 %v4086_v56, %v4064_v61 }
0x18e2   :  { %v4110_v3 = vadd.f32 %v4109_v57, %v4087_v59 }
0x18e3   :  { %v4155_v62 = vpop.f32.mrf.mxu1 }
0x18e4   :  { %v4224_v21 = vpop.f32.mrf.mxu0  ;;  %v4133_v6 = vadd.f32 %v4132_v48, %v4110_v3 }
0x18e6   :  { %v4156_v13 = vadd.f32 %v4155_v62, %v4133_v6 }
0x18e7   :  { %v4175_v1 = vpop.f32.mrf.mxu2 }
0x18e8   :  { %v4198_v2 = vpop.f32.mrf.mxu3  ;;  %v4176_v5 = vadd.f32 %v4175_v1, %v4153_v50 }
0x18ea   :  { %v4199_v12 = vadd.f32 %v4198_v2, %v4176_v5 }
0x18eb   :  { %v4244_v9 = vpop.f32.mrf.mxu1 }
0x18ec   :  { %v4222_v17 = vadd.f32 %v4221_v25, %v4199_v12  ;;  %v4313_v18 = vpop.f32.mrf.mxu0 }
0x18ee   :  { %v4245_v35 = vadd.f32 %v4244_v9, %v4222_v17  ;;  %v4788_v17 = vld [vmem:[%s6020_s14 + $0x1] ss:$0 sm:$0xff]  ;;  %s4955_s14 = smov [#allocation7]  }
0x18ef   :  { %v4178_v10 = vpop.f32.mrf.mxu2  ;;  %s4477_s22 = sshll.u32 %s4955_s14, 4  ;;  %s4478_s22 = int_to_ptr.vmem [resolvable:$true] %s4477_s22 }
0x18f0   :  { %v4201_v7 = vpop.f32.mrf.mxu3  ;;  %v4179_v30 = vadd.f32 %v4178_v10, %v4156_v13 }
0x18f2   :  { %v4202_v16 = vadd.f32 %v4201_v7, %v4179_v30 }
0x18f3   :  { %v4247_v24 = vpop.f32.mrf.mxu1 }
0x18f4   :  { %v4225_v27 = vadd.f32 %v4224_v21, %v4202_v16  ;;  %v4316_v29 = vpop.f32.mrf.mxu0 }
0x18f6   :  { %v4248_v31 = vadd.f32 %v4247_v24, %v4225_v27 }
0x18f7   :  { %v4267_v19 = vpop.f32.mrf.mxu2 }
0x18f8   :  { %v4290_v20 = vpop.f32.mrf.mxu3  ;;  %v4268_v26 = vadd.f32 %v4267_v19, %v4245_v35  ;;  %v4789_v19 = vld [vmem:[%s6021_s15 + $0x1] ss:$0 sm:$0xff]  ;;  %s4956_s15 = smov 8  }
0x18fa   :  { %v4291_v28 = vadd.f32 %v4290_v20, %v4268_v26 }
0x18fb   :  { %v4336_v34 = vpop.f32.mrf.mxu1 }
0x18fc   :  { %v4314_v63 = vadd.f32 %v4313_v18, %v4291_v28  ;;  %v4405_v38 = vpop.f32.mrf.mxu0 }
0x18fe   :  { %v4337_v11 = vadd.f32 %v4336_v34, %v4314_v63 }
0x18ff   :  { %v4270_v22 = vpop.f32.mrf.mxu2 }
0x1900   :  { %v4293_v32 = vpop.f32.mrf.mxu3  ;;  %v4271_v33 = vadd.f32 %v4270_v22, %v4248_v31 }
0x1902   :  { %v4294_v0 = vadd.f32 %v4293_v32, %v4271_v33 }
0x1903   :  { %v4339_v41 = vpop.f32.mrf.mxu1 }
0x1904   :  { %v4317_v39 = vadd.f32 %v4316_v29, %v4294_v0  ;;  %v4408_v51 = vpop.f32.mrf.mxu0 }
0x1906   :  { %v4340_v42 = vadd.f32 %v4339_v41, %v4317_v39 }
0x1907   :  { %v4359_v8 = vpop.f32.mrf.mxu2 }
0x1908   :  { %v4360_v36 = vadd.f32 %v4359_v8, %v4337_v11  ;;  %v4382_v37 = vpop.f32.mrf.mxu3 }
0x190a   :  { %v4383_v40 = vadd.f32 %v4382_v37, %v4360_v36 }
0x190c   :  { %v4406_v14 = vadd.f32 %v4405_v38, %v4383_v40 }
0x190e   :  { %v4411_v43 = vadd.f32 %v4406_v14, %v5885_v15 }
0x190f   :  { %v4362_v44 = vpop.f32.mrf.mxu2 }
0x1910   :  { %v4363_v45 = vadd.f32 %v4362_v44, %v4340_v42  ;;  %v4417_v46 = vsel %vm213_vm1, %v4411_v43, 0.0  ;;  %v4385_v47 = vpop.f32.mrf.mxu3 }
0x1911   :  { %4418 = vadd.xlane.f32.xlu2 %v4417_v46 }
0x1912   :  { %v4386_v48 = vadd.f32 %v4385_v47, %v4363_v45 }
0x1914   :  { %v4409_v52 = vadd.f32 %v4408_v51, %v4386_v48 }
0x1916   :  { %v4412_v53 = vadd.f32 %v4409_v52, %v5896_v23 }
0x1918   :  { %v4420_v4 = vsel %vm213_vm1, %v4412_v53, 0.0 }
0x1919   :  { %4421 = vadd.xlane.f32.xlu0 %v4420_v4 }
0x1984   :  { %v4419_v54 = vpop.xlane.xlu2 %4418 }
0x1985   :  { %v4423_v55 = vmul.f32 %v4419_v54, %v5405_v60 }
0x1987   :  { %v4425_v56 = vsub.f32 %v4411_v43, %v4423_v55 }
0x1989   :  { %v4427_v57 = vmul.f32 %v4425_v56, %v4425_v56 }
0x198b   :  { %v4429_v15 = vsel %vm213_vm1, %v4427_v57, 0.0 }
0x198c   :  { %4430 = vadd.xlane.f32.xlu1 %v4429_v15  ;;  %v4422_v25 = vpop.xlane.xlu0 %4421 }
0x198d   :  { %v4424_v58 = vmul.f32 %v4422_v25, %v5405_v60 }
0x198f   :  { %v4426_v61 = vsub.f32 %v4412_v53, %v4424_v58 }
0x1991   :  { %v4428_v62 = vmul.f32 %v4426_v61, %v4426_v61 }
0x1993   :  { %v4432_v49 = vsel %vm213_vm1, %v4428_v62, 0.0 }
0x1994   :  { %4433 = vadd.xlane.f32.xlu2 %v4432_v49 }
0x19ff   :  { %v4431_v23 = vpop.xlane.xlu1 %4430 }
0x1a00   :  { %v4435_v59 = vmul.f32 %v4431_v23, %v5405_v60 }
0x1a02   :  { %v4437_v1 = vadd.f32 1e-05, %v4435_v59 }
0x1a04   :  { %4868 = vrsqrt.f32 %v4437_v1  ;;  %vm4445_vm0 = vweird.f32 %v4437_v1 }
0x1a07   :  { %v4434_v2 = vpop.xlane.xlu2 %4433 }
0x1a08   :  { %v4436_v50 = vmul.f32 %v4434_v2, %v5405_v60 }
0x1a0a   :  { %v4869_v3 = vpop.eup %4868  ;;  %v4438_v21 = vadd.f32 1e-05, %v4436_v50 }
0x1a0b   :  { %v4440_v5 = vmul.f32 %v4869_v3, %v4437_v1  ;;  %vm4446_vm15 = vweird.f32 %v4869_v3 }
0x1a0c   :  { %4870 = vrsqrt.f32 %v4438_v21  ;;  %vm4447_vm3 = vmor %vm4445_vm0, %vm4446_vm15  ;;  %vm4455_vm5 = vweird.f32 %v4438_v21 }
0x1a0d   :  { %v4441_v6 = vmul.f32 %v4869_v3, %v4440_v5 }
0x1a0f   :  { %v4442_v9 = vmul.f32 0.5, %v4441_v6 }
0x1a11   :  { %v4443_v10 = vsub.f32 1.5, %v4442_v9 }
0x1a12   :  { %v4871_v12 = vpop.eup %4870 }
0x1a13   :  { %v4444_v7 = vmul.f32 %v4869_v3, %v4443_v10  ;;  %v4450_v13 = vmul.f32 %v4871_v12, %v4438_v21  ;;  %vm4456_vm4 = vweird.f32 %v4871_v12 }
0x1a14   :  { %vm4457_vm6 = vmor %vm4455_vm5, %vm4456_vm4 }
0x1a15   :  { %v4448_v30 = vsel %vm4447_vm3, %v4869_v3, %v4444_v7  ;;  %v4451_v18 = vmul.f32 %v4871_v12, %v4450_v13 }
0x1a16   :  { %v4459_v60 = vmul.f32 %v4448_v30, %v4425_v56 }
0x1a17   :  { %v4452_v35 = vmul.f32 0.5, %v4451_v18 }
0x1a18   :  { %v4464_v16 = vmul.f32 %v4788_v17, %v4459_v60 }
0x1a19   :  { %v4453_v20 = vsub.f32 1.5, %v4452_v35 }
0x1a1a   :  { %v4469_v24 = vadd.f32 %v4789_v19, %v4464_v16 }
0x1a1b   :  { %v4454_v26 = vmul.f32 %v4871_v12, %v4453_v20 }
0x1a1c   :  { %4471 = vst.msk [vmem:[#allocation7] sm:$0xff] %vm213_vm1, %v4469_v24 }
0x1a1d   :  { %v4458_v27 = vsel %vm4457_vm6, %v4871_v12, %v4454_v26 }
0x1a1e   :  { %v4460_v28 = vmul.f32 %v4458_v27, %v4426_v61 }
0x1a20   :  { %v4465_v29 = vmul.f32 %v4788_v17, %v4460_v28 }
0x1a22   :  { %v4470_v22 = vadd.f32 %v4789_v19, %v4465_v29 }
0x1a24   :  { %4472 = vst.msk [vmem:[#allocation7 + $0x8] sm:$0xff] %vm213_vm1, %v4470_v22 }
0x1a25   :  { %4485 = dma.vmem_to_hbm [thread:$0]  %s4478_s22, 256, %s4480_s4, [#allocation4], %s4952_s28, %s4952_s28, %s4956_s15  }
0x1a26   :  { %4948 = dma.done.wait [#allocation4], 256  }
0x1a27   :  { %4949 = vsyncadd [#allocation4], 4294967040 }
0x1a28   :  { %4490 = vsyncpa [#allocation3], 1 }
0x1a29   :  { %4491 = vsyncpa [#allocation6], 1 }
0x1a2a   :  { %4492 = vsyncpa [#allocation4], 1 }

</bundles_post_ra>
